<compile_context>
chip_gen: v5e
topology: v5e:2x2
jax: 0.10.0
libtpu: 0.0.40
codegen_flags: <defaults>
</compile_context>

<pallas_src>
import functools

import numpy as np
import jax
import jax.numpy as jnp
from jax.experimental import pallas as pl
from jax.experimental.pallas import tpu as pltpu


# Conservative scoped-VMEM budget: fits v7x (64 MiB physical) as well as
# v5e/v6e, with headroom for double-buffered input pipelines.
_VMEM_LIMIT = 32 * 1024 * 1024


# ----------------------------------------------------------------------------
# Row-tiled linear kernel (used for the hoisted QKV and output projections)
# ----------------------------------------------------------------------------

def _linear_kernel(x_ref, w_ref, b_ref, o_ref):
    acc = jnp.dot(x_ref[...], w_ref[...], preferred_element_type=jnp.float32)
    acc = acc + b_ref[...]                       # bias add stays in f32
    o_ref[...] = acc.astype(o_ref.dtype)


def pallas_linear(x, w, b=None, out_dtype=None, block_m=256):
    """y = x @ w + b.  x:(M,K), w:(K,N), b:(N,)|None -> (M,N).

    MXU operands are cast to bf16; accumulation and bias add are f32.
    Rows are tiled by block_m (multiple of 256 fills the MXU on v6e/v7x and
    gives the pipeline double-buffering + a 'parallel' axis for megacore).
    K and N are kept whole: for Swin dims the (K, N) weight tile easily fits
    VMEM.  # TODO(synk): add K/N tiling with a VMEM accumulator for very
    large channel counts.
    """
    M, K = x.shape
    N = w.shape[1]
    out_dtype = out_dtype or x.dtype

    tm = min(block_m, M)
    if tm % 8 != 0:          # keep the (8, 128) sublane rule satisfied
        tm = M
    grid_m = pl.cdiv(M, tm)
    Mp = grid_m * tm
    if Mp != M:
        x = jnp.pad(x, ((0, Mp - M), (0, 0)))

    xb = x.astype(jnp.bfloat16)
    wb = w.astype(jnp.bfloat16)
    b2 = (jnp.zeros((N,), jnp.float32) if b is None
          else b.astype(jnp.float32)).reshape(1, N)

    out = pl.pallas_call(
        _linear_kernel,
        out_shape=jax.ShapeDtypeStruct((Mp, N), out_dtype),
        grid=(grid_m,),
        in_specs=[
            pl.BlockSpec((tm, K), lambda i: (i, 0)),
            pl.BlockSpec((K, N), lambda i: (0, 0)),
            pl.BlockSpec((1, N), lambda i: (0, 0)),
        ],
        out_specs=pl.BlockSpec((tm, N), lambda i: (i, 0)),
        compiler_params=pltpu.CompilerParams(
            dimension_semantics=("parallel",),
            vmem_limit_bytes=_VMEM_LIMIT),
    )(xb, wb, b2)
    return out[:M] if Mp != M else out


# ----------------------------------------------------------------------------
# Batched-window attention core kernel: QK^T + bias (+ mask) + softmax + AV
# ----------------------------------------------------------------------------

def _window_attn_kernel(q_ref, k_ref, v_ref, bias_ref, *rest, scale, has_mask):
    if has_mask:
        mask_ref, o_ref = rest
    else:
        (o_ref,) = rest
    Wb, H, N, D = q_ref.shape

    # Merge window & head axes (leading-dim merge: layout-free) and run
    # batched matmuls on the MXU with f32 accumulation.
    q = q_ref[...].reshape(Wb * H, N, D)
    k = k_ref[...].reshape(Wb * H, N, D)
    v = v_ref[...].reshape(Wb * H, N, D)

    s = jnp.einsum("bnd,bmd->bnm", q, k,
                   preferred_element_type=jnp.float32) * scale   # (Wb*H, N, N)

    s = s.reshape(Wb, H, N, N) + bias_ref[...][None]             # rel-pos bias
    if has_mask:
        s = s + mask_ref[...][:, None]                           # shift mask
    s = s.reshape(Wb * H, N, N)

    # Numerically stable softmax in f32; normalization via EUP approx recip.
    s = s - jnp.max(s, axis=-1, keepdims=True)
    e = jnp.exp(s)
    p = e * pl.reciprocal(jnp.sum(e, axis=-1, keepdims=True), approx=True)

    o = jnp.einsum("bnm,bmd->bnd", p.astype(v.dtype), v,
                   preferred_element_type=jnp.float32)
    o_ref[...] = o.reshape(Wb, H, N, D).astype(o_ref.dtype)


def pallas_window_attention_core(q, k, v, rel_bias, mask, scale, block_w=16):
    """q,k,v: (B_, H, N, D); rel_bias: (H, N, N); mask: (nW, N, N) or None."""
    B_, H, N, D = q.shape
    has_mask = mask is not None

    # Wb windows per grid step; must divide B_ (and nW when masked, so the
    # modular mask index_map stays block-aligned).
    limit = mask.shape[0] if has_mask else B_
    Wb = max(d for d in range(1, min(block_w, limit) + 1)
             if limit % d == 0 and B_ % d == 0)
    grid = (B_ // Wb,)

    qkv_spec = pl.BlockSpec((Wb, H, N, D), lambda i: (i, 0, 0, 0))
    in_specs = [qkv_spec, qkv_spec, qkv_spec,
                pl.BlockSpec((H, N, N), lambda i: (0, 0, 0))]
    args = [q, k, v, rel_bias.astype(jnp.float32)]
    if has_mask:
        nW = mask.shape[0]
        n_mask_blocks = nW // Wb
        in_specs.append(
            pl.BlockSpec((Wb, N, N), lambda i: (i % n_mask_blocks, 0, 0)))
        args.append(mask.astype(jnp.float32))

    kernel = functools.partial(_window_attn_kernel, scale=scale,
                               has_mask=has_mask)
    return pl.pallas_call(
        kernel,
        out_shape=jax.ShapeDtypeStruct((B_, H, N, D), q.dtype),
        grid=grid,
        in_specs=in_specs,
        out_specs=pl.BlockSpec((Wb, H, N, D), lambda i: (i, 0, 0, 0)),
        compiler_params=pltpu.CompilerParams(
            dimension_semantics=("parallel",),
            vmem_limit_bytes=_VMEM_LIMIT),
    )(*args)


# ----------------------------------------------------------------------------
# Static helpers (numpy) — identical math to the PyTorch buffers
# ----------------------------------------------------------------------------

def relative_position_index(ws):
    coords = np.stack(np.meshgrid(np.arange(ws), np.arange(ws), indexing="ij"))
    cf = coords.reshape(2, -1)
    rel = cf[:, :, None] - cf[:, None, :]
    rel = rel.transpose(1, 2, 0).copy()
    rel[:, :, 0] += ws - 1
    rel[:, :, 1] += ws - 1
    rel[:, :, 0] *= 2 * ws - 1
    return rel.sum(-1)                               # (N, N) int


def compute_shift_mask(H, W, ws, shift):
    """Swin shifted-window attention mask, shape (nW, N, N) with 0 / -100."""
    Hp = int(np.ceil(H / ws)) * ws
    Wp = int(np.ceil(W / ws)) * ws
    img_mask = np.zeros((Hp, Wp), dtype=np.float32)
    slices = (slice(0, -ws), slice(-ws, -shift), slice(-shift, None))
    cnt = 0
    for h in slices:
        for w in slices:
            img_mask[h, w] = cnt
            cnt += 1
    mw = img_mask.reshape(Hp // ws, ws, Wp // ws, ws)
    mw = mw.transpose(0, 2, 1, 3).reshape(-1, ws * ws)          # (nW, N)
    am = mw[:, None, :] - mw[:, :, None]
    return np.where(am != 0, -100.0, 0.0).astype(np.float32)    # (nW, N, N)


# ----------------------------------------------------------------------------
# Full WindowAttention forward (matches the PyTorch module semantics)
# ----------------------------------------------------------------------------

def window_attention_forward(x, params, window_size, num_heads, mask=None,
                             qk_scale=None):
    """x: (B_, N, C) window tokens, mask: (nW, N, N) or None -> (B_, N, C)."""
    B_, N, C = x.shape
    D = C // num_heads
    scale = qk_scale or D ** (-0.5)

    # Relative-position bias (static index; gather is cheap wrapper-side XLA).
    idx = relative_position_index(window_size)                    # (N, N)
    bias = params["rel_table"][idx.reshape(-1)]
    bias = bias.reshape(N, N, num_heads).transpose(2, 0, 1)       # (H, N, N)

    # 1) Hoisted QKV projection over all tokens (MXU-shaped tiled matmul).
    qkv = pallas_linear(x.reshape(B_ * N, C), params["wqkv"], params["bqkv"],
                        out_dtype=jnp.bfloat16)                   # (B_*N, 3C)

    # 2) Head split: wrapper-side layout plumbing, not in-kernel slicing.
    qkv = qkv.reshape(B_, N, 3, num_heads, D).transpose(2, 0, 3, 1, 4)
    q, k, v = qkv[0], qkv[1], qkv[2]                              # (B_, H, N, D)

    # 3) Batched-window attention core.
    o = pallas_window_attention_core(q, k, v, bias, mask, scale)  # (B_, H, N, D)

    # 4) Head merge + hoisted output projection.
    o = o.transpose(0, 2, 1, 3).reshape(B_ * N, C)
    out = pallas_linear(o, params["wproj"], params["bproj"], out_dtype=x.dtype)
    return out.reshape(B_, N, C)


# ----------------------------------------------------------------------------
# Pure-JAX f32 reference (mirrors the PyTorch forward) for verification
# ----------------------------------------------------------------------------

def reference_window_attention(x, params, window_size, num_heads, mask=None,
                               qk_scale=None):
    B_, N, C = x.shape
    D = C // num_heads
    scale = qk_scale or D ** (-0.5)
    qkv = x @ params["wqkv"] + params["bqkv"]
    qkv = qkv.reshape(B_, N, 3, num_heads, D).transpose(2, 0, 3, 1, 4)
    q, k, v = qkv[0] * scale, qkv[1], qkv[2]
    attn = jnp.einsum("bhnd,bhmd->bhnm", q, k)
    idx = relative_position_index(window_size)
    bias = params["rel_table"][idx.reshape(-1)].reshape(N, N, num_heads)
    attn = attn + bias.transpose(2, 0, 1)[None]
    if mask is not None:
        nW = mask.shape[0]
        attn = attn.reshape(B_ // nW, nW, num_heads, N, N) + mask[None, :, None]
        attn = attn.reshape(B_, num_heads, N, N)
    attn = jax.nn.softmax(attn, axis=-1)
    o = jnp.einsum("bhnm,bhmd->bhnd", attn, v)
    o = o.transpose(0, 2, 1, 3).reshape(B_, N, C)
    return o @ params["wproj"] + params["bproj"]


# ----------------------------------------------------------------------------
# main
# ----------------------------------------------------------------------------

if __name__ == "__main__":
    key = jax.random.PRNGKey(0)
    k_x, k_qkv, k_proj, k_tab = jax.random.split(key, 4)

    # Small but representative shapes: window_size=4 -> N=16 tokens/window,
    # C=32 channels, 2 heads; B_ = 32 windows (batch 2 over a 16x16 feature
    # map shifted-partitioned into nW=16 windows).
    window_size, num_heads = 4, 2
    C = 32
    N = window_size * window_size
    B, nW = 2, 16
    B_ = B * nW

    params = {
        "wqkv":  jax.random.normal(k_qkv, (C, 3 * C), jnp.float32) * 0.02,
        "bqkv":  jnp.zeros((3 * C,), jnp.float32),
        "wproj": jax.random.normal(k_proj, (C, C), jnp.float32) * 0.02,
        "bproj": jnp.zeros((C,), jnp.float32),
        "rel_table": jax.random.normal(
            k_tab, ((2 * window_size - 1) ** 2, num_heads), jnp.float32) * 0.02,
    }

    x = jax.random.normal(k_x, (B_, N, C), jnp.float32)
    mask = jnp.asarray(compute_shift_mask(16, 16, window_size, window_size // 2))

    fwd = jax.jit(functools.partial(window_attention_forward,
                                    window_size=window_size,
                                    num_heads=num_heads))

    out_masked = jax.block_until_ready(fwd(x, params, mask=mask))   # shifted
    out_plain = jax.block_until_ready(fwd(x, params, mask=None))    # non-shifted

    ref_masked = reference_window_attention(x, params, window_size, num_heads, mask)
    ref_plain = reference_window_attention(x, params, window_size, num_heads, None)

    assert out_masked.shape == (B_, N, C), out_masked.shape
    assert out_plain.shape == (B_, N, C), out_plain.shape
    for got, ref in ((out_masked, ref_masked), (out_plain, ref_plain)):
        assert bool(jnp.all(jnp.isfinite(got)))
        err = float(jnp.max(jnp.abs(got - ref)))
        assert err < 2e-2, f"max abs error vs reference: {err}"

    print("KERNEL_OK")
</pallas_src>

<mosaic_0001>
module attributes {stable_mosaic.version = 11 : i64} {
  func.func @_linear_kernel(%arg0: i32, %arg1: memref<256x32xbf16, #tpu.memory_space<vmem>>, %arg2: memref<32x96xbf16, #tpu.memory_space<vmem>>, %arg3: memref<1x96xf32, #tpu.memory_space<vmem>>, %arg4: memref<256x96xbf16, #tpu.memory_space<vmem>>) attributes {dimension_semantics = [#tpu.dimension_semantics<parallel>], iteration_bounds = array<i64: 2>, scalar_prefetch = 0 : i64, scratch_operands = 0 : i64, tpu.core_type = #tpu.core_type<tc>, window_params = [{transform_indices = @transform_0, window_bounds = array<i64: 256, 32>}, {pipeline_mode = #tpu.pipeline_mode<synchronous>, transform_indices = @transform_1, window_bounds = array<i64: 32, 96>}, {pipeline_mode = #tpu.pipeline_mode<synchronous>, transform_indices = @transform_2, window_bounds = array<i64: 1, 96>}, {transform_indices = @transform_3, window_bounds = array<i64: 256, 96>}]} {
    %c0 = arith.constant 0 : index
    %c0_0 = arith.constant 0 : index
    %0 = vector.load %arg1[%c0, %c0_0] : memref<256x32xbf16, #tpu.memory_space<vmem>>, vector<256x32xbf16>
    %c0_1 = arith.constant 0 : index
    %c0_2 = arith.constant 0 : index
    %1 = vector.load %arg2[%c0_1, %c0_2] : memref<32x96xbf16, #tpu.memory_space<vmem>>, vector<32x96xbf16>
    %cst = arith.constant dense<0.000000e+00> : vector<256x96xf32>
    %2 = tpu.matmul %0, %1, %cst {dimension_numbers = #tpu.dot_dimension_numbers<[1], [0], [0], [1], [0, 0, 1, 1], [], []>} : vector<256x32xbf16>, vector<32x96xbf16>, vector<256x96xf32> -> vector<256x96xf32>
    %c0_3 = arith.constant 0 : index
    %c0_4 = arith.constant 0 : index
    %3 = vector.load %arg3[%c0_3, %c0_4] : memref<1x96xf32, #tpu.memory_space<vmem>>, vector<1x96xf32>
    %4 = vector.broadcast %3 : vector<1x96xf32> to vector<256x96xf32>
    %5 = arith.addf %2, %4 : vector<256x96xf32>
    %6 = arith.truncf %5 : vector<256x96xf32> to vector<256x96xbf16>
    %c0_5 = arith.constant 0 : index
    %c0_6 = arith.constant 0 : index
    %7 = vector.load %arg4[%c0_5, %c0_6] : memref<256x96xbf16, #tpu.memory_space<vmem>>, vector<256x96xbf16>
    tpu.vector_store %arg4[%c0_5, %c0_6], %6 {strides = array<i32>} : memref<256x96xbf16, #tpu.memory_space<vmem>>, vector<256x96xbf16>,
    return
  }
  func.func @transform_0(%arg0: i32) -> (i32, i32) {
    %c0_i32 = arith.constant 0 : i32
    %c0_i32_0 = arith.constant 0 : i32
    return %arg0, %c0_i32 : i32, i32
  }
  func.func @transform_1(%arg0: i32) -> (i32, i32) {
    %c0_i32 = arith.constant 0 : i32
    %c0_i32_0 = arith.constant 0 : i32
    %c0_i32_1 = arith.constant 0 : i32
    return %c0_i32, %c0_i32_0 : i32, i32
  }
  func.func @transform_2(%arg0: i32) -> (i32, i32) {
    %c0_i32 = arith.constant 0 : i32
    %c0_i32_0 = arith.constant 0 : i32
    %c0_i32_1 = arith.constant 0 : i32
    return %c0_i32, %c0_i32_0 : i32, i32
  }
  func.func @transform_3(%arg0: i32) -> (i32, i32) {
    %c0_i32 = arith.constant 0 : i32
    %c0_i32_0 = arith.constant 0 : i32
    return %arg0, %c0_i32 : i32, i32
  }
}

module attributes {stable_mosaic.version = 11 : i64} {
  func.func @_window_attn_kernel(%arg0: i32, %arg1: memref<16x2x16x16xbf16, #tpu.memory_space<vmem>>, %arg2: memref<16x2x16x16xbf16, #tpu.memory_space<vmem>>, %arg3: memref<16x2x16x16xbf16, #tpu.memory_space<vmem>>, %arg4: memref<2x16x16xf32, #tpu.memory_space<vmem>>, %arg5: memref<16x16x16xf32, #tpu.memory_space<vmem>>, %arg6: memref<16x2x16x16xbf16, #tpu.memory_space<vmem>>) attributes {dimension_semantics = [#tpu.dimension_semantics<parallel>], iteration_bounds = array<i64: 2>, scalar_prefetch = 0 : i64, scratch_operands = 0 : i64, tpu.core_type = #tpu.core_type<tc>, window_params = [{transform_indices = @transform_0, window_bounds = array<i64: 16, 2, 16, 16>}, {transform_indices = @transform_1, window_bounds = array<i64: 16, 2, 16, 16>}, {transform_indices = @transform_2, window_bounds = array<i64: 16, 2, 16, 16>}, {pipeline_mode = #tpu.pipeline_mode<synchronous>, transform_indices = @transform_3, window_bounds = array<i64: 2, 16, 16>}, {transform_indices = @transform_4, window_bounds = array<i64: 16, 16, 16>}, {transform_indices = @transform_5, window_bounds = array<i64: 16, 2, 16, 16>}]} {
    %c0 = arith.constant 0 : index
    %c0_0 = arith.constant 0 : index
    %c0_1 = arith.constant 0 : index
    %c0_2 = arith.constant 0 : index
    %0 = vector.load %arg1[%c0, %c0_0, %c0_1, %c0_2] : memref<16x2x16x16xbf16, #tpu.memory_space<vmem>>, vector<16x2x16x16xbf16>
    %1 = vector.shape_cast %0 : vector<16x2x16x16xbf16> to vector<32x16x16xbf16>
    %c0_3 = arith.constant 0 : index
    %c0_4 = arith.constant 0 : index
    %c0_5 = arith.constant 0 : index
    %c0_6 = arith.constant 0 : index
    %2 = vector.load %arg2[%c0_3, %c0_4, %c0_5, %c0_6] : memref<16x2x16x16xbf16, #tpu.memory_space<vmem>>, vector<16x2x16x16xbf16>
    %3 = vector.shape_cast %2 : vector<16x2x16x16xbf16> to vector<32x16x16xbf16>
    %c0_7 = arith.constant 0 : index
    %c0_8 = arith.constant 0 : index
    %c0_9 = arith.constant 0 : index
    %c0_10 = arith.constant 0 : index
    %4 = vector.load %arg3[%c0_7, %c0_8, %c0_9, %c0_10] : memref<16x2x16x16xbf16, #tpu.memory_space<vmem>>, vector<16x2x16x16xbf16>
    %5 = vector.shape_cast %4 : vector<16x2x16x16xbf16> to vector<32x16x16xbf16>
    "tpu.trace_start"() <{level = 10 : i32, message = "bnd,bmd->bnm"}> : () -> ()
    %cst = arith.constant dense<0.000000e+00> : vector<32x16x16xf32>
    %6 = tpu.matmul %1, %3, %cst {dimension_numbers = #tpu.dot_dimension_numbers<[2], [2], [1], [1], [0, 0, 0, 1, 1, 1], [0], [0]>} : vector<32x16x16xbf16>, vector<32x16x16xbf16>, vector<32x16x16xf32> -> vector<32x16x16xf32>
    "tpu.trace_stop"() : () -> ()
    %cst_11 = arith.constant 2.500000e-01 : f32
    %7 = vector.broadcast %cst_11 : f32 to vector<32x16x16xf32>
    %8 = arith.mulf %6, %7 : vector<32x16x16xf32>
    %9 = vector.shape_cast %8 : vector<32x16x16xf32> to vector<16x2x16x16xf32>
    %c0_12 = arith.constant 0 : index
    %c0_13 = arith.constant 0 : index
    %c0_14 = arith.constant 0 : index
    %10 = vector.load %arg4[%c0_12, %c0_13, %c0_14] : memref<2x16x16xf32, #tpu.memory_space<vmem>>, vector<2x16x16xf32>
    %11 = vector.shape_cast %10 : vector<2x16x16xf32> to vector<1x2x16x16xf32>
    %12 = vector.broadcast %11 : vector<1x2x16x16xf32> to vector<16x2x16x16xf32>
    %13 = arith.addf %9, %12 : vector<16x2x16x16xf32>
    %c0_15 = arith.constant 0 : index
    %c0_16 = arith.constant 0 : index
    %c0_17 = arith.constant 0 : index
    %14 = vector.load %arg5[%c0_15, %c0_16, %c0_17] : memref<16x16x16xf32, #tpu.memory_space<vmem>>, vector<16x16x16xf32>
    %15 = vector.shape_cast %14 : vector<16x16x16xf32> to vector<16x1x16x16xf32>
    %16 = vector.broadcast %15 : vector<16x1x16x16xf32> to vector<16x2x16x16xf32>
    %17 = arith.addf %13, %16 : vector<16x2x16x16xf32>
    %18 = vector.shape_cast %17 : vector<16x2x16x16xf32> to vector<32x16x16xf32>
    %cst_18 = arith.constant dense<0xFF800000> : vector<32x16xf32>
    %19 = vector.multi_reduction <maximumf>, %18, %cst_18 [2] : vector<32x16x16xf32> to vector<32x16xf32>
    %20 = vector.shape_cast %19 : vector<32x16xf32> to vector<32x16x1xf32>
    %21 = vector.broadcast %20 : vector<32x16x1xf32> to vector<32x16x16xf32>
    %22 = arith.subf %18, %21 : vector<32x16x16xf32>
    %23 = math.exp %22 : vector<32x16x16xf32>
    %cst_19 = arith.constant dense<0.000000e+00> : vector<32x16xf32>
    %24 = vector.multi_reduction <add>, %23, %cst_19 [2] : vector<32x16x16xf32> to vector<32x16xf32>
    %25 = vector.shape_cast %24 : vector<32x16xf32> to vector<32x16x1xf32>
    %26 = tpu.reciprocal %25 {approx = true} : vector<32x16x1xf32> -> vector<32x16x1xf32>
    %27 = vector.broadcast %26 : vector<32x16x1xf32> to vector<32x16x16xf32>
    %28 = arith.mulf %23, %27 : vector<32x16x16xf32>
    %29 = arith.truncf %28 : vector<32x16x16xf32> to vector<32x16x16xbf16>
    "tpu.trace_start"() <{level = 10 : i32, message = "bnm,bmd->bnd"}> : () -> ()
    %cst_20 = arith.constant dense<0.000000e+00> : vector<32x16x16xf32>
    %30 = tpu.matmul %29, %5, %cst_20 {dimension_numbers = #tpu.dot_dimension_numbers<[2], [1], [1], [2], [0, 0, 0, 1, 1, 2], [0], [0]>} : vector<32x16x16xbf16>, vector<32x16x16xbf16>, vector<32x16x16xf32> -> vector<32x16x16xf32>
    "tpu.trace_stop"() : () -> ()
    %31 = vector.shape_cast %30 : vector<32x16x16xf32> to vector<16x2x16x16xf32>
    %32 = arith.truncf %31 : vector<16x2x16x16xf32> to vector<16x2x16x16xbf16>
    %c0_21 = arith.constant 0 : index
    %c0_22 = arith.constant 0 : index
    %c0_23 = arith.constant 0 : index
    %c0_24 = arith.constant 0 : index
    %33 = vector.load %arg6[%c0_21, %c0_22, %c0_23, %c0_24] : memref<16x2x16x16xbf16, #tpu.memory_space<vmem>>, vector<16x2x16x16xbf16>
    tpu.vector_store %arg6[%c0_21, %c0_22, %c0_23, %c0_24], %32 {strides = array<i32>} : memref<16x2x16x16xbf16, #tpu.memory_space<vmem>>, vector<16x2x16x16xbf16>,
    return
  }
  func.func @transform_0(%arg0: i32) -> (i32, i32, i32, i32) {
    %c0_i32 = arith.constant 0 : i32
    %c0_i32_0 = arith.constant 0 : i32
    %c0_i32_1 = arith.constant 0 : i32
    %c0_i32_2 = arith.constant 0 : i32
    return %arg0, %c0_i32, %c0_i32_0, %c0_i32_1 : i32, i32, i32, i32
  }
  func.func @transform_1(%arg0: i32) -> (i32, i32, i32, i32) {
    %c0_i32 = arith.constant 0 : i32
    %c0_i32_0 = arith.constant 0 : i32
    %c0_i32_1 = arith.constant 0 : i32
    %c0_i32_2 = arith.constant 0 : i32
    return %arg0, %c0_i32, %c0_i32_0, %c0_i32_1 : i32, i32, i32, i32
  }
  func.func @transform_2(%arg0: i32) -> (i32, i32, i32, i32) {
    %c0_i32 = arith.constant 0 : i32
    %c0_i32_0 = arith.constant 0 : i32
    %c0_i32_1 = arith.constant 0 : i32
    %c0_i32_2 = arith.constant 0 : i32
    return %arg0, %c0_i32, %c0_i32_0, %c0_i32_1 : i32, i32, i32, i32
  }
  func.func @transform_3(%arg0: i32) -> (i32, i32, i32) {
    %c0_i32 = arith.constant 0 : i32
    %c0_i32_0 = arith.constant 0 : i32
    %c0_i32_1 = arith.constant 0 : i32
    %c0_i32_2 = arith.constant 0 : i32
    return %c0_i32, %c0_i32_0, %c0_i32_1 : i32, i32, i32
  }
  func.func @transform_4(%arg0: i32) -> (i32, i32, i32) {
    %c1_i32 = arith.constant 1 : i32
    %c0_i32 = arith.constant 0 : i32
    %0 = arith.cmpi eq, %c1_i32, %c0_i32 : i32
    %c1_i32_0 = arith.constant 1 : i32
    %1 = arith.select %0, %c1_i32_0, %c1_i32 : i32
    %2 = arith.remsi %arg0, %1 : i32
    %c0_i32_1 = arith.constant 0 : i32
    %3 = arith.cmpi ne, %2, %c0_i32_1 : i32
    %c0_i32_2 = arith.constant 0 : i32
    %4 = arith.cmpi slt, %2, %c0_i32_2 : i32
    %c0_i32_3 = arith.constant 0 : i32
    %5 = arith.cmpi slt, %1, %c0_i32_3 : i32
    %6 = arith.xori %4, %5 : i1
    %7 = arith.andi %6, %3 : i1
    %8 = arith.addi %2, %1 : i32
    %9 = arith.select %7, %8, %2 : i32
    %c0_i32_4 = arith.constant 0 : i32
    %c0_i32_5 = arith.constant 0 : i32
    %c0_i32_6 = arith.constant 0 : i32
    return %9, %c0_i32_4, %c0_i32_5 : i32, i32, i32
  }
  func.func @transform_5(%arg0: i32) -> (i32, i32, i32, i32) {
    %c0_i32 = arith.constant 0 : i32
    %c0_i32_0 = arith.constant 0 : i32
    %c0_i32_1 = arith.constant 0 : i32
    %c0_i32_2 = arith.constant 0 : i32
    return %arg0, %c0_i32, %c0_i32_0, %c0_i32_1 : i32, i32, i32, i32
  }
}

module attributes {stable_mosaic.version = 11 : i64} {
  func.func @_linear_kernel(%arg0: i32, %arg1: memref<256x32xbf16, #tpu.memory_space<vmem>>, %arg2: memref<32x32xbf16, #tpu.memory_space<vmem>>, %arg3: memref<1x32xf32, #tpu.memory_space<vmem>>, %arg4: memref<256x32xf32, #tpu.memory_space<vmem>>) attributes {dimension_semantics = [#tpu.dimension_semantics<parallel>], iteration_bounds = array<i64: 2>, scalar_prefetch = 0 : i64, scratch_operands = 0 : i64, tpu.core_type = #tpu.core_type<tc>, window_params = [{transform_indices = @transform_0, window_bounds = array<i64: 256, 32>}, {pipeline_mode = #tpu.pipeline_mode<synchronous>, transform_indices = @transform_1, window_bounds = array<i64: 32, 32>}, {pipeline_mode = #tpu.pipeline_mode<synchronous>, transform_indices = @transform_2, window_bounds = array<i64: 1, 32>}, {transform_indices = @transform_3, window_bounds = array<i64: 256, 32>}]} {
    %c0 = arith.constant 0 : index
    %c0_0 = arith.constant 0 : index
    %0 = vector.load %arg1[%c0, %c0_0] : memref<256x32xbf16, #tpu.memory_space<vmem>>, vector<256x32xbf16>
    %c0_1 = arith.constant 0 : index
    %c0_2 = arith.constant 0 : index
    %1 = vector.load %arg2[%c0_1, %c0_2] : memref<32x32xbf16, #tpu.memory_space<vmem>>, vector<32x32xbf16>
    %cst = arith.constant dense<0.000000e+00> : vector<256x32xf32>
    %2 = tpu.matmul %0, %1, %cst {dimension_numbers = #tpu.dot_dimension_numbers<[1], [0], [0], [1], [0, 0, 1, 1], [], []>} : vector<256x32xbf16>, vector<32x32xbf16>, vector<256x32xf32> -> vector<256x32xf32>
    %c0_3 = arith.constant 0 : index
    %c0_4 = arith.constant 0 : index
    %3 = vector.load %arg3[%c0_3, %c0_4] : memref<1x32xf32, #tpu.memory_space<vmem>>, vector<1x32xf32>
    %4 = vector.broadcast %3 : vector<1x32xf32> to vector<256x32xf32>
    %5 = arith.addf %2, %4 : vector<256x32xf32>
    %c0_5 = arith.constant 0 : index
    %c0_6 = arith.constant 0 : index
    %6 = vector.load %arg4[%c0_5, %c0_6] : memref<256x32xf32, #tpu.memory_space<vmem>>, vector<256x32xf32>
    tpu.vector_store %arg4[%c0_5, %c0_6], %5 {strides = array<i32>} : memref<256x32xf32, #tpu.memory_space<vmem>>, vector<256x32xf32>,
    return
  }
  func.func @transform_0(%arg0: i32) -> (i32, i32) {
    %c0_i32 = arith.constant 0 : i32
    %c0_i32_0 = arith.constant 0 : i32
    return %arg0, %c0_i32 : i32, i32
  }
  func.func @transform_1(%arg0: i32) -> (i32, i32) {
    %c0_i32 = arith.constant 0 : i32
    %c0_i32_0 = arith.constant 0 : i32
    %c0_i32_1 = arith.constant 0 : i32
    return %c0_i32, %c0_i32_0 : i32, i32
  }
  func.func @transform_2(%arg0: i32) -> (i32, i32) {
    %c0_i32 = arith.constant 0 : i32
    %c0_i32_0 = arith.constant 0 : i32
    %c0_i32_1 = arith.constant 0 : i32
    return %c0_i32, %c0_i32_0 : i32, i32
  }
  func.func @transform_3(%arg0: i32) -> (i32, i32) {
    %c0_i32 = arith.constant 0 : i32
    %c0_i32_0 = arith.constant 0 : i32
    return %arg0, %c0_i32 : i32, i32
  }
}

</mosaic_0001>

<bundles_post_ra>
// kernel: window_attention_forward.3
= control target key start
LH: loop header
LB: loop body
LE: loop exit
PB: predicated region body
PF: predicated region fallthrough
CT: control target
= control target key end

     0   :  { %s726_s12 = smov 0   ;;  %s893_s0 = inlined_call_operand.vmem [shape: bf16[512,32], index: 0, kind: input, shape index: {}]   ;;  %s894_s1 = inlined_call_operand.vmem [shape: bf16[32,96], index: 1, kind: input, shape index: {}]   ;;  %s895_s2 = inlined_call_operand.vmem [shape: f32[1,96], index: 2, kind: input, shape index: {}]   ;;  %s896_s3 = inlined_call_operand.vmem [shape: bf16[512,96], index: 3, kind: output, shape index: {}]  }
   0x1 LB: > { %s566_s13 = sadd.s32 4294967295, %s704_s12   ;;  %p570_p0 = scmp.ge.s32.totalorder %s704_s12, 1  ;;  %s704_s12 = sphi %s726_s12, %s13_s12  }
   0x2   : > { %p138_p1 = scmp.lt.s32.totalorder %s704_s12, 3 }
   0x4   : > { %p139_p2 = pnand %p570_p0, %p138_p1 }
   0x5   : > { %s571_s16 = sshll.u32 (!%p139_p2), %s566_s13, 5 }
   0x6   : > { %142 = sbr.rel (%p139_p2) target bundleno = 214 (0xd6), region = 32  ;;  %p163_p3 = scmp.lt.s32.totalorder (!%p139_p2), %s571_s16, 63 }
   0xb   : > { %v682_v0 = vld [vmem:[%s894_s1 + $0x8] sm:$0xff]  ;;  %v681_v1 = vld [vmem:[%s894_s1] sm:$0xff]  ;;  %s898_s16 = smov (!%p163_p3, %s571_s16), 63  ;;  %vm307_vm0 = vcmask 261120   ;;  %vm477_vm1 = vcmask 781312  }
   0xc   : > { %362 = vmatpush.bf16.msra.mxu0 %v682_v0  ;;  %683 = vmatpush.bf16.msra.mxu1 %v682_v0  ;;  %s572_s19 = sshll.u32 %s898_s16, 2  ;;  %v785_v18 = vld [vmem:[%s895_s2] ss:$0 sm:$0xff] }
   0xd   : > { %684 = vmatpush.bf16.msra.mxu2 %v682_v0  ;;  %685 = vmatpush.bf16.msra.mxu3 %v682_v0  ;;  %s748_s22 = scalar_lea.vmem %s893_s0, %s572_s19  ;;  %s794_s27 = scalar_lea.vmem %s896_s3, %s572_s19 }
   0xe   : > { %v665_v2 = vld [vmem:[%s748_s22] sm:$0xff]  ;;  %v666_v6 = vld [vmem:[%s748_s22 + $0x8] sm:$0xff]  ;;  %v667_v10 = vld [vmem:[%s748_s22 + $0x10] sm:$0xff] }
   0xf   : > { %v669_v3 = vld [vmem:[%s748_s22 + $0x20] sm:$0xff]  ;;  %v670_v7 = vld [vmem:[%s748_s22 + $0x28] sm:$0xff]  ;;  %v671_v11 = vld [vmem:[%s748_s22 + $0x30] sm:$0xff] }
  0x10   : > { %363 = vmatpush.bf16.msra.mxu0 %v681_v1  ;;  %686 = vmatpush.bf16.msra.mxu1 %v681_v1  ;;  %v673_v4 = vld [vmem:[%s748_s22 + $0x40] sm:$0xff]  ;;  %v674_v8 = vld [vmem:[%s748_s22 + $0x48] sm:$0xff]  ;;  %v675_v12 = vld [vmem:[%s748_s22 + $0x50] sm:$0xff] }
  0x11   : > { %687 = vmatpush.bf16.msra.mxu2 %v681_v1  ;;  %688 = vmatpush.bf16.msra.mxu3 %v681_v1  ;;  %v677_v5 = vld [vmem:[%s748_s22 + $0x60] sm:$0xff]  ;;  %v678_v9 = vld [vmem:[%s748_s22 + $0x68] sm:$0xff]  ;;  %v679_v13 = vld [vmem:[%s748_s22 + $0x70] sm:$0xff] }
  0x12   : > { %v668_v14 = vld [vmem:[%s748_s22 + $0x18] sm:$0xff] }
  0x13   : > { %647 = vmatmul.msk.bf16.vlgmr.msra.gmra.mxu0 %vm307_vm0, %v665_v2  ;;  %651 = vmatmul.msk.bf16.vlgmr.msra.gmra.mxu1 %vm307_vm0, %v669_v3  ;;  %v672_v15 = vld [vmem:[%s748_s22 + $0x38] sm:$0xff] }
  0x14   : > { %655 = vmatmul.msk.bf16.vlgmr.msra.gmra.mxu2 %vm307_vm0, %v673_v4  ;;  %659 = vmatmul.msk.bf16.vlgmr.msra.gmra.mxu3 %vm307_vm0, %v677_v5  ;;  %v676_v16 = vld [vmem:[%s748_s22 + $0x58] sm:$0xff] }
  0x15   : > { %v680_v17 = vld [vmem:[%s748_s22 + $0x78] sm:$0xff] }
  0x23   : > { %648 = vmatmul.msk.bf16.gmra.mxu0 %vm307_vm0, %v666_v6  ;;  %652 = vmatmul.msk.bf16.gmra.mxu1 %vm307_vm0, %v670_v7 }
  0x24   : > { %656 = vmatmul.msk.bf16.gmra.mxu2 %vm307_vm0, %v674_v8  ;;  %660 = vmatmul.msk.bf16.gmra.mxu3 %vm307_vm0, %v678_v9 }
  0x33   : > { %649 = vmatmul.msk.bf16.gmra.mxu0 %vm307_vm0, %v667_v10  ;;  %653 = vmatmul.msk.bf16.gmra.mxu1 %vm307_vm0, %v671_v11 }
  0x34   : > { %657 = vmatmul.msk.bf16.gmra.mxu2 %vm307_vm0, %v675_v12  ;;  %661 = vmatmul.msk.bf16.gmra.mxu3 %vm307_vm0, %v679_v13 }
  0x43   : > { %650 = vmatmul.msk.bf16.gmra.mxu0 %vm307_vm0, %v668_v14  ;;  %654 = vmatmul.msk.bf16.gmra.mxu1 %vm307_vm0, %v672_v15 }
  0x44   : > { %658 = vmatmul.msk.bf16.gmra.mxu2 %vm307_vm0, %v676_v16  ;;  %662 = vmatmul.msk.bf16.gmra.mxu3 %vm307_vm0, %v680_v17 }
  0x90   : > { %v365_v19 = vpop.f32.mrf.mxu0  ;;  %v385_v20 = vpop.f32.mrf.mxu1 }
  0x91   : > { %v366_v21 = vadd.f32 %v785_v18, %v365_v19  ;;  %v386_v22 = vadd.f32 %v785_v18, %v385_v20 }
  0x93   : > { %v445_v23 = vpack.c.bf16 %v366_v21, %v366_v21  ;;  %v453_v24 = vpack.c.bf16 %v386_v22, %v386_v22 }
  0x95   : > { %478 = vst.msk [vmem:[%s794_s27] sm:$0xf] %vm477_vm1, %v445_v23 }
  0x96   : > { %486 = vst.msk [vmem:[%s794_s27 + $0x20] sm:$0xf] %vm477_vm1, %v453_v24 }
  0x97   : > { %v405_v25 = vpop.f32.mrf.mxu2  ;;  %v425_v26 = vpop.f32.mrf.mxu3 }
  0x98   : > { %v406_v27 = vadd.f32 %v785_v18, %v405_v25  ;;  %v426_v28 = vadd.f32 %v785_v18, %v425_v26  ;;  %v367_v29 = vpop.f32.mrf.mxu0  ;;  %v387_v30 = vpop.f32.mrf.mxu1 }
  0x99   : > { %v368_v31 = vadd.f32 %v785_v18, %v367_v29  ;;  %v388_v32 = vadd.f32 %v785_v18, %v387_v30 }
  0x9a   : > { %v461_v33 = vpack.c.bf16 %v406_v27, %v406_v27  ;;  %v469_v34 = vpack.c.bf16 %v426_v28, %v426_v28 }
  0x9b   : > { %v446_v35 = vpack.c.bf16 %v368_v31, %v368_v31  ;;  %v454_v36 = vpack.c.bf16 %v388_v32, %v388_v32 }
  0x9c   : > { %494 = vst.msk [vmem:[%s794_s27 + $0x40] sm:$0xf] %vm477_vm1, %v461_v33 }
  0x9d   : > { %502 = vst.msk [vmem:[%s794_s27 + $0x60] sm:$0xf] %vm477_vm1, %v469_v34 }
  0x9e   : > { %479 = vst.msk [vmem:[%s794_s27 + $0x4] sm:$0xf] %vm477_vm1, %v446_v35 }
  0x9f   : > { %487 = vst.msk [vmem:[%s794_s27 + $0x24] sm:$0xf] %vm477_vm1, %v454_v36  ;;  %v407_v37 = vpop.f32.mrf.mxu2  ;;  %v427_v38 = vpop.f32.mrf.mxu3 }
  0xa0   : > { %v408_v39 = vadd.f32 %v785_v18, %v407_v37  ;;  %v428_v40 = vadd.f32 %v785_v18, %v427_v38  ;;  %v370_v41 = vpop.f32.mrf.mxu0  ;;  %v390_v42 = vpop.f32.mrf.mxu1 }
  0xa1   : > { %v371_v43 = vadd.f32 %v785_v18, %v370_v41  ;;  %v391_v44 = vadd.f32 %v785_v18, %v390_v42 }
  0xa2   : > { %v462_v45 = vpack.c.bf16 %v408_v39, %v408_v39  ;;  %v470_v46 = vpack.c.bf16 %v428_v40, %v428_v40 }
  0xa3   : > { %v447_v47 = vpack.c.bf16 %v371_v43, %v371_v43  ;;  %v455_v48 = vpack.c.bf16 %v391_v44, %v391_v44 }
  0xa4   : > { %495 = vst.msk [vmem:[%s794_s27 + $0x44] sm:$0xf] %vm477_vm1, %v462_v45 }
  0xa5   : > { %503 = vst.msk [vmem:[%s794_s27 + $0x64] sm:$0xf] %vm477_vm1, %v470_v46 }
  0xa6   : > { %480 = vst.msk [vmem:[%s794_s27 + $0x8] sm:$0xf] %vm477_vm1, %v447_v47 }
  0xa7   : > { %488 = vst.msk [vmem:[%s794_s27 + $0x28] sm:$0xf] %vm477_vm1, %v455_v48  ;;  %v410_v49 = vpop.f32.mrf.mxu2  ;;  %v430_v50 = vpop.f32.mrf.mxu3 }
  0xa8   : > { %v411_v51 = vadd.f32 %v785_v18, %v410_v49  ;;  %v431_v52 = vadd.f32 %v785_v18, %v430_v50  ;;  %v372_v53 = vpop.f32.mrf.mxu0  ;;  %v392_v54 = vpop.f32.mrf.mxu1 }
  0xa9   : > { %v373_v55 = vadd.f32 %v785_v18, %v372_v53  ;;  %v393_v56 = vadd.f32 %v785_v18, %v392_v54 }
  0xaa   : > { %v463_v57 = vpack.c.bf16 %v411_v51, %v411_v51  ;;  %v471_v58 = vpack.c.bf16 %v431_v52, %v431_v52 }
  0xab   : > { %v448_v59 = vpack.c.bf16 %v373_v55, %v373_v55  ;;  %v456_v60 = vpack.c.bf16 %v393_v56, %v393_v56 }
  0xac   : > { %496 = vst.msk [vmem:[%s794_s27 + $0x48] sm:$0xf] %vm477_vm1, %v463_v57 }
  0xad   : > { %504 = vst.msk [vmem:[%s794_s27 + $0x68] sm:$0xf] %vm477_vm1, %v471_v58 }
  0xae   : > { %481 = vst.msk [vmem:[%s794_s27 + $0xc] sm:$0xf] %vm477_vm1, %v448_v59 }
  0xaf   : > { %489 = vst.msk [vmem:[%s794_s27 + $0x2c] sm:$0xf] %vm477_vm1, %v456_v60  ;;  %v412_v61 = vpop.f32.mrf.mxu2  ;;  %v432_v62 = vpop.f32.mrf.mxu3 }
  0xb0   : > { %v413_v63 = vadd.f32 %v785_v18, %v412_v61  ;;  %v433_v0 = vadd.f32 %v785_v18, %v432_v62  ;;  %v375_v1 = vpop.f32.mrf.mxu0  ;;  %v395_v2 = vpop.f32.mrf.mxu1 }
  0xb1   : > { %v376_v3 = vadd.f32 %v785_v18, %v375_v1  ;;  %v396_v4 = vadd.f32 %v785_v18, %v395_v2 }
  0xb2   : > { %v464_v5 = vpack.c.bf16 %v413_v63, %v413_v63  ;;  %v472_v6 = vpack.c.bf16 %v433_v0, %v433_v0 }
  0xb3   : > { %v449_v7 = vpack.c.bf16 %v376_v3, %v376_v3  ;;  %v457_v8 = vpack.c.bf16 %v396_v4, %v396_v4 }
  0xb4   : > { %497 = vst.msk [vmem:[%s794_s27 + $0x4c] sm:$0xf] %vm477_vm1, %v464_v5 }
  0xb5   : > { %505 = vst.msk [vmem:[%s794_s27 + $0x6c] sm:$0xf] %vm477_vm1, %v472_v6 }
  0xb6   : > { %482 = vst.msk [vmem:[%s794_s27 + $0x10] sm:$0xf] %vm477_vm1, %v449_v7 }
  0xb7   : > { %490 = vst.msk [vmem:[%s794_s27 + $0x30] sm:$0xf] %vm477_vm1, %v457_v8  ;;  %v415_v9 = vpop.f32.mrf.mxu2  ;;  %v435_v10 = vpop.f32.mrf.mxu3 }
  0xb8   : > { %v416_v11 = vadd.f32 %v785_v18, %v415_v9  ;;  %v436_v12 = vadd.f32 %v785_v18, %v435_v10  ;;  %v377_v13 = vpop.f32.mrf.mxu0  ;;  %v397_v14 = vpop.f32.mrf.mxu1 }
  0xb9   : > { %v378_v15 = vadd.f32 %v785_v18, %v377_v13  ;;  %v398_v16 = vadd.f32 %v785_v18, %v397_v14 }
  0xba   : > { %v465_v17 = vpack.c.bf16 %v416_v11, %v416_v11  ;;  %v473_v19 = vpack.c.bf16 %v436_v12, %v436_v12 }
  0xbb   : > { %v450_v20 = vpack.c.bf16 %v378_v15, %v378_v15  ;;  %v458_v21 = vpack.c.bf16 %v398_v16, %v398_v16 }
  0xbc   : > { %498 = vst.msk [vmem:[%s794_s27 + $0x50] sm:$0xf] %vm477_vm1, %v465_v17 }
  0xbd   : > { %506 = vst.msk [vmem:[%s794_s27 + $0x70] sm:$0xf] %vm477_vm1, %v473_v19 }
  0xbe   : > { %483 = vst.msk [vmem:[%s794_s27 + $0x14] sm:$0xf] %vm477_vm1, %v450_v20 }
  0xbf   : > { %491 = vst.msk [vmem:[%s794_s27 + $0x34] sm:$0xf] %vm477_vm1, %v458_v21  ;;  %v417_v22 = vpop.f32.mrf.mxu2  ;;  %v437_v23 = vpop.f32.mrf.mxu3 }
  0xc0   : > { %v418_v24 = vadd.f32 %v785_v18, %v417_v22  ;;  %v438_v25 = vadd.f32 %v785_v18, %v437_v23  ;;  %v380_v26 = vpop.f32.mrf.mxu0  ;;  %v400_v27 = vpop.f32.mrf.mxu1 }
  0xc1   : > { %v381_v28 = vadd.f32 %v785_v18, %v380_v26  ;;  %v401_v29 = vadd.f32 %v785_v18, %v400_v27 }
  0xc2   : > { %v466_v30 = vpack.c.bf16 %v418_v24, %v418_v24  ;;  %v474_v31 = vpack.c.bf16 %v438_v25, %v438_v25 }
  0xc3   : > { %v451_v32 = vpack.c.bf16 %v381_v28, %v381_v28  ;;  %v459_v33 = vpack.c.bf16 %v401_v29, %v401_v29 }
  0xc4   : > { %499 = vst.msk [vmem:[%s794_s27 + $0x54] sm:$0xf] %vm477_vm1, %v466_v30 }
  0xc5   : > { %507 = vst.msk [vmem:[%s794_s27 + $0x74] sm:$0xf] %vm477_vm1, %v474_v31 }
  0xc6   : > { %484 = vst.msk [vmem:[%s794_s27 + $0x18] sm:$0xf] %vm477_vm1, %v451_v32 }
  0xc7   : > { %492 = vst.msk [vmem:[%s794_s27 + $0x38] sm:$0xf] %vm477_vm1, %v459_v33  ;;  %v420_v34 = vpop.f32.mrf.mxu2  ;;  %v440_v35 = vpop.f32.mrf.mxu3 }
  0xc8   : > { %v421_v36 = vadd.f32 %v785_v18, %v420_v34  ;;  %v441_v37 = vadd.f32 %v785_v18, %v440_v35  ;;  %v382_v38 = vpop.f32.mrf.mxu0  ;;  %v402_v39 = vpop.f32.mrf.mxu1 }
  0xc9   : > { %v383_v40 = vadd.f32 %v785_v18, %v382_v38  ;;  %v403_v41 = vadd.f32 %v785_v18, %v402_v39 }
  0xca   : > { %v467_v42 = vpack.c.bf16 %v421_v36, %v421_v36  ;;  %v475_v43 = vpack.c.bf16 %v441_v37, %v441_v37 }
  0xcb   : > { %v452_v44 = vpack.c.bf16 %v383_v40, %v383_v40  ;;  %v460_v45 = vpack.c.bf16 %v403_v41, %v403_v41 }
  0xcc   : > { %500 = vst.msk [vmem:[%s794_s27 + $0x58] sm:$0xf] %vm477_vm1, %v467_v42 }
  0xcd   : > { %508 = vst.msk [vmem:[%s794_s27 + $0x78] sm:$0xf] %vm477_vm1, %v475_v43 }
  0xce   : > { %485 = vst.msk [vmem:[%s794_s27 + $0x1c] sm:$0xf] %vm477_vm1, %v452_v44 }
  0xcf   : > { %493 = vst.msk [vmem:[%s794_s27 + $0x3c] sm:$0xf] %vm477_vm1, %v460_v45  ;;  %v422_v46 = vpop.f32.mrf.mxu2  ;;  %v442_v47 = vpop.f32.mrf.mxu3 }
  0xd0   : > { %v423_v48 = vadd.f32 %v785_v18, %v422_v46  ;;  %v443_v49 = vadd.f32 %v785_v18, %v442_v47 }
  0xd2   : > { %v468_v50 = vpack.c.bf16 %v423_v48, %v423_v48  ;;  %v476_v51 = vpack.c.bf16 %v443_v49, %v443_v49 }
  0xd4   : > { %501 = vst.msk [vmem:[%s794_s27 + $0x5c] sm:$0xf] %vm477_vm1, %v468_v50 }
  0xd5   : > { %509 = vst.msk [vmem:[%s794_s27 + $0x7c] sm:$0xf] %vm477_vm1, %v476_v51 }
  0xd6 PF: > { %s13_s12 = sadd.s32 1, %s704_s12  }
  0xd7   : > { %p10_p4 = scmp.ge.s32.totalorder %s13_s12, 4  }
  0xd9   :  { %12 = sbr.rel (!%p10_p4) target bundleno = 1 (0x1), region = 62 }

// kernel: window_attention_forward.5
= control target key start
LH: loop header
LB: loop body
LE: loop exit
PB: predicated region body
PF: predicated region fallthrough
CT: control target
= control target key end

     0   :  { %8 = vsyncpa [#allocation3], 0  ;;  %s1038_s0 = inlined_call_operand.vmem [shape: bf16[512,32], index: 0, kind: input, shape index: {}]   ;;  %s1039_s1 = inlined_call_operand.vmem [shape: bf16[32,32], index: 1, kind: input, shape index: {}]   ;;  %s1040_s2 = inlined_call_operand.vmem [shape: f32[1,32], index: 2, kind: input, shape index: {}]   ;;  %s1041_s3 = inlined_call_operand.hbm [shape: f32[512,32], index: 3, kind: output, shape index: {}]  }
   0x1   :  { %10 = vsyncpa [#allocation3 + $0x1], 0  ;;  %s806_s12 = smov 0   ;;  %s808_s13 = smov 0  }
   0x2   :  { %s810_s14 = smov 0   ;;  %s812_s15 = smov 0  }
   0x3 LB: > { %s827_s16 = sadd.s32 4294967295, %s782_s15   ;;  %s553_s17 = sadd.s32 4294967294, %s782_s15   ;;  %s782_s15 = sphi %s812_s15, %s1047_s15   ;;  %s778_s14 = sphi %s810_s14, %s1046_s14   ;;  %s774_s13 = sphi %s808_s13, %s1045_s13   ;;  %s770_s12 = sphi %s806_s12, %s1044_s12  }
   0x4   : > { %s831_s18 = sadd.s32 1, %s782_s15   ;;  %s91_s19 = sadd.s32 1, %s778_s14 }
   0x5   : > { %s88_s20 = ssub.s32 %s782_s15, %s831_s18  ;;  %p101_p0 = scmp.ne.s32.totalorder %s778_s14, %s774_s13 }
   0x6   : > { %p89_p1 = scmp.eq.s32.totalorder %s88_s20, 0  ;;  %p102_p2 = scmp.eq.s32.totalorder %s827_s16, 1 }
   0x7   : > { %p107_p3 = scmp.ne.s32.totalorder %s774_s13, %s770_s12  ;;  %p108_p4 = scmp.eq.s32.totalorder %s553_s17, 1 }
   0x8   : > { %s842_s21 = scalar_select %p89_p1, %s778_s14, %s91_s19  }
   0x9   : > { %p844_p5 = por %p102_p2, %p101_p0  ;;  %p848_p6 = por %p108_p4, %p107_p3 }
   0xa   : > { %p556_p7 = scmp.ge.s32.totalorder %s782_s15, 1  ;;  %p141_p8 = scmp.lt.s32.totalorder %s782_s15, 3 }
   0xc   : > { %p142_p9 = pnand %p556_p7, %p141_p8 }
   0xd   : > { %s558_s26 = sshll.u32 (!%p142_p9), %s827_s16, 5  ;;  %s162_s6 = sand.u32 (!%p142_p9), 1, %s774_s13  }
   0xe   : > { %145 = sbr.rel (%p142_p9) target bundleno = 223 (0xdf), region = 32  ;;  %p166_p10 = scmp.lt.s32.totalorder (!%p142_p9), %s558_s26, 63 }
   0xf   : > { %s557_s7 = sshll.u32 (!%p142_p9), %s162_s6, 8  ;;  %s671_s11 = sshll.u32 (!%p142_p9), %s827_s16, 8 }
  0x10   : > { %s908_s10 = scalar_lea.vmem (!%p142_p9), [#allocation2], %s557_s7  ;;  %s487_s20 = scalar_lea.hbm (!%p142_p9), %s1041_s3, %s671_s11 }
  0x11   : > { %s488_s16 = sshll.u32 (!%p142_p9), %s908_s10, 4  ;;  %s490_s24 = sshll.u32 (!%p142_p9), %s487_s20, 4  ;;  %s489_s16 = int_to_ptr.vmem [resolvable:$true] %s488_s16  ;;  %s491_s24 = int_to_ptr.hbm [resolvable:$true] %s490_s24 }
  0x12   : > { %s476_s25 = scalar_lea.sflag (!%p142_p9), [#allocation3], %s162_s6  ;;  %s740_s30 = scalar_lea.hbm (!%p142_p9), %s1041_s3, 512 }
  0x13   : > { %v670_v0 = vld [vmem:[%s1039_s1 + $0x8] sm:$0xff]  ;;  %v669_v1 = vld [vmem:[%s1039_s1] sm:$0xff]  ;;  %s1049_s26 = smov (!%p166_p10, %s558_s26), 63  ;;  %vm305_vm0 = vcmask 261120  }
  0x14   : > { %360 = vmatpush.bf16.msra.mxu0 %v670_v0  ;;  %672 = vmatpush.bf16.msra.mxu1 %v670_v0  ;;  %s559_s29 = sshll.u32 %s1049_s26, 2  ;;  %v904_v18 = vld [vmem:[%s1040_s2] ss:$0 sm:$0xff]  ;;  %s734_s26 = sshra.s32 %s491_s24, 4  ;;  %s735_s26 = int_to_ptr.hbm [resolvable:$true] %s734_s26 }
  0x15   : > { %673 = vmatpush.bf16.msra.mxu2 %v670_v0  ;;  %674 = vmatpush.bf16.msra.mxu3 %v670_v0  ;;  %s864_s5 = scalar_lea.vmem %s1038_s0, %s559_s29  ;;  %s736_s27 = scalar_lea.hbm %s735_s26, 256 }
  0x16   : > { %v653_v2 = vld [vmem:[%s864_s5] sm:$0xff]  ;;  %v654_v6 = vld [vmem:[%s864_s5 + $0x8] sm:$0xff]  ;;  %v655_v10 = vld [vmem:[%s864_s5 + $0x10] sm:$0xff]  ;;  %p737_p11 = scmp.ne.s32.totalorder %s735_s26, %s736_s27  ;;  %p741_p0 = scmp.lt.s32.totalorder %s735_s26, %s1041_s3 }
  0x17   : > { %v657_v3 = vld [vmem:[%s864_s5 + $0x20] sm:$0xff]  ;;  %v658_v7 = vld [vmem:[%s864_s5 + $0x28] sm:$0xff]  ;;  %v659_v11 = vld [vmem:[%s864_s5 + $0x30] sm:$0xff]  ;;  %p742_p1 = scmp.lt.s32.totalorder %s740_s30, %s736_s27 }
  0x18   : > { %361 = vmatpush.bf16.msra.mxu0 %v669_v1  ;;  %675 = vmatpush.bf16.msra.mxu1 %v669_v1  ;;  %v661_v4 = vld [vmem:[%s864_s5 + $0x40] sm:$0xff]  ;;  %v662_v8 = vld [vmem:[%s864_s5 + $0x48] sm:$0xff]  ;;  %v663_v12 = vld [vmem:[%s864_s5 + $0x50] sm:$0xff]  ;;  %p738_p12 = pnand %p737_p11, %p844_p5 }
  0x19   : > { %676 = vmatpush.bf16.msra.mxu2 %v669_v1  ;;  %677 = vmatpush.bf16.msra.mxu3 %v669_v1  ;;  %v665_v5 = vld [vmem:[%s864_s5 + $0x60] sm:$0xff]  ;;  %v666_v9 = vld [vmem:[%s864_s5 + $0x68] sm:$0xff]  ;;  %v667_v13 = vld [vmem:[%s864_s5 + $0x70] sm:$0xff]  ;;  %p743_p2 = por %p742_p1, %p741_p0 }
  0x1a   : > { %v656_v14 = vld [vmem:[%s864_s5 + $0x18] sm:$0xff]  ;;  %p739_p13 = pneg %p738_p12 }
  0x1b   : > { %632 = vmatmul.msk.bf16.vlgmr.msra.gmra.mxu0 %vm305_vm0, %v653_v2  ;;  %636 = vmatmul.msk.bf16.vlgmr.msra.gmra.mxu1 %vm305_vm0, %v657_v3  ;;  %v660_v15 = vld [vmem:[%s864_s5 + $0x38] sm:$0xff] }
  0x1c   : > { %640 = vmatmul.msk.bf16.vlgmr.msra.gmra.mxu2 %vm305_vm0, %v661_v4  ;;  %644 = vmatmul.msk.bf16.vlgmr.msra.gmra.mxu3 %vm305_vm0, %v665_v5  ;;  %v664_v16 = vld [vmem:[%s864_s5 + $0x58] sm:$0xff]  ;;  %p744_p3 = pnand %p743_p2, %p739_p13 }
  0x1d   : > { %v668_v17 = vld [vmem:[%s864_s5 + $0x78] sm:$0xff] }
  0x2b   : > { %633 = vmatmul.msk.bf16.gmra.mxu0 %vm305_vm0, %v654_v6  ;;  %637 = vmatmul.msk.bf16.gmra.mxu1 %vm305_vm0, %v658_v7 }
  0x2c   : > { %641 = vmatmul.msk.bf16.gmra.mxu2 %vm305_vm0, %v662_v8  ;;  %645 = vmatmul.msk.bf16.gmra.mxu3 %vm305_vm0, %v666_v9 }
  0x3b   : > { %634 = vmatmul.msk.bf16.gmra.mxu0 %vm305_vm0, %v655_v10  ;;  %638 = vmatmul.msk.bf16.gmra.mxu1 %vm305_vm0, %v659_v11 }
  0x3c   : > { %642 = vmatmul.msk.bf16.gmra.mxu2 %vm305_vm0, %v663_v12  ;;  %646 = vmatmul.msk.bf16.gmra.mxu3 %vm305_vm0, %v667_v13 }
  0x4b   : > { %635 = vmatmul.msk.bf16.gmra.mxu0 %vm305_vm0, %v656_v14  ;;  %639 = vmatmul.msk.bf16.gmra.mxu1 %vm305_vm0, %v660_v15 }
  0x4c   : > { %643 = vmatmul.msk.bf16.gmra.mxu2 %vm305_vm0, %v664_v16  ;;  %647 = vmatmul.msk.bf16.gmra.mxu3 %vm305_vm0, %v668_v17 }
  0x98   : > { %v363_v19 = vpop.f32.mrf.mxu0  ;;  %v383_v20 = vpop.f32.mrf.mxu1 }
  0x99   : > { %v364_v21 = vadd.f32 %v904_v18, %v363_v19  ;;  %v384_v22 = vadd.f32 %v904_v18, %v383_v20 }
  0x9b   : > { %443 = vst.msk [vmem:[%s908_s10] sm:$0xff] %vm305_vm0, %v364_v21 }
  0x9c   : > { %451 = vst.msk [vmem:[%s908_s10 + $0x40] sm:$0xff] %vm305_vm0, %v384_v22 }
  0x9f   : > { %v403_v23 = vpop.f32.mrf.mxu2  ;;  %v423_v24 = vpop.f32.mrf.mxu3 }
  0xa0   : > { %v404_v25 = vadd.f32 %v904_v18, %v403_v23  ;;  %v424_v26 = vadd.f32 %v904_v18, %v423_v24  ;;  %v365_v27 = vpop.f32.mrf.mxu0  ;;  %v385_v28 = vpop.f32.mrf.mxu1 }
  0xa1   : > { %v366_v29 = vadd.f32 %v904_v18, %v365_v27  ;;  %v386_v30 = vadd.f32 %v904_v18, %v385_v28 }
  0xa2   : > { %459 = vst.msk [vmem:[%s908_s10 + $0x80] sm:$0xff] %vm305_vm0, %v404_v25 }
  0xa3   : > { %467 = vst.msk [vmem:[%s908_s10 + $0xc0] sm:$0xff] %vm305_vm0, %v424_v26 }
  0xa4   : > { %444 = vst.msk [vmem:[%s908_s10 + $0x8] sm:$0xff] %vm305_vm0, %v366_v29 }
  0xa5   : > { %452 = vst.msk [vmem:[%s908_s10 + $0x48] sm:$0xff] %vm305_vm0, %v386_v30 }
  0xa7   : > { %v405_v31 = vpop.f32.mrf.mxu2  ;;  %v425_v32 = vpop.f32.mrf.mxu3 }
  0xa8   : > { %v406_v33 = vadd.f32 %v904_v18, %v405_v31  ;;  %v426_v34 = vadd.f32 %v904_v18, %v425_v32  ;;  %v368_v35 = vpop.f32.mrf.mxu0  ;;  %v388_v36 = vpop.f32.mrf.mxu1 }
  0xa9   : > { %v369_v37 = vadd.f32 %v904_v18, %v368_v35  ;;  %v389_v38 = vadd.f32 %v904_v18, %v388_v36 }
  0xaa   : > { %460 = vst.msk [vmem:[%s908_s10 + $0x88] sm:$0xff] %vm305_vm0, %v406_v33 }
  0xab   : > { %468 = vst.msk [vmem:[%s908_s10 + $0xc8] sm:$0xff] %vm305_vm0, %v426_v34 }
  0xac   : > { %445 = vst.msk [vmem:[%s908_s10 + $0x10] sm:$0xff] %vm305_vm0, %v369_v37 }
  0xad   : > { %453 = vst.msk [vmem:[%s908_s10 + $0x50] sm:$0xff] %vm305_vm0, %v389_v38 }
  0xaf   : > { %v408_v39 = vpop.f32.mrf.mxu2  ;;  %v428_v40 = vpop.f32.mrf.mxu3 }
  0xb0   : > { %v409_v41 = vadd.f32 %v904_v18, %v408_v39  ;;  %v429_v42 = vadd.f32 %v904_v18, %v428_v40  ;;  %v370_v43 = vpop.f32.mrf.mxu0  ;;  %v390_v44 = vpop.f32.mrf.mxu1 }
  0xb1   : > { %v371_v45 = vadd.f32 %v904_v18, %v370_v43  ;;  %v391_v46 = vadd.f32 %v904_v18, %v390_v44 }
  0xb2   : > { %461 = vst.msk [vmem:[%s908_s10 + $0x90] sm:$0xff] %vm305_vm0, %v409_v41 }
  0xb3   : > { %469 = vst.msk [vmem:[%s908_s10 + $0xd0] sm:$0xff] %vm305_vm0, %v429_v42 }
  0xb4   : > { %446 = vst.msk [vmem:[%s908_s10 + $0x18] sm:$0xff] %vm305_vm0, %v371_v45 }
  0xb5   : > { %454 = vst.msk [vmem:[%s908_s10 + $0x58] sm:$0xff] %vm305_vm0, %v391_v46 }
  0xb7   : > { %v410_v47 = vpop.f32.mrf.mxu2  ;;  %v430_v48 = vpop.f32.mrf.mxu3 }
  0xb8   : > { %v411_v49 = vadd.f32 %v904_v18, %v410_v47  ;;  %v431_v50 = vadd.f32 %v904_v18, %v430_v48  ;;  %v373_v51 = vpop.f32.mrf.mxu0  ;;  %v393_v52 = vpop.f32.mrf.mxu1 }
  0xb9   : > { %v374_v53 = vadd.f32 %v904_v18, %v373_v51  ;;  %v394_v54 = vadd.f32 %v904_v18, %v393_v52 }
  0xba   : > { %462 = vst.msk [vmem:[%s908_s10 + $0x98] sm:$0xff] %vm305_vm0, %v411_v49 }
  0xbb   : > { %470 = vst.msk [vmem:[%s908_s10 + $0xd8] sm:$0xff] %vm305_vm0, %v431_v50 }
  0xbc   : > { %447 = vst.msk [vmem:[%s908_s10 + $0x20] sm:$0xff] %vm305_vm0, %v374_v53 }
  0xbd   : > { %455 = vst.msk [vmem:[%s908_s10 + $0x60] sm:$0xff] %vm305_vm0, %v394_v54 }
  0xbf   : > { %v413_v55 = vpop.f32.mrf.mxu2  ;;  %v433_v56 = vpop.f32.mrf.mxu3 }
  0xc0   : > { %v414_v57 = vadd.f32 %v904_v18, %v413_v55  ;;  %v434_v58 = vadd.f32 %v904_v18, %v433_v56  ;;  %v375_v59 = vpop.f32.mrf.mxu0  ;;  %v395_v60 = vpop.f32.mrf.mxu1 }
  0xc1   : > { %v376_v61 = vadd.f32 %v904_v18, %v375_v59  ;;  %v396_v62 = vadd.f32 %v904_v18, %v395_v60 }
  0xc2   : > { %463 = vst.msk [vmem:[%s908_s10 + $0xa0] sm:$0xff] %vm305_vm0, %v414_v57 }
  0xc3   : > { %471 = vst.msk [vmem:[%s908_s10 + $0xe0] sm:$0xff] %vm305_vm0, %v434_v58 }
  0xc4   : > { %448 = vst.msk [vmem:[%s908_s10 + $0x28] sm:$0xff] %vm305_vm0, %v376_v61 }
  0xc5   : > { %456 = vst.msk [vmem:[%s908_s10 + $0x68] sm:$0xff] %vm305_vm0, %v396_v62 }
  0xc7   : > { %v415_v63 = vpop.f32.mrf.mxu2  ;;  %v435_v0 = vpop.f32.mrf.mxu3 }
  0xc8   : > { %v416_v1 = vadd.f32 %v904_v18, %v415_v63  ;;  %v436_v2 = vadd.f32 %v904_v18, %v435_v0  ;;  %v378_v3 = vpop.f32.mrf.mxu0  ;;  %v398_v4 = vpop.f32.mrf.mxu1 }
  0xc9   : > { %v379_v5 = vadd.f32 %v904_v18, %v378_v3  ;;  %v399_v6 = vadd.f32 %v904_v18, %v398_v4 }
  0xca   : > { %464 = vst.msk [vmem:[%s908_s10 + $0xa8] sm:$0xff] %vm305_vm0, %v416_v1 }
  0xcb   : > { %472 = vst.msk [vmem:[%s908_s10 + $0xe8] sm:$0xff] %vm305_vm0, %v436_v2 }
  0xcc   : > { %449 = vst.msk [vmem:[%s908_s10 + $0x30] sm:$0xff] %vm305_vm0, %v379_v5 }
  0xcd   : > { %457 = vst.msk [vmem:[%s908_s10 + $0x70] sm:$0xff] %vm305_vm0, %v399_v6 }
  0xcf   : > { %v418_v7 = vpop.f32.mrf.mxu2  ;;  %v438_v8 = vpop.f32.mrf.mxu3 }
  0xd0   : > { %v419_v9 = vadd.f32 %v904_v18, %v418_v7  ;;  %v439_v10 = vadd.f32 %v904_v18, %v438_v8  ;;  %v380_v11 = vpop.f32.mrf.mxu0  ;;  %v400_v12 = vpop.f32.mrf.mxu1 }
  0xd1   : > { %v381_v13 = vadd.f32 %v904_v18, %v380_v11  ;;  %v401_v14 = vadd.f32 %v904_v18, %v400_v12 }
  0xd2   : > { %465 = vst.msk [vmem:[%s908_s10 + $0xb0] sm:$0xff] %vm305_vm0, %v419_v9 }
  0xd3   : > { %473 = vst.msk [vmem:[%s908_s10 + $0xf0] sm:$0xff] %vm305_vm0, %v439_v10 }
  0xd4   : > { %450 = vst.msk [vmem:[%s908_s10 + $0x38] sm:$0xff] %vm305_vm0, %v381_v13 }
  0xd5   : > { %458 = vst.msk [vmem:[%s908_s10 + $0x78] sm:$0xff] %vm305_vm0, %v401_v14 }
  0xd7   : > { %v420_v15 = vpop.f32.mrf.mxu2  ;;  %v440_v16 = vpop.f32.mrf.mxu3 }
  0xd8   : > { %v421_v17 = vadd.f32 %v904_v18, %v420_v15  ;;  %v441_v19 = vadd.f32 %v904_v18, %v440_v16 }
  0xda   : > { %466 = vst.msk [vmem:[%s908_s10 + $0xb8] sm:$0xff] %vm305_vm0, %v421_v17 }
  0xdb   : > { %474 = vst.msk [vmem:[%s908_s10 + $0xf8] sm:$0xff] %vm305_vm0, %v441_v19 }
  0xdc   : > { %747 = shalt.err (!%p744_p3)
}
  0xdd   : > { %s784_s6 = smov 128   ;;  %s785_s7 = smov 8  }
  0xde   : > { %678 = dma.vmem_to_hbm [thread:$0]  (%p844_p5), %s489_s16, 4096, %s491_s24, %s476_s25, %s784_s6, %s784_s6, %s785_s7  }
  0xdf PF: > { %p684_p4 = scmp.ge.s32.totalorder %s782_s15, 2  ;;  %s505_s8 = sand.u32 1, %s770_s12  }
  0xe0   : > { %s506_s9 = scalar_lea.sflag [#allocation3], %s505_s8 }
  0xe1   : > { %p681_p7 = pnand %p684_p4, %p848_p6 }
  0xe3   : > { %p682_p8 = pneg %p681_p7 }
  0xe5   : > { %765 = dma.done.wait (%p682_p8), %s506_s9, 4096  }
  0xe6   : > { %767 = vsyncadd (%p682_p8), %s506_s9, 4294963200  ;;  %p13_p9 = scmp.ge.s32.totalorder %s831_s18, 4   ;;  %s1044_s12 = smov %s774_s13 }
  0xe7   : > { %s1045_s13 = smov %s778_s14  ;;  %s1046_s14 = smov %s842_s21 }
  0xe8   : > { %s1047_s15 = smov %s831_s18  ;;  %15 = sbr.rel (!%p13_p9) target bundleno = 3 (0x3), region = 67 }
  0xed   :  { %512 = vsyncpa [#allocation3], 1 }
  0xee   :  { %514 = vsyncpa [#allocation3 + $0x1], 1 }

// kernel: window_attention_forward.4
= control target key start
LH: loop header
LB: loop body
LE: loop exit
PB: predicated region body
PF: predicated region fallthrough
CT: control target
= control target key end

     0   :  { %s4409_s18 = smov 0   ;;  %s5778_s0 = inlined_call_operand.vmem [shape: bf16[32,2,16,16], index: 0, kind: input, shape index: {}]   ;;  %s5779_s1 = inlined_call_operand.vmem [shape: bf16[32,2,16,16], index: 1, kind: input, shape index: {}]   ;;  %s5780_s2 = inlined_call_operand.vmem [shape: bf16[32,2,16,16], index: 2, kind: input, shape index: {}]   ;;  %s5781_s3 = inlined_call_operand.vmem [shape: f32[2,16,16], index: 3, kind: input, shape index: {}]   ;;  %s5782_s4 = inlined_call_operand.vmem [shape: f32[16,16,16], index: 4, kind: input, shape index: {}]   ;;  %s5783_s5 = inlined_call_operand.vmem [shape: bf16[32,2,16,16], index: 5, kind: output, shape index: {}]  }
   0x1 LB: > { %s3540_s19 = sadd.s32 4294967295, %s4377_s18   ;;  %p3544_p0 = scmp.ge.s32.totalorder %s4377_s18, 1  ;;  %s4377_s18 = sphi %s4409_s18, %s15_s18  }
   0x2   : > { %p213_p1 = scmp.lt.s32.totalorder %s4377_s18, 3 }
   0x4   : > { %p214_p2 = pnand %p3544_p0, %p213_p1 }
   0x6   : > { %217 = sbr.rel (%p214_p2) target bundleno = 767 (0x2ff), region = 40 }
   0xb   : > { %s3545_s20 = sshll.u32 %s3540_s19, 4  ;;  %vm486_vm0 = vcmask 130048   ;;  %vm3393_vm1 = vcmask 125952  }
   0xc   : > { %p256_p3 = scmp.lt.s32.totalorder %s3545_s20, 31 }
   0xe   : > { %s5929_s20 = smov (!%p256_p3, %s3545_s20), 31 }
   0xf   : > { %s4417_s21 = sshll.u32 %s5929_s20, 4 }
  0x10   : > { %s4423_s24 = scalar_lea.vmem %s5779_s1, %s4417_s21  ;;  %s4438_s27 = scalar_lea.vmem %s5778_s0, %s4417_s21 }
  0x11   : > { %v4043_v0 = vld [vmem:[%s4423_s24] sm:$0xff]  ;;  %v4044_v1 = vld [vmem:[%s4423_s24 + $0x8] sm:$0xff]  ;;  %v4045_v2 = vld [vmem:[%s4423_s24 + $0x10] sm:$0xff]  ;;  %s5359_s8 = scalar_lea.vmem %s5780_s2, %s4417_s21  ;;  %s5624_s11 = scalar_lea.vmem %s5783_s5, %s4417_s21 }
  0x12   : > { %v4046_v3 = vld [vmem:[%s4423_s24 + $0x18] sm:$0xff]  ;;  %v491_v4 = vsel %vm486_vm0, %v4043_v0, 0  ;;  %v521_v5 = vsel %vm486_vm0, %v4044_v1, 0  ;;  %v551_v6 = vsel %vm486_vm0, %v4045_v2, 0  ;;  %v4049_v7 = vld [vmem:[%s4423_s24 + $0x30] sm:$0xff]  ;;  %v4047_v9 = vld [vmem:[%s4423_s24 + $0x20] sm:$0xff] }
  0x13   : > { %500 = vmatpush.bf16.xpose.msra.mxu0 %v491_v4  ;;  %530 = vmatpush.bf16.xpose.msra.mxu1 %v521_v5  ;;  %v581_v8 = vsel %vm486_vm0, %v4046_v3, 0  ;;  %v4048_v10 = vld [vmem:[%s4423_s24 + $0x28] sm:$0xff]  ;;  %v4050_v11 = vld [vmem:[%s4423_s24 + $0x38] sm:$0xff]  ;;  %v671_v12 = vsel %vm486_vm0, %v4049_v7, 0  ;;  %v611_v13 = vsel %vm486_vm0, %v4047_v9, 0  ;;  %v4051_v16 = vld [vmem:[%s4423_s24 + $0x40] sm:$0xff] }
  0x14   : > { %560 = vmatpush.bf16.xpose.msra.mxu2 %v551_v6  ;;  %590 = vmatpush.bf16.xpose.msra.mxu3 %v581_v8  ;;  %v641_v14 = vsel %vm486_vm0, %v4048_v10, 0  ;;  %v701_v15 = vsel %vm486_vm0, %v4050_v11, 0  ;;  %v4053_v17 = vld [vmem:[%s4423_s24 + $0x50] sm:$0xff]  ;;  %v4011_v18 = vld [vmem:[%s4438_s27] sm:$0xff]  ;;  %v4012_v19 = vld [vmem:[%s4438_s27 + $0x8] sm:$0xff]  ;;  %v731_v23 = vsel %vm486_vm0, %v4051_v16, 0 }
  0x15   : > { %v4054_v20 = vld [vmem:[%s4423_s24 + $0x58] sm:$0xff]  ;;  %v4013_v21 = vld [vmem:[%s4438_s27 + $0x10] sm:$0xff]  ;;  %v791_v24 = vsel %vm486_vm0, %v4053_v17, 0  ;;  %v4052_v25 = vld [vmem:[%s4423_s24 + $0x48] sm:$0xff] }
  0x16   : > { %v4014_v22 = vld [vmem:[%s4438_s27 + $0x18] sm:$0xff]  ;;  %v821_v26 = vsel %vm486_vm0, %v4054_v20, 0  ;;  %v761_v27 = vsel %vm486_vm0, %v4052_v25, 0  ;;  %v4057_v28 = vld [vmem:[%s4423_s24 + $0x70] sm:$0xff]  ;;  %v4055_v29 = vld [vmem:[%s4423_s24 + $0x60] sm:$0xff] }
  0x17   : > { %v4015_v30 = vld [vmem:[%s4438_s27 + $0x20] sm:$0xff]  ;;  %v4016_v31 = vld [vmem:[%s4438_s27 + $0x28] sm:$0xff]  ;;  %v4017_v33 = vld [vmem:[%s4438_s27 + $0x30] sm:$0xff]  ;;  %v911_v35 = vsel %vm486_vm0, %v4057_v28, 0  ;;  %v851_v36 = vsel %vm486_vm0, %v4055_v29, 0 }
  0x18   : > { %v4056_v32 = vld [vmem:[%s4423_s24 + $0x68] sm:$0xff]  ;;  %v4018_v34 = vld [vmem:[%s4438_s27 + $0x38] sm:$0xff]  ;;  %v4061_v40 = vld [vmem:[%s4423_s24 + $0x90] sm:$0xff] }
  0x19   : > { %v881_v37 = vsel %vm486_vm0, %v4056_v32, 0  ;;  %v4058_v38 = vld [vmem:[%s4423_s24 + $0x78] sm:$0xff]  ;;  %v4059_v41 = vld [vmem:[%s4423_s24 + $0x80] sm:$0xff]  ;;  %v4020_v43 = vld [vmem:[%s4438_s27 + $0x48] sm:$0xff]  ;;  %v1031_v46 = vsel %vm486_vm0, %v4061_v40, 0 }
  0x1a   : > { %3565 = vmatmul.msk.bf16.vlgmr.msra.gmra.mxu0 %vm486_vm0, %v4011_v18  ;;  %3574 = vmatmul.msk.bf16.vlgmr.msra.gmra.mxu1 %vm486_vm0, %v4012_v19  ;;  %v941_v39 = vsel %vm486_vm0, %v4058_v38, 0  ;;  %v4019_v42 = vld [vmem:[%s4438_s27 + $0x40] sm:$0xff]  ;;  %v4021_v44 = vld [vmem:[%s4438_s27 + $0x50] sm:$0xff]  ;;  %v4022_v45 = vld [vmem:[%s4438_s27 + $0x58] sm:$0xff]  ;;  %v971_v47 = vsel %vm486_vm0, %v4059_v41, 0 }
  0x1b   : > { %620 = vmatpush.bf16.xpose.msrb.mxu0 %v611_v13  ;;  %650 = vmatpush.bf16.xpose.msrb.mxu1 %v641_v14  ;;  %v4062_v48 = vld [vmem:[%s4423_s24 + $0x98] sm:$0xff]  ;;  %v4060_v49 = vld [vmem:[%s4423_s24 + $0x88] sm:$0xff]  ;;  %v4063_v52 = vld [vmem:[%s4423_s24 + $0xa0] sm:$0xff] }
  0x1c   : > { %680 = vmatpush.bf16.xpose.msrb.mxu2 %v671_v12  ;;  %710 = vmatpush.bf16.xpose.msrb.mxu3 %v701_v15  ;;  %v1061_v50 = vsel %vm486_vm0, %v4062_v48, 0  ;;  %v1001_v51 = vsel %vm486_vm0, %v4060_v49, 0  ;;  %v4065_v53 = vld [vmem:[%s4423_s24 + $0xb0] sm:$0xff]  ;;  %v4023_v54 = vld [vmem:[%s4438_s27 + $0x60] sm:$0xff]  ;;  %v4024_v55 = vld [vmem:[%s4438_s27 + $0x68] sm:$0xff]  ;;  %v1091_v59 = vsel %vm486_vm0, %v4063_v52, 0 }
  0x1d   : > { %3583 = vmatmul.msk.bf16.vlgmr.msra.gmra.mxu2 %vm486_vm0, %v4013_v21  ;;  %3592 = vmatmul.msk.bf16.vlgmr.msra.gmra.mxu3 %vm486_vm0, %v4014_v22  ;;  %v4066_v56 = vld [vmem:[%s4423_s24 + $0xb8] sm:$0xff]  ;;  %v4025_v57 = vld [vmem:[%s4438_s27 + $0x70] sm:$0xff]  ;;  %v1151_v60 = vsel %vm486_vm0, %v4065_v53, 0  ;;  %v4064_v62 = vld [vmem:[%s4423_s24 + $0xa8] sm:$0xff] }
  0x1e   : > { %v4026_v58 = vld [vmem:[%s4438_s27 + $0x78] sm:$0xff]  ;;  %v1181_v61 = vsel %vm486_vm0, %v4066_v56, 0  ;;  %v1121_v63 = vsel %vm486_vm0, %v4064_v62, 0  ;;  %v4069_v0 = vld [vmem:[%s4423_s24 + $0xd0] sm:$0xff]  ;;  %v4067_v1 = vld [vmem:[%s4423_s24 + $0xc0] sm:$0xff] }
  0x1f   : > { %v4027_v2 = vld [vmem:[%s4438_s27 + $0x80] sm:$0xff]  ;;  %v4028_v3 = vld [vmem:[%s4438_s27 + $0x88] sm:$0xff]  ;;  %v4029_v5 = vld [vmem:[%s4438_s27 + $0x90] sm:$0xff]  ;;  %v1271_v7 = vsel %vm486_vm0, %v4069_v0, 0  ;;  %v1211_v8 = vsel %vm486_vm0, %v4067_v1, 0 }
  0x20   : > { %v4068_v4 = vld [vmem:[%s4423_s24 + $0xc8] sm:$0xff]  ;;  %v4030_v6 = vld [vmem:[%s4438_s27 + $0x98] sm:$0xff]  ;;  %v4073_v12 = vld [vmem:[%s4423_s24 + $0xf0] sm:$0xff] }
  0x21   : > { %v1241_v9 = vsel %vm486_vm0, %v4068_v4, 0  ;;  %v4070_v10 = vld [vmem:[%s4423_s24 + $0xd8] sm:$0xff]  ;;  %v4031_v13 = vld [vmem:[%s4438_s27 + $0xa0] sm:$0xff]  ;;  %v4032_v14 = vld [vmem:[%s4438_s27 + $0xa8] sm:$0xff]  ;;  %v1391_v17 = vsel %vm486_vm0, %v4073_v12, 0 }
  0x22   : > { %v1301_v11 = vsel %vm486_vm0, %v4070_v10, 0  ;;  %v4033_v15 = vld [vmem:[%s4438_s27 + $0xb0] sm:$0xff]  ;;  %v4034_v16 = vld [vmem:[%s4438_s27 + $0xb8] sm:$0xff]  ;;  %v4035_v18 = vld [vmem:[%s4438_s27 + $0xc0] sm:$0xff] }
  0x23   : > { %740 = vmatpush.bf16.xpose.msra.mxu0 %v731_v23  ;;  %770 = vmatpush.bf16.xpose.msra.mxu1 %v761_v27  ;;  %v4036_v19 = vld [vmem:[%s4438_s27 + $0xc8] sm:$0xff]  ;;  %v4037_v20 = vld [vmem:[%s4438_s27 + $0xd0] sm:$0xff]  ;;  %v4038_v21 = vld [vmem:[%s4438_s27 + $0xd8] sm:$0xff] }
  0x24   : > { %800 = vmatpush.bf16.xpose.msra.mxu2 %v791_v24  ;;  %830 = vmatpush.bf16.xpose.msra.mxu3 %v821_v26  ;;  %v4071_v22 = vld [vmem:[%s4423_s24 + $0xe0] sm:$0xff]  ;;  %v4074_v23 = vld [vmem:[%s4423_s24 + $0xf8] sm:$0xff]  ;;  %v4041_v27 = vld [vmem:[%s4438_s27 + $0xf0] sm:$0xff] }
  0x25   : > { %v1331_v24 = vsel %vm486_vm0, %v4071_v22, 0  ;;  %v1421_v25 = vsel %vm486_vm0, %v4074_v23, 0  ;;  %v4039_v26 = vld [vmem:[%s4438_s27 + $0xe0] sm:$0xff]  ;;  %v4042_v28 = vld [vmem:[%s4438_s27 + $0xf8] sm:$0xff]  ;;  %v4072_v29 = vld [vmem:[%s4423_s24 + $0xe8] sm:$0xff] }
  0x26   : > { %v1569_v38 = vld [vmem:[%s5782_s4] sm:$0xff]  ;;  %v1571_v53 = vld [vmem:[%s5782_s4 + $0x10] sm:$0xff]  ;;  %v1570_v56 = vld [vmem:[%s5782_s4 + $0x8] sm:$0xff] }
  0x2a   : > { %3601 = vmatmul.msk.bf16.vlgmr.msrb.gmra.mxu0 %vm486_vm0, %v4015_v30  ;;  %3610 = vmatmul.msk.bf16.vlgmr.msrb.gmra.mxu1 %vm486_vm0, %v4016_v31  ;;  %v1361_v30 = vsel %vm486_vm0, %v4072_v29, 0  ;;  %v4040_v31 = vld [vmem:[%s4438_s27 + $0xe8] sm:$0xff] }
  0x2b   : > { %860 = vmatpush.bf16.xpose.msrb.mxu0 %v851_v36  ;;  %890 = vmatpush.bf16.xpose.msrb.mxu1 %v881_v37 }
  0x2d   : > { %3619 = vmatmul.msk.bf16.vlgmr.msrb.gmra.mxu2 %vm486_vm0, %v4017_v33  ;;  %3628 = vmatmul.msk.bf16.vlgmr.msrb.gmra.mxu3 %vm486_vm0, %v4018_v34  ;;  %v4562_v33 = vld [vmem:[%s5781_s3] sm:$0xff] }
  0x2e   : > { %920 = vmatpush.bf16.xpose.msrb.mxu2 %v911_v35  ;;  %950 = vmatpush.bf16.xpose.msrb.mxu3 %v941_v39  ;;  %v4567_v35 = vld [vmem:[%s5781_s3 + $0x10] sm:$0xff] }
  0x3a   : > { %3637 = vmatmul.msk.bf16.vlgmr.msra.gmra.mxu0 %vm486_vm0, %v4019_v42  ;;  %3646 = vmatmul.msk.bf16.vlgmr.msra.gmra.mxu1 %vm486_vm0, %v4020_v43 }
  0x3b   : > { %980 = vmatpush.bf16.xpose.msra.mxu0 %v971_v47  ;;  %1010 = vmatpush.bf16.xpose.msra.mxu1 %v1001_v51 }
  0x3d   : > { %3655 = vmatmul.msk.bf16.vlgmr.msra.gmra.mxu2 %vm486_vm0, %v4021_v44  ;;  %3664 = vmatmul.msk.bf16.vlgmr.msra.gmra.mxu3 %vm486_vm0, %v4022_v45 }
  0x3e   : > { %1040 = vmatpush.bf16.xpose.msra.mxu2 %v1031_v46  ;;  %1070 = vmatpush.bf16.xpose.msra.mxu3 %v1061_v50  ;;  %v4585_v50 = vld [vmem:[%s5781_s3 + $0x18] sm:$0xff] }
  0x4a   : > { %3673 = vmatmul.msk.bf16.vlgmr.msrb.gmra.mxu0 %vm486_vm0, %v4023_v54  ;;  %3682 = vmatmul.msk.bf16.vlgmr.msrb.gmra.mxu1 %vm486_vm0, %v4024_v55 }
  0x4b   : > { %1100 = vmatpush.bf16.xpose.msrb.mxu0 %v1091_v59  ;;  %1130 = vmatpush.bf16.xpose.msrb.mxu1 %v1121_v63  ;;  %v4599_v59 = vld [vmem:[%s5781_s3 + $0x8] sm:$0xff] }
  0x4d   : > { %3691 = vmatmul.msk.bf16.vlgmr.msrb.gmra.mxu2 %vm486_vm0, %v4025_v57  ;;  %3700 = vmatmul.msk.bf16.vlgmr.msrb.gmra.mxu3 %vm486_vm0, %v4026_v58 }
  0x4e   : > { %1160 = vmatpush.bf16.xpose.msrb.mxu2 %v1151_v60  ;;  %1190 = vmatpush.bf16.xpose.msrb.mxu3 %v1181_v61 }
  0x5a   : > { %3709 = vmatmul.msk.bf16.vlgmr.msra.gmra.mxu0 %vm486_vm0, %v4027_v2  ;;  %3718 = vmatmul.msk.bf16.vlgmr.msra.gmra.mxu1 %vm486_vm0, %v4028_v3 }
  0x5b   : > { %1220 = vmatpush.bf16.xpose.msra.mxu0 %v1211_v8  ;;  %1250 = vmatpush.bf16.xpose.msra.mxu1 %v1241_v9 }
  0x5d   : > { %3727 = vmatmul.msk.bf16.vlgmr.msra.gmra.mxu2 %vm486_vm0, %v4029_v5  ;;  %3736 = vmatmul.msk.bf16.vlgmr.msra.gmra.mxu3 %vm486_vm0, %v4030_v6 }
  0x5e   : > { %1280 = vmatpush.bf16.xpose.msra.mxu2 %v1271_v7  ;;  %1310 = vmatpush.bf16.xpose.msra.mxu3 %v1301_v11  ;;  %v1572_v11 = vld [vmem:[%s5782_s4 + $0x18] sm:$0xff] }
  0x6a   : > { %3745 = vmatmul.msk.bf16.vlgmr.msrb.gmra.mxu0 %vm486_vm0, %v4031_v13  ;;  %3754 = vmatmul.msk.bf16.vlgmr.msrb.gmra.mxu1 %vm486_vm0, %v4032_v14 }
  0x6b   : > { %1340 = vmatpush.bf16.xpose.msrb.mxu0 %v1331_v24  ;;  %1370 = vmatpush.bf16.xpose.msrb.mxu1 %v1361_v30  ;;  %v1575_v30 = vld [vmem:[%s5782_s4 + $0x30] sm:$0xff] }
  0x6d   : > { %3763 = vmatmul.msk.bf16.vlgmr.msrb.gmra.mxu2 %vm486_vm0, %v4033_v15  ;;  %3772 = vmatmul.msk.bf16.vlgmr.msrb.gmra.mxu3 %vm486_vm0, %v4034_v16 }
  0x6e   : > { %1400 = vmatpush.bf16.xpose.msrb.mxu2 %v1391_v17  ;;  %1430 = vmatpush.bf16.xpose.msrb.mxu3 %v1421_v25 }
  0x7a   : > { %3781 = vmatmul.msk.bf16.vlgmr.msra.gmra.mxu0 %vm486_vm0, %v4035_v18  ;;  %3790 = vmatmul.msk.bf16.vlgmr.msra.gmra.mxu1 %vm486_vm0, %v4036_v19  ;;  %v1573_v19 = vld [vmem:[%s5782_s4 + $0x20] sm:$0xff] }
  0x7d   : > { %3799 = vmatmul.msk.bf16.vlgmr.msra.gmra.mxu2 %vm486_vm0, %v4037_v20  ;;  %3808 = vmatmul.msk.bf16.vlgmr.msra.gmra.mxu3 %vm486_vm0, %v4038_v21 }
  0x8a   : > { %3817 = vmatmul.msk.bf16.vlgmr.msrb.gmra.mxu0 %vm486_vm0, %v4039_v26  ;;  %3826 = vmatmul.msk.bf16.vlgmr.msrb.gmra.mxu1 %vm486_vm0, %v4040_v31 }
  0x8d   : > { %3835 = vmatmul.msk.bf16.vlgmr.msrb.gmra.mxu2 %vm486_vm0, %v4041_v27  ;;  %3844 = vmatmul.msk.bf16.vlgmr.msrb.gmra.mxu3 %vm486_vm0, %v4042_v28 }
  0x97   : > { %v502_v32 = vpop.f32.mrf.mxu0  ;;  %v532_v34 = vpop.f32.mrf.mxu1 }
  0x98   : > { %v1437_v36 = vmul.f32 0.25, %v502_v32  ;;  %v1439_v37 = vmul.f32 0.25, %v532_v34 }
  0x9a   : > { %v1505_v39 = vadd.f32 %v4562_v33, %v1437_v36  ;;  %v1507_v40 = vadd.f32 %v4567_v35, %v1439_v37 }
  0x9c   : > { %v4574_v41 = vadd.f32 %v1569_v38, %v1507_v40  ;;  %v4576_v42 = vadd.f32 %v1569_v38, %v1505_v39 }
  0x9e   : > { %v1671_v45 = vsel %vm486_vm0, %v4574_v41, -inf  ;;  %v1665_v46 = vsel %vm486_vm0, %v4576_v42, -inf }
  0x9f   : > { %1672 = vmax.xlane.f32.xlu1 %v1671_v45  ;;  %v534_v49 = vpop.f32.mrf.mxu1  ;;  %1666 = vmax.xlane.f32.xlu0 %v1665_v46  ;;  %v504_v51 = vpop.f32.mrf.mxu0 }
  0xa0   : > { %v562_v43 = vpop.f32.mrf.mxu2  ;;  %v592_v44 = vpop.f32.mrf.mxu3  ;;  %v1440_v52 = vmul.f32 0.25, %v534_v49  ;;  %v1438_v58 = vmul.f32 0.25, %v504_v51  ;;  %v1574_v49 = vld [vmem:[%s5782_s4 + $0x28] sm:$0xff] }
  0xa1   : > { %v1441_v47 = vmul.f32 0.25, %v562_v43  ;;  %v1443_v48 = vmul.f32 0.25, %v592_v44 }
  0xa2   : > { %v1508_v57 = vadd.f32 %v4585_v50, %v1440_v52  ;;  %v1506_v1 = vadd.f32 %v4599_v59, %v1438_v58  ;;  %v1576_v52 = vld [vmem:[%s5782_s4 + $0x38] sm:$0xff] }
  0xa3   : > { %v1509_v54 = vadd.f32 %v4562_v33, %v1441_v47  ;;  %v1511_v55 = vadd.f32 %v4567_v35, %v1443_v48 }
  0xa4   : > { %v4605_v62 = vadd.f32 %v1570_v56, %v1508_v57  ;;  %v4619_v14 = vadd.f32 %v1570_v56, %v1506_v1 }
  0xa5   : > { %v4601_v60 = vadd.f32 %v1571_v53, %v1509_v54  ;;  %v4603_v61 = vadd.f32 %v1571_v53, %v1511_v55 }
  0xa6   : > { %v1674_v4 = vsel %vm486_vm0, %v4605_v62, -inf  ;;  %v1668_v24 = vsel %vm486_vm0, %v4619_v14, -inf }
  0xa7   : > { %v1677_v63 = vsel %vm486_vm0, %v4601_v60, -inf  ;;  %v1683_v0 = vsel %vm486_vm0, %v4603_v61, -inf  ;;  %1675 = vmax.xlane.f32.xlu1 %v1674_v4  ;;  %v652_v7 = vpop.f32.mrf.mxu1  ;;  %v622_v8 = vpop.f32.mrf.mxu0 }
  0xa8   : > { %v594_v2 = vpop.f32.mrf.mxu3  ;;  %1678 = vmax.xlane.f32.xlu2 %v1677_v63  ;;  %v564_v3 = vpop.f32.mrf.mxu2  ;;  %1684 = vmax.xlane.f32.xlu0 %v1683_v0  ;;  %v1447_v9 = vmul.f32 0.25, %v652_v7  ;;  %v1445_v10 = vmul.f32 0.25, %v622_v8 }
  0xa9   : > { %v1444_v5 = vmul.f32 0.25, %v594_v2  ;;  %v1442_v6 = vmul.f32 0.25, %v564_v3  ;;  %v1577_v2 = vld [vmem:[%s5782_s4 + $0x40] sm:$0xff] }
  0xaa   : > { %v1513_v15 = vadd.f32 %v4562_v33, %v1445_v10  ;;  %v1515_v18 = vadd.f32 %v4567_v35, %v1447_v9 }
  0xab   : > { %v1512_v12 = vadd.f32 %v4585_v50, %v1444_v5  ;;  %v1510_v13 = vadd.f32 %v4599_v59, %v1442_v6 }
  0xac   : > { %v4636_v28 = vadd.f32 %v1573_v19, %v1513_v15  ;;  %v4638_v29 = vadd.f32 %v1573_v19, %v1515_v18 }
  0xad   : > { %v4622_v16 = vadd.f32 %v1572_v11, %v1510_v13  ;;  %v4624_v17 = vadd.f32 %v1572_v11, %v1512_v12 }
  0xae   : > { %v1689_v37 = vsel %vm486_vm0, %v4636_v28, -inf  ;;  %v1695_v39 = vsel %vm486_vm0, %v4638_v29, -inf }
  0xaf   : > { %v1680_v20 = vsel %vm486_vm0, %v4622_v16, -inf  ;;  %v1686_v23 = vsel %vm486_vm0, %v4624_v17, -inf  ;;  %v624_v27 = vpop.f32.mrf.mxu0  ;;  %v654_v36 = vpop.f32.mrf.mxu1 }
  0xb0   : > { %1681 = vmax.xlane.f32.xlu2 %v1680_v20  ;;  %v682_v21 = vpop.f32.mrf.mxu2  ;;  %v712_v22 = vpop.f32.mrf.mxu3  ;;  %1687 = vmax.xlane.f32.xlu1 %v1686_v23  ;;  %v1446_v32 = vmul.f32 0.25, %v624_v27  ;;  %v1448_v53 = vmul.f32 0.25, %v654_v36  ;;  %v1578_v27 = vld [vmem:[%s5782_s4 + $0x48] sm:$0xff] }
  0xb1   : > { %v1449_v25 = vmul.f32 0.25, %v682_v21  ;;  %v1451_v26 = vmul.f32 0.25, %v712_v22  ;;  %1669 = vmax.xlane.f32.xlu0 %v1668_v24  ;;  %v1579_v24 = vld [vmem:[%s5782_s4 + $0x50] sm:$0xff] }
  0xb2   : > { %v1514_v43 = vadd.f32 %v4599_v59, %v1446_v32  ;;  %v1516_v1 = vadd.f32 %v4585_v50, %v1448_v53  ;;  %v1580_v53 = vld [vmem:[%s5782_s4 + $0x58] sm:$0xff] }
  0xb3   : > { %v1517_v31 = vadd.f32 %v4562_v33, %v1449_v25  ;;  %v1519_v34 = vadd.f32 %v4567_v35, %v1451_v26 }
  0xb4   : > { %v4663_v56 = vadd.f32 %v1574_v49, %v1514_v43  ;;  %v4681_v13 = vadd.f32 %v1574_v49, %v1516_v1 }
  0xb5   : > { %v4647_v38 = vadd.f32 %v1575_v30, %v1517_v31  ;;  %v4654_v48 = vadd.f32 %v1575_v30, %v1519_v34 }
  0xb6   : > { %v1692_v7 = vsel %vm486_vm0, %v4663_v56, -inf  ;;  %v1698_v22 = vsel %vm486_vm0, %v4681_v13, -inf }
  0xb7   : > { %v1701_v40 = vsel %vm486_vm0, %v4647_v38, -inf  ;;  %v742_v47 = vpop.f32.mrf.mxu0  ;;  %v1707_v57 = vsel %vm486_vm0, %v4654_v48, -inf  ;;  %v772_v63 = vpop.f32.mrf.mxu1 }
  0xb8   : > { %v684_v44 = vpop.f32.mrf.mxu2  ;;  %1690 = vmax.xlane.f32.xlu2 %v1689_v37  ;;  %v714_v45 = vpop.f32.mrf.mxu3  ;;  %1696 = vmax.xlane.f32.xlu1 %v1695_v39  ;;  %v1453_v51 = vmul.f32 0.25, %v742_v47  ;;  %v1455_v10 = vmul.f32 0.25, %v772_v63 }
  0xb9   : > { %v1450_v46 = vmul.f32 0.25, %v684_v44  ;;  %1702 = vmax.xlane.f32.xlu0 %v1701_v40  ;;  %v1452_v55 = vmul.f32 0.25, %v714_v45 }
  0xba   : > { %v1521_v0 = vadd.f32 %v4562_v33, %v1453_v51  ;;  %v1523_v19 = vadd.f32 %v4567_v35, %v1455_v10 }
  0xbb   : > { %v1518_v54 = vadd.f32 %v4599_v59, %v1450_v46  ;;  %v1520_v3 = vadd.f32 %v4585_v50, %v1452_v55 }
  0xbc   : > { %v4679_v11 = vadd.f32 %v1577_v2, %v1521_v0  ;;  %v4700_v31 = vadd.f32 %v1577_v2, %v1523_v19 }
  0xbd   : > { %v4667_v58 = vadd.f32 %v1576_v52, %v1518_v54  ;;  %v4683_v15 = vadd.f32 %v1576_v52, %v1520_v3 }
  0xbe   : > { %v1713_v20 = vsel %vm486_vm0, %v4679_v11, -inf  ;;  %v1719_v43 = vsel %vm486_vm0, %v4700_v31, -inf }
  0xbf   : > { %v1704_v6 = vsel %vm486_vm0, %v4667_v58, -inf  ;;  %v744_v8 = vpop.f32.mrf.mxu0  ;;  %v774_v23 = vpop.f32.mrf.mxu1  ;;  %v1710_v26 = vsel %vm486_vm0, %v4683_v15, -inf }
  0xc0   : > { %1708 = vmax.xlane.f32.xlu2 %v1707_v57  ;;  %v802_v4 = vpop.f32.mrf.mxu2  ;;  %v832_v5 = vpop.f32.mrf.mxu3  ;;  %1705 = vmax.xlane.f32.xlu1 %v1704_v6  ;;  %v1454_v12 = vmul.f32 0.25, %v744_v8  ;;  %v1456_v34 = vmul.f32 0.25, %v774_v23  ;;  %v1583_v8 = vld [vmem:[%s5782_s4 + $0x70] sm:$0xff] }
  0xc1   : > { %1693 = vmax.xlane.f32.xlu0 %v1692_v7  ;;  %v1457_v9 = vmul.f32 0.25, %v802_v4  ;;  %v1459_v39 = vmul.f32 0.25, %v832_v5 }
  0xc2   : > { %v1522_v21 = vadd.f32 %v4599_v59, %v1454_v12  ;;  %v1524_v45 = vadd.f32 %v4585_v50, %v1456_v34 }
  0xc3   : > { %v1525_v18 = vadd.f32 %v4562_v33, %v1457_v9  ;;  %v1527_v47 = vadd.f32 %v4567_v35, %v1459_v39  ;;  %v1581_v9 = vld [vmem:[%s5782_s4 + $0x60] sm:$0xff] }
  0xc4   : > { %v4704_v36 = vadd.f32 %v1578_v27, %v1522_v21  ;;  %v4718_v63 = vadd.f32 %v1578_v27, %v1524_v45  ;;  %v1584_v45 = vld [vmem:[%s5782_s4 + $0x78] sm:$0xff] }
  0xc5   : > { %v4702_v32 = vadd.f32 %v1579_v24, %v1525_v18  ;;  %v4720_v1 = vadd.f32 %v1579_v24, %v1527_v47 }
  0xc6   : > { %v1716_v46 = vsel %vm486_vm0, %v4704_v36, -inf  ;;  %v1722_v7 = vsel %vm486_vm0, %v4718_v63, -inf }
  0xc7   : > { %v862_v37 = vpop.f32.mrf.mxu0  ;;  %v1725_v44 = vsel %vm486_vm0, %v4702_v32, -inf  ;;  %v892_v52 = vpop.f32.mrf.mxu1  ;;  %v1731_v12 = vsel %vm486_vm0, %v4720_v1, -inf }
  0xc8   : > { %1699 = vmax.xlane.f32.xlu2 %v1698_v22  ;;  %v804_v25 = vpop.f32.mrf.mxu2  ;;  %v834_v30 = vpop.f32.mrf.mxu3  ;;  %1714 = vmax.xlane.f32.xlu1 %v1713_v20  ;;  %v1463_v54 = vmul.f32 0.25, %v892_v52  ;;  %v1461_v21 = vmul.f32 0.25, %v862_v37 }
  0xc9   : > { %1711 = vmax.xlane.f32.xlu0 %v1710_v26  ;;  %v1460_v40 = vmul.f32 0.25, %v834_v30  ;;  %v1458_v57 = vmul.f32 0.25, %v804_v25 }
  0xca   : > { %v1531_v4 = vadd.f32 %v4567_v35, %v1463_v54  ;;  %v1529_v30 = vadd.f32 %v4562_v33, %v1461_v21 }
  0xcb   : > { %v1528_v49 = vadd.f32 %v4585_v50, %v1460_v40  ;;  %v1526_v6 = vadd.f32 %v4599_v59, %v1458_v57 }
  0xcc   : > { %v4741_v20 = vadd.f32 %v1581_v9, %v1531_v4 }
  0xcd   : > { %v4722_v2 = vadd.f32 %v1580_v53, %v1528_v49  ;;  %v4743_v22 = vadd.f32 %v1580_v53, %v1526_v6 }
  0xce   : > { %v1743_v27 = vsel %vm486_vm0, %v4741_v20, -inf }
  0xcf   : > { %v864_v3 = vpop.f32.mrf.mxu0  ;;  %v1734_v18 = vsel %vm486_vm0, %v4722_v2, -inf  ;;  %v1728_v34 = vsel %vm486_vm0, %v4743_v22, -inf }
  0xd0   : > { %1717 = vmax.xlane.f32.xlu2 %v1716_v46  ;;  %v922_v51 = vpop.f32.mrf.mxu2  ;;  %1726 = vmax.xlane.f32.xlu1 %v1725_v44  ;;  %v952_v0 = vpop.f32.mrf.mxu3  ;;  %v1462_v24 = vmul.f32 0.25, %v864_v3  ;;  %v1582_v46 = vld [vmem:[%s5782_s4 + $0x68] sm:$0xff] }
  0xd1   : > { %1720 = vmax.xlane.f32.xlu0 %v1719_v43  ;;  %v1465_v55 = vmul.f32 0.25, %v922_v51  ;;  %v894_v43 = vpop.f32.mrf.mxu1  ;;  %v1467_v49 = vmul.f32 0.25, %v952_v0  ;;  %v4760_v51 = vadd.f32 %v1581_v9, %v1529_v30 }
  0xd2   : > { %v1530_v37 = vadd.f32 %v4599_v59, %v1462_v24 }
  0xd3   : > { %v1533_v5 = vadd.f32 %v4562_v33, %v1465_v55  ;;  %v1535_v57 = vadd.f32 %v4567_v35, %v1467_v49  ;;  %v1737_v3 = vsel %vm486_vm0, %v4760_v51, -inf }
  0xd4   : > { %v4764_v54 = vadd.f32 %v1582_v46, %v1530_v37 }
  0xd5   : > { %v4739_v19 = vadd.f32 %v1583_v8, %v1533_v5  ;;  %v1587_v5 = vld [vmem:[%s5782_s4 + $0x90] sm:$0xff]  ;;  %v4780_v21 = vadd.f32 %v1583_v8, %v1535_v57 }
  0xd7   : > { %v1749_v26 = vsel %vm486_vm0, %v4739_v19, -inf  ;;  %v982_v39 = vpop.f32.mrf.mxu0  ;;  %5833 = vst [vmem:[#allocation3_spill] sm:$0xff] %v4780_v21  ;;  %v1755_v30 = vsel %vm486_vm0, %v4780_v21, -inf }
  0xd8   : > { %1723 = vmax.xlane.f32.xlu2 %v1722_v7  ;;  %v924_v10 = vpop.f32.mrf.mxu2  ;;  %1735 = vmax.xlane.f32.xlu1 %v1734_v18  ;;  %v954_v25 = vpop.f32.mrf.mxu3  ;;  %v1740_v7 = vsel %vm486_vm0, %v4764_v54, -inf  ;;  %v1464_v18 = vmul.f32 0.25, %v894_v43 }
  0xd9   : > { %1732 = vmax.xlane.f32.xlu0 %v1731_v12  ;;  %v1466_v23 = vmul.f32 0.25, %v924_v10  ;;  %v1468_v52 = vmul.f32 0.25, %v954_v25  ;;  %v1012_v10 = vpop.f32.mrf.mxu1 }
  0xda   : > { %v1471_v37 = vmul.f32 0.25, %v1012_v10 }
  0xdb   : > { %v1534_v40 = vadd.f32 %v4599_v59, %v1466_v23  ;;  %v1536_v0 = vadd.f32 %v4585_v50, %v1468_v52  ;;  %v1469_v23 = vmul.f32 0.25, %v982_v39 }
  0xdd   : > { %v4762_v53 = vadd.f32 %v1584_v45, %v1534_v40  ;;  %v4782_v25 = vadd.f32 %v1584_v45, %v1536_v0  ;;  %v1586_v45 = vld [vmem:[%s5782_s4 + $0x88] sm:$0xff]  ;;  %v1539_v0 = vadd.f32 %v4567_v35, %v1471_v37 }
  0xdf   : > { %v1752_v6 = vsel %vm486_vm0, %v4762_v53, -inf  ;;  %v984_v9 = vpop.f32.mrf.mxu0  ;;  %5834 = vst [vmem:[#allocation4_spill] sm:$0xff] %v4782_v25  ;;  %v1758_v8 = vsel %vm486_vm0, %v4782_v25, -inf }
  0xe0   : > { %1729 = vmax.xlane.f32.xlu2 %v1728_v34  ;;  %v1042_v44 = vpop.f32.mrf.mxu2  ;;  %1744 = vmax.xlane.f32.xlu1 %v1743_v27  ;;  %v1072_v4 = vpop.f32.mrf.mxu3  ;;  %v1470_v24 = vmul.f32 0.25, %v984_v9  ;;  %v1532_v27 = vadd.f32 %v4585_v50, %v1464_v18  ;;  %v1537_v34 = vadd.f32 %v4562_v33, %v1469_v23 }
  0xe1   : > { %1750 = vmax.xlane.f32.xlu0 %v1749_v26  ;;  %v1473_v47 = vmul.f32 0.25, %v1042_v44  ;;  %v1585_v44 = vld [vmem:[%s5782_s4 + $0x80] sm:$0xff]  ;;  %v1014_v49 = vpop.f32.mrf.mxu1  ;;  %v1475_v52 = vmul.f32 0.25, %v1072_v4 }
  0xe2   : > { %v1538_v40 = vadd.f32 %v4599_v59, %v1470_v24  ;;  %v4801_v57 = vadd.f32 %v1585_v44, %v1537_v34  ;;  %v4814_v18 = vadd.f32 %v1585_v44, %v1539_v0 }
  0xe3   : > { %v1541_v55 = vadd.f32 %v4562_v33, %v1473_v47  ;;  %v4799_v47 = vadd.f32 %v1582_v46, %v1532_v27  ;;  %v1588_v27 = vld [vmem:[%s5782_s4 + $0x98] sm:$0xff] }
  0xe4   : > { %5836 = vst [vmem:[#allocation6_spill] sm:$0xff] %v4801_v57  ;;  %v1761_v46 = vsel %vm486_vm0, %v4801_v57, -inf }
  0xe5   : > { %v4778_v12 = vadd.f32 %v1587_v5, %v1541_v55  ;;  %5835 = vst [vmem:[#allocation5_spill] sm:$0xff] %v4799_v47 }
  0xe6   : > { %5838 = vst [vmem:[#allocation8_spill] sm:$0xff] %v4814_v18 }
  0xe7   : > { %5832 = vst [vmem:[#allocation2_spill] sm:$0xff] %v4778_v12  ;;  %v1773_v26 = vsel %vm486_vm0, %v4778_v12, -inf  ;;  %v1102_v10 = vpop.f32.mrf.mxu0 }
  0xe8   : > { %1738 = vmax.xlane.f32.xlu2 %v1737_v3  ;;  %1753 = vmax.xlane.f32.xlu1 %v1752_v6  ;;  %v1044_v39 = vpop.f32.mrf.mxu2  ;;  %v1074_v43 = vpop.f32.mrf.mxu3  ;;  %v4803_v3 = vadd.f32 %v1586_v45, %v1538_v40  ;;  %v1746_v6 = vsel %vm486_vm0, %v4799_v47, -inf  ;;  %v1477_v24 = vmul.f32 0.25, %v1102_v10 }
  0xe9   : > { %1741 = vmax.xlane.f32.xlu0 %v1740_v7  ;;  %v1476_v55 = vmul.f32 0.25, %v1074_v43  ;;  %v1543_v7 = vadd.f32 %v4567_v35, %v1475_v52  ;;  %v1132_v37 = vpop.f32.mrf.mxu1 }
  0xea   : > { %5837 = vst [vmem:[#allocation7_spill] sm:$0xff] %v4803_v3  ;;  %v1764_v4 = vsel %vm486_vm0, %v4803_v3, -inf  ;;  %v1545_v43 = vadd.f32 %v4562_v33, %v1477_v24 }
  0xeb   : > { %v1544_v9 = vadd.f32 %v4585_v50, %v1476_v55  ;;  %v4819_v34 = vadd.f32 %v1587_v5, %v1543_v7 }
  0xed   : > { %5839 = vst [vmem:[#allocation9_spill] sm:$0xff] %v4819_v34  ;;  %v4821_v40 = vadd.f32 %v1588_v27, %v1544_v9  ;;  %v1779_v5 = vsel %vm486_vm0, %v4819_v34, -inf }
  0xef   : > { %5840 = vst [vmem:[#allocation10_spill] sm:$0xff] %v4821_v40 }
  0xf0   : > { %1756 = vmax.xlane.f32.xlu2 %v1755_v30  ;;  %1774 = vmax.xlane.f32.xlu1 %v1773_v26  ;;  %v1162_v23 = vpop.f32.mrf.mxu2  ;;  %v1474_v26 = vmul.f32 0.25, %v1044_v39  ;;  %v1472_v30 = vmul.f32 0.25, %v1014_v49  ;;  %v1589_v39 = vld [vmem:[%s5782_s4 + $0xa0] sm:$0xff]  ;;  %v1782_v49 = vsel %vm486_vm0, %v4821_v40, -inf  ;;  %v1192_v0 = vpop.f32.mrf.mxu3 }
  0xf1   : > { %1759 = vmax.xlane.f32.xlu0 %v1758_v8  ;;  %v1767_v8 = vsel %vm486_vm0, %v4814_v18, -inf  ;;  %v1481_v55 = vmul.f32 0.25, %v1162_v23  ;;  %v1483_v7 = vmul.f32 0.25, %v1192_v0  ;;  %v4835_v9 = vadd.f32 %v1589_v39, %v1545_v43  ;;  %v1134_v43 = vpop.f32.mrf.mxu1 }
  0xf2   : > { %v1542_v44 = vadd.f32 %v4599_v59, %v1474_v26  ;;  %v1540_v52 = vadd.f32 %v4585_v50, %v1472_v30 }
  0xf3   : > { %5841 = vst [vmem:[#allocation11_spill] sm:$0xff] %v4835_v9  ;;  %v1549_v26 = vadd.f32 %v4562_v33, %v1481_v55  ;;  %v1785_v23 = vsel %vm486_vm0, %v4835_v9, -inf }
  0xf4   : > { %v4839_v24 = vadd.f32 %v1586_v45, %v1540_v52 }
  0xf6   : > { %5843 = vst [vmem:[#allocation13_spill] sm:$0xff] %v4839_v24  ;;  %v1770_v45 = vsel %vm486_vm0, %v4839_v24, -inf }
  0xf8   : > { %1747 = vmax.xlane.f32.xlu2 %v1746_v6  ;;  %1765 = vmax.xlane.f32.xlu1 %v1764_v4  ;;  %v1479_v6 = vmul.f32 0.25, %v1132_v37  ;;  %v4837_v4 = vadd.f32 %v1588_v27, %v1542_v44  ;;  %v1164_v10 = vpop.f32.mrf.mxu2  ;;  %v1591_v37 = vld [vmem:[%s5782_s4 + $0xb0] sm:$0xff]  ;;  %v1194_v55 = vpop.f32.mrf.mxu3 }
  0xf9   : > { %1762 = vmax.xlane.f32.xlu0 %v1761_v46  ;;  %v1104_v46 = vpop.f32.mrf.mxu0  ;;  %v4853_v44 = vadd.f32 %v1591_v37, %v1549_v26 }
  0xfa   : > { %5842 = vst [vmem:[#allocation12_spill] sm:$0xff] %v4837_v4  ;;  %v1547_v30 = vadd.f32 %v4567_v35, %v1479_v6  ;;  %v1776_v27 = vsel %vm486_vm0, %v4837_v4, -inf  ;;  %v1480_v6 = vmul.f32 0.25, %v1134_v43 }
  0xfb   : > { %5844 = vst [vmem:[#allocation14_spill] sm:$0xff] %v4853_v44  ;;  %v1797_v9 = vsel %vm486_vm0, %v4853_v44, -inf }
  0xfc   : > { %v4855_v52 = vadd.f32 %v1589_v39, %v1547_v30  ;;  %v1548_v30 = vadd.f32 %v4585_v50, %v1480_v6 }
  0xfe   : > { %5845 = vst [vmem:[#allocation15_spill] sm:$0xff] %v4855_v52  ;;  %v1791_v24 = vsel %vm486_vm0, %v4855_v52, -inf }
 0x100   : > { %1768 = vmax.xlane.f32.xlu2 %v1767_v8  ;;  %1783 = vmax.xlane.f32.xlu1 %v1782_v49  ;;  %v1551_v8 = vadd.f32 %v4567_v35, %v1483_v7  ;;  %v1478_v49 = vmul.f32 0.25, %v1104_v46  ;;  %v1482_v7 = vmul.f32 0.25, %v1164_v10  ;;  %v1590_v10 = vld [vmem:[%s5782_s4 + $0xa8] sm:$0xff]  ;;  %v1312_v6 = vpop.f32.mrf.mxu3 }
 0x101   : > { %1780 = vmax.xlane.f32.xlu0 %v1779_v5  ;;  %v1222_v0 = vpop.f32.mrf.mxu0 }
 0x102   : > { %v4857_v5 = vadd.f32 %v1591_v37, %v1551_v8  ;;  %v1546_v39 = vadd.f32 %v4599_v59, %v1478_v49  ;;  %v1550_v46 = vadd.f32 %v4599_v59, %v1482_v7  ;;  %v1252_v8 = vpop.f32.mrf.mxu1 }
 0x103   : > { %v1487_v37 = vmul.f32 0.25, %v1252_v8 }
 0x104   : > { %5846 = vst [vmem:[#allocation16_spill] sm:$0xff] %v4857_v5  ;;  %v1803_v26 = vsel %vm486_vm0, %v4857_v5, -inf  ;;  %v4874_v49 = vadd.f32 %v1590_v10, %v1546_v39  ;;  %v4882_v5 = vadd.f32 %v1590_v10, %v1548_v30  ;;  %v1595_v39 = vld [vmem:[%s5782_s4 + $0xd0] sm:$0xff]  ;;  %v1593_v30 = vld [vmem:[%s5782_s4 + $0xc0] sm:$0xff] }
 0x106   : > { %5847 = vst [vmem:[#allocation17_spill] sm:$0xff] %v4874_v49  ;;  %v1794_v10 = vsel %vm486_vm0, %v4882_v5, -inf }
 0x107   : > { %5849 = vst [vmem:[#allocation19_spill] sm:$0xff] %v4882_v5 }
 0x108   : > { %1777 = vmax.xlane.f32.xlu2 %v1776_v27  ;;  %1786 = vmax.xlane.f32.xlu1 %v1785_v23  ;;  %v1282_v27 = vpop.f32.mrf.mxu2  ;;  %v1592_v23 = vld [vmem:[%s5782_s4 + $0xb8] sm:$0xff] }
 0x109   : > { %1771 = vmax.xlane.f32.xlu0 %v1770_v45  ;;  %v1489_v43 = vmul.f32 0.25, %v1282_v27  ;;  %v1484_v45 = vmul.f32 0.25, %v1194_v55  ;;  %v4880_v7 = vadd.f32 %v1592_v23, %v1550_v46  ;;  %v1788_v55 = vsel %vm486_vm0, %v4874_v49, -inf }
 0x10a   : > { %v1254_v57 = vpop.f32.mrf.mxu1 }
 0x10b   : > { %5848 = vst [vmem:[#allocation18_spill] sm:$0xff] %v4880_v7  ;;  %v1557_v52 = vadd.f32 %v4562_v33, %v1489_v43  ;;  %v1552_v8 = vadd.f32 %v4585_v50, %v1484_v45  ;;  %v1800_v46 = vsel %vm486_vm0, %v4880_v7, -inf  ;;  %v1485_v45 = vmul.f32 0.25, %v1222_v0  ;;  %v1314_v7 = vpop.f32.mrf.mxu3 }
 0x10d   : > { %v4905_v4 = vadd.f32 %v1592_v23, %v1552_v8 }
 0x10f   : > { %5852 = vst [vmem:[#allocation22_spill] sm:$0xff] %v4905_v4  ;;  %v1806_v0 = vsel %vm486_vm0, %v4905_v4, -inf }
 0x110   : > { %1798 = vmax.xlane.f32.xlu2 %v1797_v9  ;;  %1804 = vmax.xlane.f32.xlu1 %v1803_v26  ;;  %v1555_v26 = vadd.f32 %v4567_v35, %v1487_v37  ;;  %v1284_v27 = vpop.f32.mrf.mxu2  ;;  %v4899_v37 = vadd.f32 %v1595_v39, %v1557_v52 }
 0x111   : > { %1792 = vmax.xlane.f32.xlu0 %v1791_v24  ;;  %v1224_v24 = vpop.f32.mrf.mxu0  ;;  %v1490_v40 = vmul.f32 0.25, %v1284_v27 }
 0x112   : > { %v4876_v44 = vpop.xlane.xlu1 %1672  ;;  %v4878_v9 = vpop.xlane.xlu0 %1666  ;;  %5850 = vst [vmem:[#allocation20_spill] sm:$0xff] %v4899_v37  ;;  %v4901_v43 = vadd.f32 %v1593_v30, %v1555_v26  ;;  %v1486_v34 = vmul.f32 0.25, %v1224_v24  ;;  %v1553_v26 = vadd.f32 %v4562_v33, %v1485_v45  ;;  %v1594_v45 = vld [vmem:[%s5782_s4 + $0xc8] sm:$0xff] }
 0x113   : > { %v1558_v8 = vadd.f32 %v4599_v59, %v1490_v40  ;;  %v1492_v40 = vmul.f32 0.25, %v1314_v7  ;;  %v1599_v7 = vld [vmem:[%s5782_s4 + $0xf0] sm:$0xff] }
 0x114   : > { %5851 = vst [vmem:[#allocation21_spill] sm:$0xff] %v4901_v43  ;;  %v1815_v52 = vsel %vm486_vm0, %v4901_v43, -inf  ;;  %v1554_v24 = vadd.f32 %v4599_v59, %v1486_v34  ;;  %v1491_v43 = vmul.f32 0.25, %v1312_v6  ;;  %v4928_v5 = vadd.f32 %v1593_v30, %v1553_v26 }
 0x115   : > { %v1560_v30 = vadd.f32 %v4585_v50, %v1492_v40 }
 0x116   : > { %5853 = vst [vmem:[#allocation23_spill] sm:$0xff] %v4928_v5  ;;  %v1559_v47 = vadd.f32 %v4567_v35, %v1491_v43  ;;  %v1809_v6 = vsel %vm486_vm0, %v4928_v5, -inf }
 0x118   : > { %1789 = vmax.xlane.f32.xlu2 %v1788_v55  ;;  %1795 = vmax.xlane.f32.xlu1 %v1794_v10  ;;  %v1402_v27 = vpop.f32.mrf.mxu2  ;;  %v1596_v10 = vld [vmem:[%s5782_s4 + $0xd8] sm:$0xff]  ;;  %v4954_v12 = vadd.f32 %v1595_v39, %v1559_v47 }
 0x119   : > { %1801 = vmax.xlane.f32.xlu0 %v1800_v46  ;;  %v1821_v46 = vsel %vm486_vm0, %v4899_v37, -inf  ;;  %v1342_v23 = vpop.f32.mrf.mxu0  ;;  %v1497_v37 = vmul.f32 0.25, %v1402_v27  ;;  %v1432_v27 = vpop.f32.mrf.mxu3 }
 0x11a   : > { %v4907_v55 = vpop.xlane.xlu1 %1675  ;;  %5857 = vst [vmem:[#allocation27_spill] sm:$0xff] %v4954_v12  ;;  %v1493_v25 = vmul.f32 0.25, %v1342_v23 }
 0x11b   : > { %v4903_v49 = vpop.xlane.xlu2 %1678  ;;  %v4909_v18 = vpop.xlane.xlu0 %1684  ;;  %v1565_v3 = vadd.f32 %v4562_v33, %v1497_v37 }
 0x11c   : > { %v1561_v47 = vadd.f32 %v4562_v33, %v1493_v25 }
 0x120   : > { %1807 = vmax.xlane.f32.xlu2 %v1806_v0  ;;  %1816 = vmax.xlane.f32.xlu1 %v1815_v52  ;;  %v4936_v52 = vadd.f32 %v1594_v45, %v1554_v24  ;;  %v1488_v24 = vmul.f32 0.25, %v1254_v57  ;;  %v1827_v57 = vsel %vm486_vm0, %v4954_v12, -inf }
 0x121   : > { %1822 = vmax.xlane.f32.xlu0 %v1821_v46  ;;  %v4934_v46 = vadd.f32 %v1596_v10, %v1558_v8  ;;  %v1344_v43 = vpop.f32.mrf.mxu0  ;;  %v4950_v8 = vadd.f32 %v1599_v7, %v1565_v3  ;;  %v1372_v3 = vpop.f32.mrf.mxu1 }
 0x122   : > { %5855 = vst [vmem:[#allocation25_spill] sm:$0xff] %v4936_v52  ;;  %v1812_v37 = vsel %vm486_vm0, %v4936_v52, -inf  ;;  %v1494_v21 = vmul.f32 0.25, %v1344_v43  ;;  %v1495_v43 = vmul.f32 0.25, %v1372_v3  ;;  %v1861_v52 = vsub.f32 %v4601_v60, %v4903_v49 }
 0x123   : > { %v4926_v4 = vpop.xlane.xlu2 %1681  ;;  %v4930_v34 = vpop.xlane.xlu1 %1687  ;;  %5854 = vst [vmem:[#allocation24_spill] sm:$0xff] %v4934_v46  ;;  %v1824_v26 = vsel %vm486_vm0, %v4934_v46, -inf  ;;  %v4960_v46 = vadd.f32 %v1596_v10, %v1560_v30  ;;  %v1597_v30 = vld [vmem:[%s5782_s4 + $0xe0] sm:$0xff] }
 0x124   : > { %v4932_v0 = vpop.xlane.xlu0 %1669  ;;  %5856 = vst [vmem:[#allocation26_spill] sm:$0xff] %v4950_v8  ;;  %v1562_v39 = vadd.f32 %v4599_v59, %v1494_v21  ;;  %v1434_v10 = vpop.f32.mrf.mxu3  ;;  %v1499_v21 = vmul.f32 0.25, %v1432_v27  ;;  %v1929_v60 = vmul.f32 1.442695, %v1861_v52 }
 0x125   : > { %5858 = vst [vmem:[#allocation28_spill] sm:$0xff] %v4960_v46  ;;  %v1830_v23 = vsel %vm486_vm0, %v4960_v46, -inf  ;;  %v1500_v25 = vmul.f32 0.25, %v1434_v10  ;;  %v1563_v46 = vadd.f32 %v4567_v35, %v1495_v43 }
 0x126   : > { %v1567_v27 = vadd.f32 %v4567_v35, %v1499_v21  ;;  %v1600_v35 = vld [vmem:[%s5782_s4 + $0xf8] sm:$0xff]  ;;  %4115 = vpow2.f32 %v1929_v60  ;;  %v1862_v60 = vsub.f32 %v4622_v16, %v4926_v4 }
 0x127   : > { %v5000_v43 = vadd.f32 %v1597_v30, %v1563_v46  ;;  %v1859_v46 = vsub.f32 %v4574_v41, %v4876_v44 }
 0x128   : > { %1810 = vmax.xlane.f32.xlu2 %v1809_v6  ;;  %1825 = vmax.xlane.f32.xlu1 %v1824_v26  ;;  %v1845_v26 = vsel %vm486_vm0, %v4950_v8, -inf }
 0x129   : > { %1813 = vmax.xlane.f32.xlu0 %v1812_v37  ;;  %v1556_v37 = vadd.f32 %v4585_v50, %v1488_v24  ;;  %v1598_v24 = vld [vmem:[%s5782_s4 + $0xe8] sm:$0xff]  ;;  %v1374_v10 = vpop.f32.mrf.mxu1  ;;  %v1839_v52 = vsel %vm486_vm0, %v5000_v43, -inf  ;;  %v1925_v44 = vmul.f32 1.442695, %v1859_v46 }
 0x12b   : > { %v4952_v5 = vpop.xlane.xlu2 %1690  ;;  %v4956_v40 = vpop.xlane.xlu1 %1696  ;;  %v4979_v33 = vadd.f32 %v1594_v45, %v1556_v37  ;;  %v1568_v37 = vadd.f32 %v4585_v50, %v1500_v25  ;;  %4117 = vpow2.f32 %v1925_v44 }
 0x12c   : > { %v4958_v6 = vpop.xlane.xlu0 %1702  ;;  %v1404_v45 = vpop.f32.mrf.mxu2 }
 0x12d   : > { %5859 = vst [vmem:[#allocation29_spill] sm:$0xff] %v4979_v33  ;;  %v1818_v12 = vsel %vm486_vm0, %v4979_v33, -inf  ;;  %v1498_v49 = vmul.f32 0.25, %v1404_v45  ;;  %v1858_v45 = vsub.f32 %v4619_v14, %v4932_v0  ;;  %v5039_v0 = vpop.eup %4115 }
 0x130   : > { %1828 = vmax.xlane.f32.xlu2 %v1827_v57  ;;  %1846 = vmax.xlane.f32.xlu1 %v1845_v26  ;;  %v4985_v26 = vadd.f32 %v1597_v30, %v1561_v47  ;;  %v1857_v30 = vsub.f32 %v4576_v42, %v4878_v9  ;;  %v1923_v42 = vmul.f32 1.442695, %v1858_v45  ;;  %v1860_v45 = vsub.f32 %v4605_v62, %v4907_v55 }
 0x131   : > { %1831 = vmax.xlane.f32.xlu0 %v1830_v23  ;;  %v4987_v23 = vadd.f32 %v1598_v24, %v1562_v39 }
 0x132   : > { %5860 = vst [vmem:[#allocation30_spill] sm:$0xff] %v4985_v26  ;;  %v1833_v47 = vsel %vm486_vm0, %v4985_v26, -inf  ;;  %v5011_v26 = vadd.f32 %v1599_v7, %v1567_v27  ;;  %v1927_v62 = vmul.f32 1.442695, %v1860_v45 }
 0x133   : > { %v4977_v8 = vpop.xlane.xlu2 %1708  ;;  %v4981_v57 = vpop.xlane.xlu1 %1705  ;;  %5861 = vst [vmem:[#allocation31_spill] sm:$0xff] %v4987_v23  ;;  %v1836_v39 = vsel %vm486_vm0, %v4987_v23, -inf  ;;  %v5013_v23 = vadd.f32 %v1600_v35, %v1568_v37  ;;  %v1921_v37 = vmul.f32 1.442695, %v1857_v30 }
 0x134   : > { %v4983_v3 = vpop.xlane.xlu0 %1693  ;;  %v1851_v27 = vsel %vm486_vm0, %v5011_v26, -inf }
 0x135   : > { %v1854_v41 = vsel %vm486_vm0, %v5013_v23, -inf  ;;  %4119 = vpow2.f32 %v1921_v37 }
 0x136   : > { %4121 = vpow2.f32 %v1923_v42 }
 0x138   : > { %1819 = vmax.xlane.f32.xlu2 %v1818_v12  ;;  %1837 = vmax.xlane.f32.xlu1 %v1836_v39  ;;  %v1496_v12 = vmul.f32 0.25, %v1374_v10  ;;  %v1863_v10 = vsub.f32 %v4603_v61, %v4909_v18  ;;  %v1931_v61 = vmul.f32 1.442695, %v1862_v60  ;;  %v5053_v18 = vpop.eup %4117  ;;  %v1867_v60 = vsub.f32 %v4638_v29, %v4956_v40 }
 0x139   : > { %1834 = vmax.xlane.f32.xlu0 %v1833_v47  ;;  %v1566_v47 = vadd.f32 %v4599_v59, %v1498_v49  ;;  %v1864_v49 = vsub.f32 %v4624_v17, %v4930_v34 }
 0x13a   : > { %v1564_v7 = vadd.f32 %v4585_v50, %v1496_v12  ;;  %v2061_v12 = vsel %vm486_vm0, %v5039_v0, 0.0  ;;  %v1933_v46 = vmul.f32 1.442695, %v1863_v10 }
 0x13b   : > { %v5002_v33 = vpop.xlane.xlu2 %1699  ;;  %v5009_v25 = vpop.xlane.xlu1 %1714  ;;  %v5031_v39 = vadd.f32 %v1600_v35, %v1566_v47  ;;  %v1935_v16 = vmul.f32 1.442695, %v1864_v49  ;;  %v1869_v47 = vsub.f32 %v4647_v38, %v4958_v6  ;;  %v1866_v49 = vsub.f32 %v4663_v56, %v4983_v3 }
 0x13c   : > { %v5007_v21 = vpop.xlane.xlu0 %1711  ;;  %v5037_v50 = vadd.f32 %v1598_v24, %v1564_v7  ;;  %v5057_v17 = vpop.eup %4119  ;;  %4123 = vpow2.f32 %v1933_v46  ;;  %v1865_v7 = vsub.f32 %v4636_v28, %v4952_v5 }
 0x13d   : > { %v1848_v35 = vsel %vm486_vm0, %v5031_v39, -inf  ;;  %v5063_v30 = vpop.eup %4121  ;;  %4125 = vpow2.f32 %v1931_v61  ;;  %v1945_v55 = vmul.f32 1.442695, %v1869_v47  ;;  %v1941_v61 = vmul.f32 1.442695, %v1867_v60 }
 0x13e   : > { %v1842_v24 = vsel %vm486_vm0, %v5037_v50, -inf  ;;  %4127 = vpow2.f32 %v1935_v16  ;;  %v2052_v44 = vsel %vm486_vm0, %v5063_v30, 0.0  ;;  %v1937_v38 = vmul.f32 1.442695, %v1865_v7 }
 0x13f   : > { %4129 = vpow2.f32 %v1927_v62  ;;  %v1939_v29 = vmul.f32 1.442695, %v1866_v49  ;;  %v1870_v47 = vsub.f32 %v4667_v58, %v4981_v57  ;;  %v1872_v7 = vsub.f32 %v4683_v15, %v5007_v21 }
 0x140   : > { %1840 = vmax.xlane.f32.xlu2 %v1839_v52  ;;  %1855 = vmax.xlane.f32.xlu1 %v1854_v41  ;;  %v2049_v41 = vsel %vm486_vm0, %v5057_v17, 0.0  ;;  %4131 = vpow2.f32 %v1945_v55  ;;  %v1873_v49 = vsub.f32 %v4679_v11, %v5009_v25 }
 0x141   : > { %1852 = vmax.xlane.f32.xlu0 %v1851_v27  ;;  %v2055_v27 = vsel %vm486_vm0, %v5053_v18, 0.0  ;;  %4133 = vpow2.f32 %v1937_v38  ;;  %v1947_v55 = vmul.f32 1.442695, %v1870_v47  ;;  %v1951_v58 = vmul.f32 1.442695, %v1872_v7 }
 0x142   : > { %v5077_v37 = vpop.eup %4123  ;;  %4135 = vpow2.f32 %v1941_v61 }
 0x143   : > { %v5029_v9 = vpop.xlane.xlu2 %1717  ;;  %v5035_v59 = vpop.xlane.xlu1 %1726  ;;  %4137 = vpow2.f32 %v1939_v29  ;;  %v1953_v29 = vmul.f32 1.442695, %v1873_v49 }
 0x144   : > { %v5033_v14 = vpop.xlane.xlu0 %1720  ;;  %v5081_v28 = vpop.eup %4125  ;;  %v1874_v7 = vsub.f32 %v4704_v36, %v5029_v9 }
 0x145   : > { %v5087_v10 = vpop.eup %4127 }
 0x146   : > { %v2070_v46 = vsel %vm486_vm0, %v5087_v10, 0.0  ;;  %v5101_v40 = vpop.eup %4129 }
 0x148   : > { %1849 = vmax.xlane.f32.xlu2 %v1848_v35  ;;  %2062 = vadd.xlane.f32.xlu1 %v2061_v12  ;;  %v1871_v35 = vsub.f32 %v4654_v48, %v4977_v8  ;;  %v2067_v12 = vsel %vm486_vm0, %v5077_v37, 0.0  ;;  %v5105_v48 = vpop.eup %4131 }
 0x149   : > { %1843 = vmax.xlane.f32.xlu0 %v1842_v24  ;;  %v2064_v24 = vsel %vm486_vm0, %v5081_v28, 0.0  ;;  %v5111_v45 = vpop.eup %4133 }
 0x14a   : > { %v1949_v56 = vmul.f32 1.442695, %v1871_v35  ;;  %v2073_v62 = vsel %vm486_vm0, %v5111_v45, 0.0  ;;  %v5125_v57 = vpop.eup %4135  ;;  %v1875_v35 = vsub.f32 %v4700_v31, %v5033_v14 }
 0x14b   : > { %v5055_v4 = vpop.xlane.xlu2 %1723  ;;  %v5061_v52 = vpop.xlane.xlu1 %1735 }
 0x14c   : > { %v5059_v34 = vpop.xlane.xlu0 %1732  ;;  %4139 = vpow2.f32 %v1949_v56  ;;  %v1957_v11 = vmul.f32 1.442695, %v1875_v35  ;;  %v1876_v35 = vsub.f32 %v4718_v63, %v5055_v4 }
 0x14d   : > { %4141 = vpow2.f32 %v1947_v55 }
 0x14e   : > { %4143 = vpow2.f32 %v1951_v58  ;;  %v1955_v58 = vmul.f32 1.442695, %v1874_v7 }
 0x150   : > { %2056 = vadd.xlane.f32.xlu2 %v2055_v27  ;;  %2053 = vadd.xlane.f32.xlu1 %v2052_v44  ;;  %v1868_v27 = vsub.f32 %v4681_v13, %v5002_v33  ;;  %v2058_v44 = vsel %vm486_vm0, %v5101_v40, 0.0  ;;  %v5129_v13 = vpop.eup %4137 }
 0x151   : > { %2050 = vadd.xlane.f32.xlu0 %v2049_v41  ;;  %v2085_v41 = vsel %vm486_vm0, %v5105_v48, 0.0 }
 0x152   : > { %v1943_v15 = vmul.f32 1.442695, %v1868_v27  ;;  %v5135_v60 = vpop.eup %4139  ;;  %v1879_v27 = vsub.f32 %v4720_v1, %v5059_v34 }
 0x153   : > { %v5079_v6 = vpop.xlane.xlu2 %1729  ;;  %v5085_v42 = vpop.xlane.xlu1 %1744  ;;  %v2091_v61 = vsel %vm486_vm0, %v5135_v60, 0.0 }
 0x154   : > { %v5083_v5 = vpop.xlane.xlu0 %1750  ;;  %4145 = vpow2.f32 %v1943_v15  ;;  %v5149_v25 = vpop.eup %4141  ;;  %v1965_v36 = vmul.f32 1.442695, %v1879_v27  ;;  %v1883_v27 = vsub.f32 %v4741_v20, %v5085_v42 }
 0x155   : > { %4147 = vpow2.f32 %v1953_v29 }
 0x156   : > { %4149 = vpow2.f32 %v1957_v11  ;;  %v1959_v11 = vmul.f32 1.442695, %v1876_v35 }
 0x158   : > { %2065 = vadd.xlane.f32.xlu2 %v2064_v24  ;;  %2071 = vadd.xlane.f32.xlu1 %v2070_v46  ;;  %v1877_v24 = vsub.f32 %v4702_v32, %v5035_v59  ;;  %v2079_v46 = vsel %vm486_vm0, %v5125_v57, 0.0  ;;  %v5153_v32 = vpop.eup %4143 }
 0x159   : > { %2068 = vadd.xlane.f32.xlu0 %v2067_v12  ;;  %v2076_v12 = vsel %vm486_vm0, %v5129_v13, 0.0 }
 0x15a   : > { %v1961_v31 = vmul.f32 1.442695, %v1877_v24  ;;  %v5159_v47 = vpop.eup %4145  ;;  %v1880_v24 = vsub.f32 %v4722_v2, %v5061_v52 }
 0x15b   : > { %v5103_v3 = vpop.xlane.xlu2 %1738  ;;  %v5107_v8 = vpop.xlane.xlu1 %1753  ;;  %v2082_v55 = vsel %vm486_vm0, %v5159_v47, 0.0 }
 0x15c   : > { %v5109_v16 = vpop.xlane.xlu0 %1741  ;;  %4151 = vpow2.f32 %v1961_v31  ;;  %v5173_v9 = vpop.eup %4147  ;;  %v1967_v63 = vmul.f32 1.442695, %v1880_v24  ;;  %v1886_v24 = vsub.f32 %v4762_v53, %v5107_v8 }
 0x15d   : > { %4153 = vpow2.f32 %v1955_v58 }
 0x15e   : > { %4155 = vpow2.f32 %v1965_v36  ;;  %v1973_v36 = vmul.f32 1.442695, %v1883_v27  ;;  %v1979_v27 = vmul.f32 1.442695, %v1886_v24  ;;  %v5867_v24 = vld [vmem:[#allocation6_spill] sm:$0xff] }
 0x160   : > { %2086 = vadd.xlane.f32.xlu2 %v2085_v41  ;;  %2074 = vadd.xlane.f32.xlu1 %v2073_v62  ;;  %v1878_v41 = vsub.f32 %v4743_v22, %v5079_v6  ;;  %v2088_v62 = vsel %vm486_vm0, %v5149_v25, 0.0  ;;  %v5177_v22 = vpop.eup %4149 }
 0x161   : > { %2059 = vadd.xlane.f32.xlu0 %v2058_v44  ;;  %v2094_v44 = vsel %vm486_vm0, %v5153_v32, 0.0  ;;  %v2103_v29 = vsel %vm486_vm0, %v5177_v22, 0.0 }
 0x162   : > { %v1963_v1 = vmul.f32 1.442695, %v1878_v41  ;;  %v5183_v49 = vpop.eup %4151  ;;  %v1881_v41 = vsub.f32 %v4760_v51, %v5103_v3 }
 0x163   : > { %v5127_v21 = vpop.xlane.xlu2 %1756  ;;  %v5131_v33 = vpop.xlane.xlu1 %1774 }
 0x164   : > { %v5133_v38 = vpop.xlane.xlu0 %1759  ;;  %4157 = vpow2.f32 %v1963_v1  ;;  %v5197_v4 = vpop.eup %4153  ;;  %v1969_v20 = vmul.f32 1.442695, %v1881_v41 }
 0x165   : > { %4159 = vpow2.f32 %v1959_v11 }
 0x166   : > { %4161 = vpow2.f32 %v1967_v63 }
 0x168   : > { %2077 = vadd.xlane.f32.xlu2 %v2076_v12  ;;  %2092 = vadd.xlane.f32.xlu1 %v2091_v61  ;;  %v1885_v12 = vsub.f32 %v4739_v19, %v5083_v5  ;;  %v2109_v61 = vsel %vm486_vm0, %v5183_v49, 0.0  ;;  %v5201_v19 = vpop.eup %4155 }
 0x169   : > { %2080 = vadd.xlane.f32.xlu0 %v2079_v46  ;;  %v2097_v46 = vsel %vm486_vm0, %v5173_v9, 0.0 }
 0x16a   : > { %v1977_v2 = vmul.f32 1.442695, %v1885_v12  ;;  %v5207_v7 = vpop.eup %4157  ;;  %v5862_v12 = vld [vmem:[#allocation3_spill] sm:$0xff] }
 0x16b   : > { %v5151_v14 = vpop.xlane.xlu2 %1747  ;;  %v5157_v56 = vpop.xlane.xlu1 %1765  ;;  %v2112_v58 = vsel %vm486_vm0, %v5207_v7, 0.0 }
 0x16c   : > { %v5155_v59 = vpop.xlane.xlu0 %1762  ;;  %4163 = vpow2.f32 %v1977_v2  ;;  %v5221_v42 = vpop.eup %4159 }
 0x16d   : > { %4165 = vpow2.f32 %v1973_v36  ;;  %v2106_v11 = vsel %vm486_vm0, %v5221_v42, 0.0 }
 0x16e   : > { %4167 = vpow2.f32 %v1969_v20  ;;  %v5866_v20 = vld [vmem:[#allocation5_spill] sm:$0xff] }
 0x170   : > { %2095 = vadd.xlane.f32.xlu2 %v2094_v44  ;;  %2083 = vadd.xlane.f32.xlu1 %v2082_v55  ;;  %v1882_v44 = vsub.f32 %v4764_v54, %v5109_v16  ;;  %v2100_v55 = vsel %vm486_vm0, %v5197_v4, 0.0  ;;  %v5225_v54 = vpop.eup %4161 }
 0x171   : > { %2089 = vadd.xlane.f32.xlu0 %v2088_v62  ;;  %v2115_v62 = vsel %vm486_vm0, %v5201_v19, 0.0  ;;  %v2118_v63 = vsel %vm486_vm0, %v5225_v54, 0.0 }
 0x172   : > { %v1971_v51 = vmul.f32 1.442695, %v1882_v44  ;;  %v5231_v35 = vpop.eup %4163 }
 0x173   : > { %v5175_v34 = vpop.xlane.xlu2 %1768  ;;  %v5181_v15 = vpop.xlane.xlu1 %1783  ;;  %v2133_v2 = vsel %vm486_vm0, %v5231_v35, 0.0 }
 0x174   : > { %v5179_v6 = vpop.xlane.xlu0 %1780  ;;  %4169 = vpow2.f32 %v1971_v51  ;;  %v5245_v8 = vpop.eup %4165  ;;  %v1884_v51 = vsub.f32 %v5866_v20, %v5151_v14  ;;  %v5871_v20 = vld [vmem:[#allocation8_spill] sm:$0xff] }
 0x175   : > { %5864 = vst [vmem:[#allocation3_spill] sm:$0xff] %v5245_v8  ;;  %4171 = vpow2.f32 %v1979_v27 }
 0x178   : > { %2098 = vadd.xlane.f32.xlu2 %v2097_v46  ;;  %2104 = vadd.xlane.f32.xlu1 %v2103_v29  ;;  %v1887_v46 = vsub.f32 %v5862_v12, %v5127_v21  ;;  %v1889_v12 = vsub.f32 %v5867_v24, %v5155_v59  ;;  %v5872_v24 = vld [vmem:[#allocation9_spill] sm:$0xff] }
 0x179   : > { %2110 = vadd.xlane.f32.xlu0 %v2109_v61  ;;  %v5863_v61 = vld [vmem:[#allocation4_spill] sm:$0xff] }
 0x17a   : > { %v1888_v29 = vsub.f32 %v5863_v61, %v5133_v38  ;;  %v1981_v53 = vmul.f32 1.442695, %v1887_v46  ;;  %v5249_v38 = vpop.eup %4167  ;;  %v2127_v46 = vsel %vm486_vm0, %v5245_v8, 0.0  ;;  %v1985_v14 = vmul.f32 1.442695, %v1889_v12 }
 0x17b   : > { %v5199_v52 = vpop.xlane.xlu2 %1777  ;;  %v5205_v31 = vpop.xlane.xlu1 %1786  ;;  %v2121_v61 = vsel %vm486_vm0, %v5249_v38, 0.0  ;;  %v1895_v12 = vsub.f32 %v5872_v24, %v5179_v6 }
 0x17c   : > { %v5203_v5 = vpop.xlane.xlu0 %1771  ;;  %v1983_v21 = vmul.f32 1.442695, %v1888_v29  ;;  %4173 = vpow2.f32 %v1981_v53 }
 0x17e   : > { %4175 = vpow2.f32 %v1983_v21 }
 0x180   : > { %2116 = vadd.xlane.f32.xlu2 %v2115_v62  ;;  %2113 = vadd.xlane.f32.xlu1 %v2112_v58  ;;  %v5865_v58 = vld [vmem:[#allocation2_spill] sm:$0xff] }
 0x181   : > { %2101 = vadd.xlane.f32.xlu0 %v2100_v55  ;;  %v5255_v55 = vpop.eup %4169  ;;  %v1893_v36 = vsub.f32 %v5865_v58, %v5131_v33  ;;  %v1975_v33 = vmul.f32 1.442695, %v1884_v51  ;;  %v5870_v58 = vld [vmem:[#allocation7_spill] sm:$0xff]  ;;  %v1891_v51 = vsub.f32 %v5871_v20, %v5175_v34  ;;  %v1997_v34 = vmul.f32 1.442695, %v1895_v12  ;;  %v5878_v12 = vld [vmem:[#allocation13_spill] sm:$0xff] }
 0x182   : > { %v2124_v29 = vsel %vm486_vm0, %v5255_v55, 0.0 }
 0x183   : > { %v5223_v3 = vpop.xlane.xlu2 %1798  ;;  %v5229_v1 = vpop.xlane.xlu1 %1804 }
 0x184   : > { %v5227_v16 = vpop.xlane.xlu0 %1792 }
 0x188   : > { %2107 = vadd.xlane.f32.xlu2 %v2106_v11  ;;  %2134 = vadd.xlane.f32.xlu1 %v2133_v2  ;;  %v1993_v11 = vmul.f32 1.442695, %v1893_v36  ;;  %v1890_v36 = vsub.f32 %v5870_v58, %v5157_v56  ;;  %v1989_v56 = vmul.f32 1.442695, %v1891_v51  ;;  %v5877_v51 = vld [vmem:[#allocation12_spill] sm:$0xff] }
 0x189   : > { %2119 = vadd.xlane.f32.xlu0 %v2118_v63  ;;  %v5269_v63 = vpop.eup %4171 }
 0x18a   : > { %v5273_v59 = vpop.eup %4173  ;;  %4177 = vpow2.f32 %v1993_v11  ;;  %v1987_v11 = vmul.f32 1.442695, %v1890_v36 }
 0x18b   : > { %v5247_v41 = vpop.xlane.xlu2 %1789  ;;  %v5253_v62 = vpop.xlane.xlu1 %1795  ;;  %5868 = vst [vmem:[#allocation4_spill] sm:$0xff] %v5273_v59  ;;  %4179 = vpow2.f32 %v1975_v33 }
 0x18c   : > { %v5251_v44 = vpop.xlane.xlu0 %1801  ;;  %v5279_v21 = vpop.eup %4175  ;;  %4181 = vpow2.f32 %v1985_v14 }
 0x18d   : > { %5869 = vst [vmem:[#allocation2_spill] sm:$0xff] %v5279_v21  ;;  %4183 = vpow2.f32 %v1987_v11 }
 0x18e   : > { %4185 = vpow2.f32 %v1989_v56 }
 0x18f   : > { %4187 = vpow2.f32 %v1997_v34 }
 0x190   : > { %2128 = vadd.xlane.f32.xlu2 %v2127_v46  ;;  %2125 = vadd.xlane.f32.xlu1 %v2124_v29  ;;  %v2136_v46 = vsel %vm486_vm0, %v5269_v63, 0.0  ;;  %v2142_v29 = vsel %vm486_vm0, %v5279_v21, 0.0  ;;  %v5293_v33 = vpop.eup %4177 }
 0x191   : > { %2122 = vadd.xlane.f32.xlu0 %v2121_v61  ;;  %v2139_v61 = vsel %vm486_vm0, %v5273_v59, 0.0  ;;  %5873 = vst [vmem:[#allocation5_spill] sm:$0xff] %v5293_v33  ;;  %v5297_v6 = vpop.eup %4179  ;;  %v2157_v8 = vsel %vm486_vm0, %v5293_v33, 0.0 }
 0x192   : > { %5874 = vst [vmem:[#allocation6_spill] sm:$0xff] %v5297_v6  ;;  %v5303_v24 = vpop.eup %4181  ;;  %v2130_v21 = vsel %vm486_vm0, %v5297_v6, 0.0 }
 0x193   : > { %v5271_v2 = vpop.xlane.xlu2 %1807  ;;  %v5277_v53 = vpop.xlane.xlu1 %1816  ;;  %5875 = vst [vmem:[#allocation7_spill] sm:$0xff] %v5303_v24  ;;  %v2145_v11 = vsel %vm486_vm0, %v5303_v24, 0.0 }
 0x194   : > { %v5275_v27 = vpop.xlane.xlu0 %1822  ;;  %v5317_v56 = vpop.eup %4183 }
 0x195   : > { %5879 = vst [vmem:[#allocation8_spill] sm:$0xff] %v5317_v56  ;;  %v2148_v33 = vsel %vm486_vm0, %v5317_v56, 0.0 }
 0x198   : > { %2137 = vadd.xlane.f32.xlu2 %v2136_v46  ;;  %2143 = vadd.xlane.f32.xlu1 %v2142_v29  ;;  %v5876_v46 = vld [vmem:[#allocation10_spill] sm:$0xff]  ;;  %v1892_v29 = vsub.f32 %v5878_v12, %v5203_v5  ;;  %v5321_v5 = vpop.eup %4185  ;;  %v5882_v12 = vld [vmem:[#allocation11_spill] sm:$0xff] }
 0x199   : > { %2140 = vadd.xlane.f32.xlu0 %v2139_v61  ;;  %v1896_v36 = vsub.f32 %v5876_v46, %v5181_v15  ;;  %v1894_v61 = vsub.f32 %v5877_v51, %v5199_v52  ;;  %5880 = vst [vmem:[#allocation9_spill] sm:$0xff] %v5321_v5  ;;  %v5327_v51 = vpop.eup %4187  ;;  %v2151_v24 = vsel %vm486_vm0, %v5321_v5, 0.0  ;;  %v5888_v5 = vld [vmem:[#allocation14_spill] sm:$0xff] }
 0x19a   : > { %v1991_v52 = vmul.f32 1.442695, %v1892_v29  ;;  %5881 = vst [vmem:[#allocation10_spill] sm:$0xff] %v5327_v51  ;;  %v5884_v29 = vld [vmem:[#allocation16_spill] sm:$0xff] }
 0x19b   : > { %v5295_v14 = vpop.xlane.xlu2 %1810  ;;  %v5299_v58 = vpop.xlane.xlu1 %1825  ;;  %v1999_v59 = vmul.f32 1.442695, %v1896_v36  ;;  %v1995_v15 = vmul.f32 1.442695, %v1894_v61  ;;  %v1897_v36 = vsub.f32 %v5882_v12, %v5205_v31 }
 0x19c   : > { %v5301_v20 = vpop.xlane.xlu0 %1813 }
 0x19d   : > { %4189 = vpow2.f32 %v1999_v59  ;;  %v2163_v59 = vsel %vm486_vm0, %v5327_v51, 0.0  ;;  %v2001_v31 = vmul.f32 1.442695, %v1897_v36  ;;  %v1901_v36 = vsub.f32 %v5888_v5, %v5223_v3  ;;  %v4075_v51 = vld [vmem:[%s5359_s8] sm:$0xff] }
 0x19e   : > { %4191 = vpow2.f32 %v1995_v15  ;;  %2454 = vmatpush.bf16.msra.mxu0 %v4075_v51  ;;  %v5894_v51 = vld [vmem:[#allocation22_spill] sm:$0xff] }
 0x19f   : > { %4193 = vpow2.f32 %v1991_v52  ;;  %v2009_v56 = vmul.f32 1.442695, %v1901_v36  ;;  %v5893_v36 = vld [vmem:[#allocation18_spill] sm:$0xff] }
 0x1a0   : > { %2158 = vadd.xlane.f32.xlu2 %v2157_v8  ;;  %2146 = vadd.xlane.f32.xlu1 %v2145_v11  ;;  %v1903_v11 = vsub.f32 %v5884_v29, %v5229_v1  ;;  %4195 = vpow2.f32 %v2001_v31 }
 0x1a1   : > { %2131 = vadd.xlane.f32.xlu0 %v2130_v21  ;;  %v5883_v21 = vld [vmem:[#allocation15_spill] sm:$0xff] }
 0x1a2   : > { %v1899_v61 = vsub.f32 %v5883_v21, %v5227_v16  ;;  %v2013_v52 = vmul.f32 1.442695, %v1903_v11  ;;  %v5890_v11 = vld [vmem:[#allocation19_spill] sm:$0xff] }
 0x1a3   : > { %v5319_v34 = vpop.xlane.xlu2 %1828  ;;  %v5323_v46 = vpop.xlane.xlu1 %1846 }
 0x1a4   : > { %v5325_v8 = vpop.xlane.xlu0 %1831  ;;  %v2005_v15 = vmul.f32 1.442695, %v1899_v61  ;;  %v5341_v16 = vpop.eup %4189 }
 0x1a5   : > { %5885 = vst [vmem:[#allocation12_spill] sm:$0xff] %v5341_v16  ;;  %v5345_v1 = vpop.eup %4191  ;;  %v2166_v31 = vsel %vm486_vm0, %v5341_v16, 0.0 }
 0x1a6   : > { %5886 = vst [vmem:[#allocation13_spill] sm:$0xff] %v5345_v1  ;;  %v5351_v29 = vpop.eup %4193  ;;  %4197 = vpow2.f32 %v2005_v15  ;;  %v2160_v3 = vsel %vm486_vm0, %v5345_v1, 0.0 }
 0x1a7   : > { %5887 = vst [vmem:[#allocation11_spill] sm:$0xff] %v5351_v29  ;;  %4199 = vpow2.f32 %v2013_v52  ;;  %v2154_v5 = vsel %vm486_vm0, %v5351_v29, 0.0  ;;  %v5372_v15 = vpop.eup %4195 }
 0x1a8   : > { %2149 = vadd.xlane.f32.xlu2 %v2148_v33  ;;  %2164 = vadd.xlane.f32.xlu1 %v2163_v59  ;;  %v1900_v59 = vsub.f32 %v5890_v11, %v5253_v62  ;;  %5891 = vst [vmem:[#allocation15_spill] sm:$0xff] %v5372_v15  ;;  %4201 = vpow2.f32 %v2009_v56  ;;  %v2169_v6 = vsel %vm486_vm0, %v5372_v15, 0.0 }
 0x1a9   : > { %2152 = vadd.xlane.f32.xlu0 %v2151_v24  ;;  %v5889_v24 = vld [vmem:[#allocation17_spill] sm:$0xff] }
 0x1aa   : > { %v1898_v61 = vsub.f32 %v5889_v24, %v5247_v41  ;;  %v2007_v62 = vmul.f32 1.442695, %v1900_v59  ;;  %v4077_v59 = vld [vmem:[%s5359_s8 + $0x10] sm:$0xff] }
 0x1ab   : > { %v5343_v12 = vpop.xlane.xlu2 %1819  ;;  %v5349_v33 = vpop.xlane.xlu1 %1837  ;;  %2510 = vmatpush.bf16.msra.mxu2 %v4077_v59 }
 0x1ac   : > { %v5347_v21 = vpop.xlane.xlu0 %1834  ;;  %v2003_v41 = vmul.f32 1.442695, %v1898_v61  ;;  %v5376_v24 = vpop.eup %4197  ;;  %v1904_v61 = vsub.f32 %v5894_v51, %v5271_v2 }
 0x1ad   : > { %v5382_v29 = vpop.eup %4199  ;;  %v2175_v16 = vsel %vm486_vm0, %v5376_v24, 0.0 }
 0x1ae   : > { %5892 = vst [vmem:[#allocation16_spill] sm:$0xff] %v5382_v29  ;;  %4203 = vpow2.f32 %v2003_v41  ;;  %v2187_v56 = vsel %vm486_vm0, %v5382_v29, 0.0  ;;  %v2015_v2 = vmul.f32 1.442695, %v1904_v61 }
 0x1af   : > { %4205 = vpow2.f32 %v2007_v62  ;;  %v5896_v62 = vld [vmem:[#allocation20_spill] sm:$0xff] }
 0x1b0   : > { %2167 = vadd.xlane.f32.xlu2 %v2166_v31  ;;  %2155 = vadd.xlane.f32.xlu1 %v2154_v5  ;;  %v5895_v5 = vld [vmem:[#allocation21_spill] sm:$0xff] }
 0x1b1   : > { %2161 = vadd.xlane.f32.xlu0 %v2160_v3  ;;  %v1902_v3 = vsub.f32 %v5893_v36, %v5251_v44  ;;  %v1907_v1 = vsub.f32 %v5895_v5, %v5277_v53  ;;  %v4078_v44 = vld [vmem:[%s5359_s8 + $0x18] sm:$0xff]  ;;  %v1909_v36 = vsub.f32 %v5896_v62, %v5275_v27  ;;  %v5400_v53 = vpop.eup %4201 }
 0x1b2   : > { %2538 = vmatpush.bf16.msra.mxu3 %v4078_v44  ;;  %5897 = vst [vmem:[#allocation14_spill] sm:$0xff] %v5400_v53 }
 0x1b3   : > { %v5374_v52 = vpop.xlane.xlu2 %1840  ;;  %v5380_v31 = vpop.xlane.xlu1 %1855  ;;  %v2011_v41 = vmul.f32 1.442695, %v1902_v3  ;;  %v2021_v51 = vmul.f32 1.442695, %v1907_v1  ;;  %v2025_v27 = vmul.f32 1.442695, %v1909_v36 }
 0x1b4   : > { %v5378_v11 = vpop.xlane.xlu0 %1852  ;;  %v5406_v29 = vpop.eup %4203  ;;  %v5900_v1 = vld [vmem:[#allocation27_spill] sm:$0xff]  ;;  %v5902_v36 = vld [vmem:[#allocation25_spill] sm:$0xff] }
 0x1b5   : > { %5899 = vst [vmem:[#allocation17_spill] sm:$0xff] %v5406_v29  ;;  %v5410_v3 = vpop.eup %4205  ;;  %4207 = vpow2.f32 %v2011_v41  ;;  %v2172_v62 = vsel %vm486_vm0, %v5406_v29, 0.0  ;;  %v5901_v41 = vld [vmem:[#allocation24_spill] sm:$0xff] }
 0x1b6   : > { %4209 = vpow2.f32 %v2015_v2  ;;  %v2178_v44 = vsel %vm486_vm0, %v5410_v3, 0.0  ;;  %v1910_v2 = vsub.f32 %v5901_v41, %v5299_v58 }
 0x1b7   : > { %4211 = vpow2.f32 %v2021_v51 }
 0x1b8   : > { %2176 = vadd.xlane.f32.xlu2 %v2175_v16  ;;  %2188 = vadd.xlane.f32.xlu1 %v2187_v56  ;;  %v5898_v16 = vld [vmem:[#allocation23_spill] sm:$0xff]  ;;  %v1911_v56 = vsub.f32 %v5900_v1, %v5319_v34  ;;  %4213 = vpow2.f32 %v2025_v27  ;;  %v1906_v34 = vsub.f32 %v5902_v36, %v5301_v20  ;;  %v5904_v1 = vld [vmem:[#allocation28_spill] sm:$0xff]  ;;  %v2027_v27 = vmul.f32 1.442695, %v1910_v2  ;;  %v5906_v36 = vld [vmem:[#allocation26_spill] sm:$0xff] }
 0x1b9   : > { %2170 = vadd.xlane.f32.xlu0 %v2169_v6  ;;  %v1905_v5 = vsub.f32 %v5898_v16, %v5295_v14  ;;  %v2181_v14 = vsel %vm486_vm0, %v5400_v53, 0.0  ;;  %v4076_v16 = vld [vmem:[%s5359_s8 + $0x8] sm:$0xff] }
 0x1ba   : > { %2482 = vmatpush.bf16.msra.mxu1 %v4076_v16  ;;  %v2019_v20 = vmul.f32 1.442695, %v1906_v34  ;;  %v4079_v16 = vld [vmem:[%s5359_s8 + $0x20] sm:$0xff]  ;;  %v1917_v34 = vsub.f32 %v5906_v36, %v5323_v46 }
 0x1bb   : > { %v5404_v15 = vpop.xlane.xlu2 %1849  ;;  %v2063_v6 = vpop.xlane.xlu1 %2062  ;;  %v2017_v61 = vmul.f32 1.442695, %v1905_v5  ;;  %v2029_v5 = vmul.f32 1.442695, %v1911_v56  ;;  %2566 = vmatpush.bf16.msrb.mxu0 %v4079_v16  ;;  %v5908_v16 = vld [vmem:[#allocation30_spill] sm:$0xff] }
 0x1bc   : > { %v5408_v59 = vpop.xlane.xlu0 %1843  ;;  %v5425_v51 = vpop.eup %4207 }
 0x1bd   : > { %5903 = vst [vmem:[#allocation19_spill] sm:$0xff] %v5425_v51  ;;  %4215 = vpow2.f32 %v2017_v61  ;;  %v5429_v29 = vpop.eup %4209 }
 0x1be   : > { %4217 = vrcp.f32 %v2063_v6  ;;  %v2190_v61 = vsel %vm486_vm0, %v5429_v29, 0.0 }
 0x1c0   : > { %2182 = vadd.xlane.f32.xlu2 %v2181_v14  ;;  %2173 = vadd.xlane.f32.xlu1 %v2172_v62  ;;  %v1912_v14 = vsub.f32 %v5904_v1, %v5325_v8  ;;  %v5431_v62 = vpop.eup %4211  ;;  %v2184_v8 = vsel %vm486_vm0, %v5425_v51, 0.0  ;;  %v5907_v1 = vld [vmem:[#allocation29_spill] sm:$0xff] }
 0x1c1   : > { %2179 = vadd.xlane.f32.xlu0 %v2178_v44  ;;  %5905 = vst [vmem:[#allocation18_spill] sm:$0xff] %v5431_v62  ;;  %v5436_v56 = vpop.eup %4213  ;;  %v2199_v6 = vsel %vm486_vm0, %v5431_v62, 0.0  ;;  %v1913_v62 = vsub.f32 %v5908_v16, %v5347_v21  ;;  %v4081_v16 = vld [vmem:[%s5359_s8 + $0x30] sm:$0xff] }
 0x1c2   : > { %v2031_v41 = vmul.f32 1.442695, %v1912_v14  ;;  %v1908_v14 = vsub.f32 %v5907_v1, %v5343_v12  ;;  %2622 = vmatpush.bf16.msrb.mxu2 %v4081_v16 }
 0x1c3   : > { %v2057_v53 = vpop.xlane.xlu2 %2056  ;;  %v2054_v44 = vpop.xlane.xlu1 %2053 }
 0x1c4   : > { %v2051_v58 = vpop.xlane.xlu0 %2050  ;;  %v5442_v2 = vpop.eup %4215  ;;  %v2023_v12 = vmul.f32 1.442695, %v1908_v14  ;;  %v2205_v14 = vsel %vm486_vm0, %v5436_v56, 0.0 }
 0x1c5   : > { %4219 = vrcp.f32 %v2051_v58 }
 0x1c6   : > { %4221 = vrcp.f32 %v2054_v44 }
 0x1c7   : > { %4223 = vpow2.f32 %v2029_v5  ;;  %v4218_v5 = vpop.eup %4217 }
 0x1c8   : > { %2191 = vadd.xlane.f32.xlu2 %v2190_v61  ;;  %4225 = vpow2.f32 %v2027_v27  ;;  %2200 = vadd.xlane.f32.xlu1 %v2199_v6  ;;  %v2041_v6 = vmul.f32 1.442695, %v1917_v34  ;;  %v2309_v21 = vmul.f32 %v4218_v5, %v5039_v0  ;;  %v2033_v34 = vmul.f32 1.442695, %v1913_v62 }
 0x1c9   : > { %2185 = vadd.xlane.f32.xlu0 %v2184_v8  ;;  %4227 = vpow2.f32 %v2019_v20  ;;  %v1919_v62 = vsub.f32 %v5011_v26, %v5378_v11  ;;  %v1918_v26 = vsub.f32 %v5031_v39, %v5404_v15 }
 0x1ca   : > { %4229 = vpow2.f32 %v2031_v41  ;;  %v4082_v41 = vld [vmem:[%s5359_s8 + $0x38] sm:$0xff] }
 0x1cb   : > { %v4220_v58 = vpop.eup %4219  ;;  %v2066_v44 = vpop.xlane.xlu2 %2065  ;;  %2650 = vmatpush.bf16.msrb.mxu3 %v4082_v41 }
 0x1cc   : > { %v4222_v61 = vpop.eup %4221  ;;  %v2305_v27 = vmul.f32 %v4220_v58, %v5057_v17  ;;  %4231 = vrcp.f32 %v2066_v44  ;;  %v2069_v51 = vpop.xlane.xlu0 %2068  ;;  %v2193_v58 = vsel %vm486_vm0, %v5442_v2, 0.0 }
 0x1cd   : > { %v2072_v46 = vpop.xlane.xlu1 %2071  ;;  %v5451_v8 = vpop.eup %4223  ;;  %v2306_v20 = vmul.f32 %v4222_v61, %v5063_v30  ;;  %4233 = vrcp.f32 %v2069_v51  ;;  %v4080_v61 = vld [vmem:[%s5359_s8 + $0x28] sm:$0xff] }
 0x1ce   : > { %v2369_v36 = vpack.c.bf16 %v2305_v27, %v2305_v27  ;;  %4235 = vrcp.f32 %v2072_v46  ;;  %v5455_v1 = vpop.eup %4225  ;;  %v2211_v51 = vsel %vm486_vm0, %v5451_v8, 0.0  ;;  %2594 = vmatpush.bf16.msrb.mxu1 %v4080_v61  ;;  %v1920_v46 = vsub.f32 %v5013_v23, %v5380_v31 }
 0x1cf   : > { %4237 = vrcp.f32 %v2057_v53  ;;  %v2370_v17 = vpack.c.bf16 %v2306_v20, %v2306_v20  ;;  %v5460_v44 = vpop.eup %4227  ;;  %v2373_v20 = vpack.c.bf16 %v2309_v21, %v2309_v21  ;;  %v2045_v23 = vmul.f32 1.442695, %v1919_v62  ;;  %v5909_v62 = vld [vmem:[#allocation31_spill] sm:$0xff] }
 0x1d0   : > { %v2435_v30 = vunpack.c.l.b16 %v2369_v36  ;;  %2194 = vadd.xlane.f32.xlu2 %v2193_v58  ;;  %v5468_v0 = vpop.eup %4229  ;;  %4239 = vpow2.f32 %v2041_v6  ;;  %2206 = vadd.xlane.f32.xlu1 %v2205_v14  ;;  %v2196_v15 = vsel %vm486_vm0, %v5460_v44, 0.0 }
 0x1d1   : > { %v2436_v53 = vunpack.c.l.b16 %v2370_v17  ;;  %2212 = vadd.xlane.f32.xlu0 %v2211_v51  ;;  %4241 = vpow2.f32 %v2023_v12 }
 0x1d2   : > { %v4232_v5 = vpop.eup %4231  ;;  %4243 = vpow2.f32 %v2033_v34  ;;  %v2491_v34 = vunpack.c.l.b16 %v2373_v20 }
 0x1d3   : > { %v4234_v27 = vpop.eup %4233  ;;  %v2437_v36 = vpack.c.b16 %v2436_v53, %v2435_v30  ;;  %v2310_v41 = vmul.f32 %v4232_v5, %v5081_v28  ;;  %v2087_v58 = vpop.xlane.xlu2 %2086  ;;  %v2208_v28 = vsel %vm486_vm0, %v5455_v1, 0.0  ;;  %v2214_v5 = vsel %vm486_vm0, %v5468_v0, 0.0 }
 0x1d4   : > { %v4236_v6 = vpop.eup %4235  ;;  %v2311_v17 = vmul.f32 %v4234_v27, %v5077_v37  ;;  %v2060_v51 = vpop.xlane.xlu0 %2059  ;;  %v2047_v37 = vmul.f32 1.442695, %v1920_v46  ;;  %v1914_v27 = vsub.f32 %v5909_v62, %v5349_v33 }
 0x1d5   : > { %v2075_v12 = vpop.xlane.xlu1 %2074  ;;  %v4238_v14 = vpop.eup %4237  ;;  %v2374_v11 = vpack.c.bf16 %v2310_v41, %v2310_v41  ;;  %v2312_v61 = vmul.f32 %v4236_v6, %v5087_v10  ;;  %4245 = vrcp.f32 %v2060_v51  ;;  %3849 = vmatmul.msk.bf16.vlgmr.msra.gmra.mxu0 %vm486_vm0, %v2437_v36  ;;  %v2043_v36 = vmul.f32 1.442695, %v1918_v26 }
 0x1d6   : > { %v2375_v31 = vpack.c.bf16 %v2311_v17, %v2311_v17  ;;  %4247 = vrcp.f32 %v2075_v12  ;;  %v5482_v21 = vpop.eup %4239  ;;  %v2307_v39 = vmul.f32 %v4238_v14, %v5053_v18  ;;  %v1915_v18 = vsub.f32 %v5000_v43, %v5374_v52 }
 0x1d7   : > { %v2492_v30 = vunpack.c.l.b16 %v2374_v11  ;;  %v2376_v16 = vpack.c.bf16 %v2312_v61, %v2312_v61  ;;  %v5484_v53 = vpop.eup %4241  ;;  %4249 = vpow2.f32 %v2045_v23  ;;  %v2035_v61 = vmul.f32 1.442695, %v1914_v27 }
 0x1d8   : > { %v2519_v10 = vunpack.c.l.b16 %v2375_v31  ;;  %2209 = vadd.xlane.f32.xlu2 %v2208_v28  ;;  %2215 = vadd.xlane.f32.xlu1 %v2214_v5  ;;  %v5493_v41 = vpop.eup %4243  ;;  %4251 = vpow2.f32 %v2047_v37  ;;  %v2371_v14 = vpack.c.bf16 %v2307_v39, %v2307_v39  ;;  %v2037_v43 = vmul.f32 1.442695, %v1915_v18  ;;  %v4083_v39 = vld [vmem:[%s5359_s8 + $0x40] sm:$0xff] }
 0x1d9   : > { %v2493_v46 = vpack.c.b16 %v2492_v30, %v2491_v34  ;;  %v2520_v20 = vunpack.c.l.b16 %v2376_v16  ;;  %2197 = vadd.xlane.f32.xlu0 %v2196_v15  ;;  %v2229_v23 = vsel %vm486_vm0, %v5482_v21, 0.0  ;;  %v1916_v31 = vsub.f32 %v5037_v50, %v5408_v59  ;;  %2678 = vmatpush.bf16.msra.mxu0 %v4083_v39 }
 0x1da   : > { %v2202_v28 = vsel %vm486_vm0, %v5484_v53, 0.0  ;;  %v2463_v34 = vunpack.c.l.b16 %v2371_v14  ;;  %v2217_v16 = vsel %vm486_vm0, %v5493_v41, 0.0 }
 0x1db   : > { %v4246_v6 = vpop.eup %4245  ;;  %v2521_v17 = vpack.c.b16 %v2520_v20, %v2519_v10  ;;  %v2078_v51 = vpop.xlane.xlu2 %2077  ;;  %3859 = vmatmul.msk.bf16.vlgmr.msra.gmra.mxu2 %vm486_vm0, %v2493_v46  ;;  %v4085_v10 = vld [vmem:[%s5359_s8 + $0x50] sm:$0xff] }
 0x1dc   : > { %v4248_v12 = vpop.eup %4247  ;;  %v2308_v33 = vmul.f32 %v4246_v6, %v5101_v40  ;;  %4253 = vrcp.f32 %v2078_v51  ;;  %v2081_v26 = vpop.xlane.xlu0 %2080  ;;  %2734 = vmatpush.bf16.msra.mxu2 %v4085_v10 }
 0x1dd   : > { %v2093_v11 = vpop.xlane.xlu1 %2092  ;;  %4255 = vpow2.f32 %v2043_v36  ;;  %3864 = vmatmul.msk.bf16.vlgmr.msra.gmra.mxu3 %vm486_vm0, %v2521_v17  ;;  %v2313_v40 = vmul.f32 %v4248_v12, %v5111_v45  ;;  %v5507_v37 = vpop.eup %4249  ;;  %v4084_v12 = vld [vmem:[%s5359_s8 + $0x48] sm:$0xff] }
 0x1de   : > { %v2372_v52 = vpack.c.bf16 %v2308_v33, %v2308_v33  ;;  %4257 = vrcp.f32 %v2093_v11  ;;  %v5513_v15 = vpop.eup %4251  ;;  %v2235_v51 = vsel %vm486_vm0, %v5507_v37, 0.0 }
 0x1df   : > { %4259 = vrcp.f32 %v2087_v58  ;;  %v2039_v58 = vmul.f32 1.442695, %v1916_v31  ;;  %v2377_v5 = vpack.c.bf16 %v2313_v40, %v2313_v40 }
 0x1e0   : > { %v2464_v30 = vunpack.c.l.b16 %v2372_v52  ;;  %4261 = vrcp.f32 %v2081_v26  ;;  %2203 = vadd.xlane.f32.xlu2 %v2202_v28  ;;  %2218 = vadd.xlane.f32.xlu1 %v2217_v16  ;;  %v4086_v52 = vld [vmem:[%s5359_s8 + $0x58] sm:$0xff] }
 0x1e1   : > { %2230 = vadd.xlane.f32.xlu0 %v2229_v23  ;;  %4263 = vpow2.f32 %v2035_v61  ;;  %v2547_v14 = vunpack.c.l.b16 %v2377_v5  ;;  %2762 = vmatpush.bf16.msra.mxu3 %v4086_v52 }
 0x1e2   : > { %v4254_v50 = vpop.eup %4253  ;;  %v2465_v45 = vpack.c.b16 %v2464_v30, %v2463_v34  ;;  %4265 = vpow2.f32 %v2037_v43  ;;  %v2238_v43 = vsel %vm486_vm0, %v5513_v15, 0.0 }
 0x1e3   : > { %v5515_v59 = vpop.eup %4255  ;;  %v2314_v62 = vmul.f32 %v4254_v50, %v5129_v13  ;;  %v2096_v27 = vpop.xlane.xlu2 %2095 }
 0x1e4   : > { %v4258_v36 = vpop.eup %4257  ;;  %4267 = vrcp.f32 %v2096_v27  ;;  %3854 = vmatmul.msk.bf16.vlgmr.msra.gmra.mxu1 %vm486_vm0, %v2465_v45  ;;  %v2090_v46 = vpop.xlane.xlu0 %2089  ;;  %v2232_v61 = vsel %vm486_vm0, %v5515_v59, 0.0 }
 0x1e5   : > { %v2084_v20 = vpop.xlane.xlu1 %2083  ;;  %v4260_v18 = vpop.eup %4259  ;;  %v2378_v6 = vpack.c.bf16 %v2314_v62, %v2314_v62  ;;  %4269 = vrcp.f32 %v2090_v46  ;;  %v2319_v33 = vmul.f32 %v4258_v36, %v5135_v60  ;;  %2706 = vmatpush.bf16.msra.mxu1 %v4084_v12 }
 0x1e6   : > { %v4262_v17 = vpop.eup %4261  ;;  %4271 = vrcp.f32 %v2084_v20  ;;  %v2317_v11 = vmul.f32 %v4260_v18, %v5105_v48 }
 0x1e7   : > { %4273 = vpow2.f32 %v2039_v58  ;;  %v2548_v13 = vunpack.c.l.b16 %v2378_v6  ;;  %v5523_v26 = vpop.eup %4263  ;;  %v2315_v40 = vmul.f32 %v4262_v17, %v5125_v57  ;;  %v2383_v48 = vpack.c.bf16 %v2319_v33, %v2319_v33 }
 0x1e8   : > { %2236 = vadd.xlane.f32.xlu2 %v2235_v51  ;;  %v5531_v23 = vpop.eup %4265  ;;  %2233 = vadd.xlane.f32.xlu1 %v2232_v61  ;;  %v2381_v39 = vpack.c.bf16 %v2317_v11, %v2317_v11  ;;  %v4087_v51 = vld [vmem:[%s5359_s8 + $0x60] sm:$0xff] }
 0x1e9   : > { %v2549_v31 = vpack.c.b16 %v2548_v13, %v2547_v14  ;;  %2239 = vadd.xlane.f32.xlu0 %v2238_v43  ;;  %v2379_v57 = vpack.c.bf16 %v2315_v40, %v2315_v40  ;;  %v2223_v36 = vsel %vm486_vm0, %v5531_v23, 0.0  ;;  %v2631_v46 = vunpack.c.l.b16 %v2383_v48  ;;  %v4089_v40 = vld [vmem:[%s5359_s8 + $0x70] sm:$0xff] }
 0x1ea   : > { %v4268_v60 = vpop.eup %4267 }
 0x1eb   : > { %v4270_v28 = vpop.eup %4269  ;;  %v2320_v34 = vmul.f32 %v4268_v60, %v5153_v32  ;;  %v2099_v30 = vpop.xlane.xlu2 %2098  ;;  %3869 = vmatmul.msk.bf16.vlgmr.msrb.gmra.mxu0 %vm486_vm0, %v2549_v31  ;;  %v2220_v32 = vsel %vm486_vm0, %v5523_v26, 0.0 }
 0x1ec   : > { %v4272_v16 = vpop.eup %4271  ;;  %v2318_v10 = vmul.f32 %v4270_v28, %v5149_v25  ;;  %v2111_v50 = vpop.xlane.xlu0 %2110  ;;  %4275 = vrcp.f32 %v2099_v30  ;;  %v2603_v25 = vunpack.c.l.b16 %v2381_v39  ;;  %2790 = vmatpush.bf16.msrb.mxu0 %v4087_v51  ;;  %v4090_v28 = vld [vmem:[%s5359_s8 + $0x78] sm:$0xff] }
 0x1ed   : > { %v2105_v45 = vpop.xlane.xlu1 %2104  ;;  %v5537_v58 = vpop.eup %4273  ;;  %v2384_v5 = vpack.c.bf16 %v2320_v34, %v2320_v34  ;;  %v2316_v62 = vmul.f32 %v4272_v16, %v5159_v47  ;;  %4277 = vrcp.f32 %v2111_v50  ;;  %v2575_v47 = vunpack.c.l.b16 %v2379_v57 }
 0x1ee   : > { %v2382_v27 = vpack.c.bf16 %v2318_v10, %v2318_v10  ;;  %v2226_v17 = vsel %vm486_vm0, %v5537_v58, 0.0  ;;  %4279 = vrcp.f32 %v2105_v45 }
 0x1ef   : > { %v2632_v20 = vunpack.c.l.b16 %v2384_v5  ;;  %v2380_v18 = vpack.c.bf16 %v2316_v62, %v2316_v62 }
 0x1f0   : > { %v2604_v6 = vunpack.c.l.b16 %v2382_v27  ;;  %2221 = vadd.xlane.f32.xlu2 %v2220_v32  ;;  %2227 = vadd.xlane.f32.xlu1 %v2226_v17 }
 0x1f1   : > { %v2633_v12 = vpack.c.b16 %v2632_v20, %v2631_v46  ;;  %v2576_v14 = vunpack.c.l.b16 %v2380_v18  ;;  %2224 = vadd.xlane.f32.xlu0 %v2223_v36  ;;  %v4088_v18 = vld [vmem:[%s5359_s8 + $0x68] sm:$0xff] }
 0x1f2   : > { %v2605_v13 = vpack.c.b16 %v2604_v6, %v2603_v25  ;;  %v4276_v52 = vpop.eup %4275 }
 0x1f3   : > { %v2577_v33 = vpack.c.b16 %v2576_v14, %v2575_v47  ;;  %v2117_v11 = vpop.xlane.xlu2 %2116  ;;  %3884 = vmatmul.msk.bf16.vlgmr.msrb.gmra.mxu3 %vm486_vm0, %v2633_v12  ;;  %v4278_v31 = vpop.eup %4277  ;;  %v2321_v60 = vmul.f32 %v4276_v52, %v5173_v9 }
 0x1f4   : > { %v2102_v61 = vpop.xlane.xlu0 %2101  ;;  %3879 = vmatmul.msk.bf16.vlgmr.msrb.gmra.mxu2 %vm486_vm0, %v2605_v13  ;;  %v2325_v48 = vmul.f32 %v4278_v31, %v5183_v49  ;;  %v4280_v34 = vpop.eup %4279  ;;  %2874 = vmatpush.bf16.msrb.mxu3 %v4090_v28 }
 0x1f5   : > { %v2114_v43 = vpop.xlane.xlu1 %2113  ;;  %4281 = vrcp.f32 %v2102_v61  ;;  %3874 = vmatmul.msk.bf16.vlgmr.msrb.gmra.mxu1 %vm486_vm0, %v2577_v33  ;;  %2846 = vmatpush.bf16.msrb.mxu2 %v4089_v40  ;;  %v2385_v10 = vpack.c.bf16 %v2321_v60, %v2321_v60  ;;  %v2323_v49 = vmul.f32 %v4280_v34, %v5177_v22 }
 0x1f6   : > { %4283 = vrcp.f32 %v2114_v43  ;;  %v2389_v62 = vpack.c.bf16 %v2325_v48, %v2325_v48  ;;  %2818 = vmatpush.bf16.msrb.mxu1 %v4088_v18  ;;  %v4091_v43 = vld [vmem:[%s5359_s8 + $0x80] sm:$0xff] }
 0x1f7   : > { %4285 = vrcp.f32 %v2117_v11  ;;  %v2659_v36 = vunpack.c.l.b16 %v2385_v10  ;;  %v2387_v47 = vpack.c.bf16 %v2323_v49, %v2323_v49 }
 0x1f8   : > { %v2715_v25 = vunpack.c.l.b16 %v2389_v62 }
 0x1f9   : > { %v2687_v52 = vunpack.c.l.b16 %v2387_v47 }
 0x1fb   : > { %v4282_v30 = vpop.eup %4281  ;;  %v2108_v16 = vpop.xlane.xlu2 %2107 }
 0x1fc   : > { %v4284_v39 = vpop.eup %4283  ;;  %v2322_v50 = vmul.f32 %v4282_v30, %v5197_v4  ;;  %4287 = vrcp.f32 %v2108_v16  ;;  %v2120_v45 = vpop.xlane.xlu0 %2119 }
 0x1fd   : > { %v2135_v57 = vpop.xlane.xlu1 %2134  ;;  %v4286_v5 = vpop.eup %4285  ;;  %v2326_v9 = vmul.f32 %v4284_v39, %v5207_v7  ;;  %4289 = vrcp.f32 %v2120_v45 }
 0x1fe   : > { %v2386_v27 = vpack.c.bf16 %v2322_v50, %v2322_v50  ;;  %v2327_v46 = vmul.f32 %v4286_v5, %v5201_v19  ;;  %4291 = vrcp.f32 %v2135_v57  ;;  %v4094_v57 = vld [vmem:[%s5359_s8 + $0x98] sm:$0xff] }
 0x1ff   : > { %v2390_v32 = vpack.c.bf16 %v2326_v9, %v2326_v9 }
 0x200   : > { %v2660_v20 = vunpack.c.l.b16 %v2386_v27  ;;  %v2391_v13 = vpack.c.bf16 %v2327_v46, %v2327_v46  ;;  %v4093_v27 = vld [vmem:[%s5359_s8 + $0x90] sm:$0xff] }
 0x201   : > { %v2716_v6 = vunpack.c.l.b16 %v2390_v32 }
 0x202   : > { %v4288_v4 = vpop.eup %4287  ;;  %v2661_v17 = vpack.c.b16 %v2660_v20, %v2659_v36  ;;  %v2743_v40 = vunpack.c.l.b16 %v2391_v13 }
 0x203   : > { %v4290_v51 = vpop.eup %4289  ;;  %v2717_v12 = vpack.c.b16 %v2716_v6, %v2715_v25  ;;  %v2324_v7 = vmul.f32 %v4288_v4, %v5221_v42  ;;  %v2129_v14 = vpop.xlane.xlu2 %2128  ;;  %v5910_v6 = vld [vmem:[#allocation4_spill] sm:$0xff] }
 0x204   : > { %v2328_v22 = vmul.f32 %v4290_v51, %v5225_v54  ;;  %v2123_v33 = vpop.xlane.xlu0 %2122  ;;  %3889 = vmatmul.msk.bf16.vlgmr.msra.gmra.mxu0 %vm486_vm0, %v2661_v17  ;;  %v4292_v54 = vpop.eup %4291 }
 0x205   : > { %v2126_v19 = vpop.xlane.xlu1 %2125  ;;  %v2388_v11 = vpack.c.bf16 %v2324_v7, %v2324_v7  ;;  %4293 = vrcp.f32 %v2123_v33  ;;  %3899 = vmatmul.msk.bf16.vlgmr.msra.gmra.mxu2 %vm486_vm0, %v2717_v12  ;;  %2902 = vmatpush.bf16.msra.mxu0 %v4091_v43  ;;  %v2333_v5 = vmul.f32 %v4292_v54, %v5231_v35  ;;  %v5911_v12 = vld [vmem:[#allocation2_spill] sm:$0xff] }
 0x206   : > { %v2392_v61 = vpack.c.bf16 %v2328_v22, %v2328_v22  ;;  %4295 = vrcp.f32 %v2126_v19  ;;  %2958 = vmatpush.bf16.msra.mxu2 %v4093_v27  ;;  %v5912_v19 = vld [vmem:[#allocation3_spill] sm:$0xff]  ;;  %v5913_v54 = vld [vmem:[#allocation6_spill] sm:$0xff]  ;;  %v5915_v27 = vld [vmem:[#allocation8_spill] sm:$0xff] }
 0x207   : > { %v2688_v31 = vunpack.c.l.b16 %v2388_v11  ;;  %v2397_v46 = vpack.c.bf16 %v2333_v5, %v2333_v5 }
 0x208   : > { %v2744_v42 = vunpack.c.l.b16 %v2392_v61 }
 0x209   : > { %v2689_v60 = vpack.c.b16 %v2688_v31, %v2687_v52  ;;  %v2827_v13 = vunpack.c.l.b16 %v2397_v46 }
 0x20a   : > { %v2745_v28 = vpack.c.b16 %v2744_v42, %v2743_v40 }
 0x20b   : > { %v4294_v48 = vpop.eup %4293  ;;  %v2138_v34 = vpop.xlane.xlu2 %2137  ;;  %3894 = vmatmul.msk.bf16.vlgmr.msra.gmra.mxu1 %vm486_vm0, %v2689_v60 }
 0x20c   : > { %v4296_v30 = vpop.eup %4295  ;;  %v2329_v16 = vmul.f32 %v4294_v48, %v5249_v38  ;;  %4297 = vrcp.f32 %v2138_v34  ;;  %v2141_v39 = vpop.xlane.xlu0 %2140  ;;  %3904 = vmatmul.msk.bf16.vlgmr.msra.gmra.mxu3 %vm486_vm0, %v2745_v28  ;;  %v4092_v38 = vld [vmem:[%s5359_s8 + $0x88] sm:$0xff] }
 0x20d   : > { %v2144_v10 = vpop.xlane.xlu1 %2143  ;;  %v2330_v50 = vmul.f32 %v4296_v30, %v5255_v55  ;;  %4299 = vrcp.f32 %v2141_v39  ;;  %2986 = vmatpush.bf16.msra.mxu3 %v4094_v57  ;;  %2930 = vmatpush.bf16.msra.mxu1 %v4092_v38  ;;  %v4096_v57 = vld [vmem:[%s5359_s8 + $0xa8] sm:$0xff] }
 0x20e   : > { %v2393_v45 = vpack.c.bf16 %v2329_v16, %v2329_v16  ;;  %4301 = vrcp.f32 %v2144_v10  ;;  %v5914_v16 = vld [vmem:[#allocation7_spill] sm:$0xff] }
 0x20f   : > { %4303 = vrcp.f32 %v2129_v14  ;;  %v2394_v62 = vpack.c.bf16 %v2330_v50, %v2330_v50 }
 0x210   : > { %v2771_v9 = vunpack.c.l.b16 %v2393_v45  ;;  %v4095_v45 = vld [vmem:[%s5359_s8 + $0xa0] sm:$0xff] }
 0x211   : > { %v2772_v49 = vunpack.c.l.b16 %v2394_v62 }
 0x212   : > { %v4298_v32 = vpop.eup %4297 }
 0x213   : > { %v4300_v36 = vpop.eup %4299  ;;  %v2773_v20 = vpack.c.b16 %v2772_v49, %v2771_v9  ;;  %v2334_v55 = vmul.f32 %v4298_v32, %v5269_v63  ;;  %v2159_v18 = vpop.xlane.xlu2 %2158 }
 0x214   : > { %v4302_v25 = vpop.eup %4301  ;;  %v2335_v4 = vmul.f32 %v4300_v36, %v5910_v6  ;;  %v2132_v35 = vpop.xlane.xlu0 %2131 }
 0x215   : > { %v2147_v17 = vpop.xlane.xlu1 %2146  ;;  %v4304_v51 = vpop.eup %4303  ;;  %v2398_v47 = vpack.c.bf16 %v2334_v55, %v2334_v55  ;;  %v2336_v7 = vmul.f32 %v4302_v25, %v5911_v12  ;;  %4305 = vrcp.f32 %v2132_v35  ;;  %3909 = vmatmul.msk.bf16.vlgmr.msrb.gmra.mxu0 %vm486_vm0, %v2773_v20  ;;  %v4098_v25 = vld [vmem:[%s5359_s8 + $0xb8] sm:$0xff]  ;;  %v5916_v35 = vld [vmem:[#allocation10_spill] sm:$0xff]  ;;  %v4097_v12 = vld [vmem:[%s5359_s8 + $0xb0] sm:$0xff] }
 0x216   : > { %v2399_v14 = vpack.c.bf16 %v2335_v4, %v2335_v4  ;;  %4307 = vrcp.f32 %v2147_v17  ;;  %v2331_v63 = vmul.f32 %v4304_v51, %v5912_v19  ;;  %3014 = vmatpush.bf16.msrb.mxu0 %v4095_v45  ;;  %v5917_v51 = vld [vmem:[#allocation5_spill] sm:$0xff] }
 0x217   : > { %v2828_v22 = vunpack.c.l.b16 %v2398_v47  ;;  %v2400_v33 = vpack.c.bf16 %v2336_v7, %v2336_v7 }
 0x218   : > { %v2855_v11 = vunpack.c.l.b16 %v2399_v14  ;;  %v2395_v60 = vpack.c.bf16 %v2331_v63, %v2331_v63  ;;  %v5918_v14 = vld [vmem:[#allocation9_spill] sm:$0xff]  ;;  %v5919_v63 = vld [vmem:[#allocation12_spill] sm:$0xff] }
 0x219   : > { %v2829_v61 = vpack.c.b16 %v2828_v22, %v2827_v13  ;;  %v2856_v43 = vunpack.c.l.b16 %v2400_v33 }
 0x21a   : > { %v2799_v10 = vunpack.c.l.b16 %v2395_v60 }
 0x21b   : > { %v4306_v52 = vpop.eup %4305  ;;  %v2857_v31 = vpack.c.b16 %v2856_v43, %v2855_v11  ;;  %v2150_v40 = vpop.xlane.xlu2 %2149  ;;  %3919 = vmatmul.msk.bf16.vlgmr.msrb.gmra.mxu2 %vm486_vm0, %v2829_v61 }
 0x21c   : > { %v4308_v42 = vpop.eup %4307  ;;  %v2332_v28 = vmul.f32 %v4306_v52, %v5913_v54  ;;  %4309 = vrcp.f32 %v2150_v40  ;;  %v2153_v48 = vpop.xlane.xlu0 %2152  ;;  %3070 = vmatpush.bf16.msrb.mxu2 %v4097_v12 }
 0x21d   : > { %v2165_v34 = vpop.xlane.xlu1 %2164  ;;  %3924 = vmatmul.msk.bf16.vlgmr.msrb.gmra.mxu3 %vm486_vm0, %v2857_v31  ;;  %v2337_v39 = vmul.f32 %v4308_v42, %v5914_v16  ;;  %v5920_v31 = vld [vmem:[#allocation13_spill] sm:$0xff] }
 0x21e   : > { %v2396_v30 = vpack.c.bf16 %v2332_v28, %v2332_v28  ;;  %4311 = vrcp.f32 %v2165_v34  ;;  %3098 = vmatpush.bf16.msrb.mxu3 %v4098_v25  ;;  %v4099_v25 = vld [vmem:[%s5359_s8 + $0xc0] sm:$0xff] }
 0x21f   : > { %4313 = vrcp.f32 %v2159_v18  ;;  %v2401_v9 = vpack.c.bf16 %v2337_v39, %v2337_v39 }
 0x220   : > { %v2800_v50 = vunpack.c.l.b16 %v2396_v30  ;;  %4315 = vrcp.f32 %v2153_v48  ;;  %v5921_v48 = vld [vmem:[#allocation11_spill] sm:$0xff] }
 0x221   : > { %v2883_v6 = vunpack.c.l.b16 %v2401_v9 }
 0x222   : > { %v4310_v5 = vpop.eup %4309  ;;  %v2801_v62 = vpack.c.b16 %v2800_v50, %v2799_v10 }
 0x223   : > { %v2338_v38 = vmul.f32 %v4310_v5, %v5915_v27  ;;  %v2168_v49 = vpop.xlane.xlu2 %2167 }
 0x224   : > { %v4312_v32 = vpop.eup %4311  ;;  %4317 = vrcp.f32 %v2168_v49  ;;  %v2162_v36 = vpop.xlane.xlu0 %2161  ;;  %3914 = vmatmul.msk.bf16.vlgmr.msrb.gmra.mxu1 %vm486_vm0, %v2801_v62 }
 0x225   : > { %v2156_v46 = vpop.xlane.xlu1 %2155  ;;  %v4314_v20 = vpop.eup %4313  ;;  %v2402_v55 = vpack.c.bf16 %v2338_v38, %v2338_v38  ;;  %4319 = vrcp.f32 %v2162_v36  ;;  %3042 = vmatpush.bf16.msrb.mxu1 %v4096_v57  ;;  %v2343_v17 = vmul.f32 %v4312_v32, %v5916_v35 }
 0x226   : > { %v4316_v18 = vpop.eup %4315  ;;  %4321 = vrcp.f32 %v2156_v46  ;;  %v2341_v47 = vmul.f32 %v4314_v20, %v5917_v51 }
 0x227   : > { %v2884_v4 = vunpack.c.l.b16 %v2402_v55  ;;  %v2339_v13 = vmul.f32 %v4316_v18, %v5918_v14  ;;  %v2407_v19 = vpack.c.bf16 %v2343_v17, %v2343_v17  ;;  %v4101_v55 = vld [vmem:[%s5359_s8 + $0xd0] sm:$0xff]  ;;  %v4102_v18 = vld [vmem:[%s5359_s8 + $0xd8] sm:$0xff] }
 0x228   : > { %v2405_v52 = vpack.c.bf16 %v2341_v47, %v2341_v47 }
 0x229   : > { %v2885_v7 = vpack.c.b16 %v2884_v4, %v2883_v6  ;;  %v2403_v54 = vpack.c.bf16 %v2339_v13, %v2339_v13  ;;  %v2967_v16 = vunpack.c.l.b16 %v2407_v19  ;;  %v5922_v6 = vld [vmem:[#allocation15_spill] sm:$0xff] }
 0x22a   : > { %v4318_v22 = vpop.eup %4317  ;;  %v2939_v50 = vunpack.c.l.b16 %v2405_v52 }
 0x22b   : > { %v4320_v33 = vpop.eup %4319  ;;  %v2344_v11 = vmul.f32 %v4318_v22, %v5919_v63  ;;  %v2177_v61 = vpop.xlane.xlu2 %2176  ;;  %3929 = vmatmul.msk.bf16.vlgmr.msra.gmra.mxu0 %vm486_vm0, %v2885_v7  ;;  %v2911_v57 = vunpack.c.l.b16 %v2403_v54 }
 0x22c   : > { %v4322_v43 = vpop.eup %4321  ;;  %v2342_v40 = vmul.f32 %v4320_v33, %v5920_v31  ;;  %v2171_v42 = vpop.xlane.xlu0 %2170  ;;  %4323 = vrcp.f32 %v2177_v61  ;;  %3126 = vmatpush.bf16.msra.mxu0 %v4099_v25  ;;  %v5923_v33 = vld [vmem:[#allocation17_spill] sm:$0xff]  ;;  %v5924_v61 = vld [vmem:[#allocation16_spill] sm:$0xff] }
 0x22d   : > { %v2189_v60 = vpop.xlane.xlu1 %2188  ;;  %v2408_v28 = vpack.c.bf16 %v2344_v11, %v2344_v11  ;;  %v2340_v34 = vmul.f32 %v4322_v43, %v5921_v48  ;;  %4325 = vrcp.f32 %v2171_v42  ;;  %v4100_v11 = vld [vmem:[%s5359_s8 + $0xc8] sm:$0xff] }
 0x22e   : > { %v2406_v30 = vpack.c.bf16 %v2342_v40, %v2342_v40  ;;  %4327 = vrcp.f32 %v2189_v60  ;;  %v5925_v40 = vld [vmem:[#allocation14_spill] sm:$0xff] }
 0x22f   : > { %v2968_v39 = vunpack.c.l.b16 %v2408_v28  ;;  %v2404_v10 = vpack.c.bf16 %v2340_v34, %v2340_v34 }
 0x230   : > { %v2940_v45 = vunpack.c.l.b16 %v2406_v30 }
 0x231   : > { %v2969_v5 = vpack.c.b16 %v2968_v39, %v2967_v16  ;;  %v2912_v62 = vunpack.c.l.b16 %v2404_v10 }
 0x232   : > { %v2941_v9 = vpack.c.b16 %v2940_v45, %v2939_v50  ;;  %v4324_v36 = vpop.eup %4323  ;;  %v5926_v45 = vld [vmem:[#allocation19_spill] sm:$0xff] }
 0x233   : > { %v2913_v27 = vpack.c.b16 %v2912_v62, %v2911_v57  ;;  %v2183_v38 = vpop.xlane.xlu2 %2182  ;;  %3944 = vmatmul.msk.bf16.vlgmr.msra.gmra.mxu3 %vm486_vm0, %v2969_v5  ;;  %v4326_v46 = vpop.eup %4325  ;;  %v2347_v20 = vmul.f32 %v4324_v36, %v5376_v24  ;;  %v4106_v36 = vld [vmem:[%s5359_s8 + $0xf8] sm:$0xff] }
 0x234   : > { %v2180_v49 = vpop.xlane.xlu0 %2179  ;;  %3939 = vmatmul.msk.bf16.vlgmr.msra.gmra.mxu2 %vm486_vm0, %v2941_v9  ;;  %v2345_v4 = vmul.f32 %v4326_v46, %v5922_v6  ;;  %v4328_v35 = vpop.eup %4327  ;;  %3210 = vmatpush.bf16.msra.mxu3 %v4102_v18 }
 0x235   : > { %v2174_v32 = vpop.xlane.xlu1 %2173  ;;  %4329 = vrcp.f32 %v2180_v49  ;;  %3934 = vmatmul.msk.bf16.vlgmr.msra.gmra.mxu1 %vm486_vm0, %v2913_v27  ;;  %3182 = vmatpush.bf16.msra.mxu2 %v4101_v55  ;;  %v2411_v12 = vpack.c.bf16 %v2347_v20, %v2347_v20  ;;  %v2351_v43 = vmul.f32 %v4328_v35, %v5924_v61  ;;  %v4105_v20 = vld [vmem:[%s5359_s8 + $0xf0] sm:$0xff] }
 0x236   : > { %4331 = vrcp.f32 %v2174_v32  ;;  %v2409_v22 = vpack.c.bf16 %v2345_v4, %v2345_v4  ;;  %3154 = vmatpush.bf16.msra.mxu1 %v4100_v11 }
 0x237   : > { %4333 = vrcp.f32 %v2183_v38  ;;  %v3023_v31 = vunpack.c.l.b16 %v2411_v12  ;;  %v2415_v30 = vpack.c.bf16 %v2351_v43, %v2351_v43 }
 0x238   : > { %v2995_v54 = vunpack.c.l.b16 %v2409_v22 }
 0x239   : > { %v3079_v38 = vunpack.c.l.b16 %v2415_v30 }
 0x23b   : > { %v4330_v17 = vpop.eup %4329  ;;  %v2192_v51 = vpop.xlane.xlu2 %2191 }
 0x23c   : > { %v4332_v47 = vpop.eup %4331  ;;  %v2348_v7 = vmul.f32 %v4330_v17, %v5410_v3  ;;  %4335 = vrcp.f32 %v2192_v51  ;;  %v2186_v14 = vpop.xlane.xlu0 %2185  ;;  %v4103_v51 = vld [vmem:[%s5359_s8 + $0xe0] sm:$0xff] }
 0x23d   : > { %v2201_v13 = vpop.xlane.xlu1 %2200  ;;  %v4334_v24 = vpop.eup %4333  ;;  %v2346_v19 = vmul.f32 %v4332_v47, %v5923_v33  ;;  %4337 = vrcp.f32 %v2186_v14 }
 0x23e   : > { %v2412_v63 = vpack.c.bf16 %v2348_v7, %v2348_v7  ;;  %v2349_v42 = vmul.f32 %v4334_v24, %v5925_v40  ;;  %v4104_v7 = vld [vmem:[%s5359_s8 + $0xe8] sm:$0xff] }
 0x23f   : > { %v2410_v52 = vpack.c.bf16 %v2346_v19, %v2346_v19 }
 0x240   : > { %v3024_v60 = vunpack.c.l.b16 %v2412_v63  ;;  %v2413_v50 = vpack.c.bf16 %v2349_v42, %v2349_v42 }
 0x241   : > { %v2996_v3 = vunpack.c.l.b16 %v2410_v52 }
 0x242   : > { %v4336_v28 = vpop.eup %4335  ;;  %v3025_v48 = vpack.c.b16 %v3024_v60, %v3023_v31  ;;  %v3051_v32 = vunpack.c.l.b16 %v2413_v50  ;;  %v5927_v60 = vld [vmem:[#allocation18_spill] sm:$0xff] }
 0x243   : > { %v4338_v34 = vpop.eup %4337  ;;  %v2997_v16 = vpack.c.b16 %v2996_v3, %v2995_v54  ;;  %v2352_v39 = vmul.f32 %v4336_v28, %v5429_v29  ;;  %v2195_v10 = vpop.xlane.xlu2 %2194 }
 0x244   : > { %v2350_v57 = vmul.f32 %v4338_v34, %v5926_v45  ;;  %v2213_v5 = vpop.xlane.xlu0 %2212  ;;  %4339 = vrcp.f32 %v2195_v10 }
 0x245   : > { %v2207_v62 = vpop.xlane.xlu1 %2206  ;;  %v2416_v9 = vpack.c.bf16 %v2352_v39, %v2352_v39  ;;  %3949 = vmatmul.msk.bf16.vlgmr.msrb.gmra.mxu0 %vm486_vm0, %v2997_v16  ;;  %3954 = vmatmul.msk.bf16.vlgmr.msrb.gmra.mxu1 %vm486_vm0, %v3025_v48 }
 0x246   : > { %v2414_v27 = vpack.c.bf16 %v2350_v57, %v2350_v57  ;;  %4341 = vrcp.f32 %v2207_v62  ;;  %3238 = vmatpush.bf16.msrb.mxu0 %v4103_v51  ;;  %3266 = vmatpush.bf16.msrb.mxu1 %v4104_v7 }
 0x247   : > { %v3080_v49 = vunpack.c.l.b16 %v2416_v9  ;;  %4343 = vrcp.f32 %v2213_v5 }
 0x248   : > { %v3052_v29 = vunpack.c.l.b16 %v2414_v27  ;;  %4345 = vrcp.f32 %v2201_v13 }
 0x249   : > { %v3081_v46 = vpack.c.b16 %v3080_v49, %v3079_v38 }
 0x24a   : > { %v3053_v55 = vpack.c.b16 %v3052_v29, %v3051_v32  ;;  %v4340_v25 = vpop.eup %4339 }
 0x24b   : > { %v2210_v18 = vpop.xlane.xlu2 %2209  ;;  %3964 = vmatmul.msk.bf16.vlgmr.msrb.gmra.mxu3 %vm486_vm0, %v3081_v46  ;;  %v2353_v47 = vmul.f32 %v4340_v25, %v5442_v2 }
 0x24c   : > { %4347 = vrcp.f32 %v2210_v18  ;;  %v2198_v6 = vpop.xlane.xlu0 %2197  ;;  %3959 = vmatmul.msk.bf16.vlgmr.msrb.gmra.mxu2 %vm486_vm0, %v3053_v55  ;;  %3322 = vmatpush.bf16.msrb.mxu3 %v4106_v36  ;;  %v4342_v35 = vpop.eup %4341 }
 0x24d   : > { %v2216_v4 = vpop.xlane.xlu1 %2215  ;;  %4349 = vrcp.f32 %v2198_v6  ;;  %3294 = vmatpush.bf16.msrb.mxu2 %v4105_v20  ;;  %v4344_v17 = vpop.eup %4343  ;;  %v2357_v12 = vmul.f32 %v4342_v35, %v5436_v56  ;;  %v2417_v11 = vpack.c.bf16 %v2353_v47, %v2353_v47 }
 0x24e   : > { %4351 = vrcp.f32 %v2216_v4  ;;  %v4346_v14 = vpop.eup %4345  ;;  %v2359_v13 = vmul.f32 %v4344_v17, %v5451_v8 }
 0x24f   : > { %v2421_v61 = vpack.c.bf16 %v2357_v12, %v2357_v12  ;;  %v2355_v54 = vmul.f32 %v4346_v14, %v5927_v60  ;;  %v3107_v48 = vunpack.c.l.b16 %v2417_v11 }
 0x250   : > { %v2423_v31 = vpack.c.bf16 %v2359_v13, %v2359_v13 }
 0x251   : > { %v3163_v34 = vunpack.c.l.b16 %v2421_v61  ;;  %v2419_v10 = vpack.c.bf16 %v2355_v54, %v2355_v54 }
 0x252   : > { %v4348_v24 = vpop.eup %4347  ;;  %v2456_v22 = vpop.f32.mrf.mxu0  ;;  %v3191_v16 = vunpack.c.l.b16 %v2423_v31 }
 0x253   : > { %v4350_v33 = vpop.eup %4349  ;;  %v2358_v2 = vmul.f32 %v4348_v24, %v5455_v1  ;;  %v3329_v19 = vpack.c.bf16 %v2456_v22, %v2456_v22  ;;  %v2204_v56 = vpop.xlane.xlu2 %2203  ;;  %v3135_v29 = vunpack.c.l.b16 %v2419_v10 }
 0x254   : > { %v4352_v63 = vpop.eup %4351  ;;  %v2354_v8 = vmul.f32 %v4350_v33, %v5460_v44  ;;  %4353 = vrcp.f32 %v2204_v56  ;;  %v2231_v43 = vpop.xlane.xlu0 %2230 }
 0x255   : > { %v2219_v52 = vpop.xlane.xlu1 %2218  ;;  %v2422_v40 = vpack.c.bf16 %v2358_v2, %v2358_v2  ;;  %v2360_v42 = vmul.f32 %v4352_v63, %v5468_v0  ;;  %3394 = vst.msk [vmem:[%s5624_s11] sm:$0xf] %vm3393_vm1, %v3329_v19  ;;  %4355 = vrcp.f32 %v2231_v43 }
 0x256   : > { %v2418_v3 = vpack.c.bf16 %v2354_v8, %v2354_v8  ;;  %4357 = vrcp.f32 %v2219_v52 }
 0x257   : > { %v3164_v1 = vunpack.c.l.b16 %v2422_v40  ;;  %v2424_v28 = vpack.c.bf16 %v2360_v42, %v2360_v42 }
 0x258   : > { %v3108_v30 = vunpack.c.l.b16 %v2418_v3 }
 0x259   : > { %v3192_v44 = vunpack.c.l.b16 %v2424_v28  ;;  %v3165_v50 = vpack.c.b16 %v3164_v1, %v3163_v34 }
 0x25a   : > { %v4354_v39 = vpop.eup %4353  ;;  %v3109_v45 = vpack.c.b16 %v3108_v30, %v3107_v48  ;;  %v2458_v57 = vpop.f32.mrf.mxu0 }
 0x25b   : > { %v3193_v0 = vpack.c.b16 %v3192_v44, %v3191_v16  ;;  %v2356_v5 = vmul.f32 %v4354_v39, %v5484_v53  ;;  %v3330_v62 = vpack.c.bf16 %v2458_v57, %v2458_v57  ;;  %v2237_v9 = vpop.xlane.xlu2 %2236  ;;  %v4356_v32 = vpop.eup %4355 }
 0x25c   : > { %4359 = vrcp.f32 %v2237_v9  ;;  %v2240_v27 = vpop.xlane.xlu0 %2239  ;;  %3969 = vmatmul.msk.bf16.vlgmr.msra.gmra.mxu0 %vm486_vm0, %v3109_v45  ;;  %3979 = vmatmul.msk.bf16.vlgmr.msra.gmra.mxu2 %vm486_vm0, %v3165_v50  ;;  %v4358_v55 = vpop.eup %4357  ;;  %v2365_v25 = vmul.f32 %v4356_v32, %v5482_v21 }
 0x25d   : > { %v2234_v38 = vpop.xlane.xlu1 %2233  ;;  %v2420_v49 = vpack.c.bf16 %v2356_v5, %v2356_v5  ;;  %3395 = vst.msk [vmem:[%s5624_s11 + $0x4] sm:$0xf] %vm3393_vm1, %v3330_v62  ;;  %4361 = vrcp.f32 %v2240_v27  ;;  %3984 = vmatmul.msk.bf16.vlgmr.msra.gmra.mxu3 %vm486_vm0, %v3193_v0  ;;  %v2361_v19 = vmul.f32 %v4358_v55, %v5493_v41 }
 0x25e   : > { %4363 = vrcp.f32 %v2234_v38  ;;  %v2512_v53 = vpop.f32.mrf.mxu2  ;;  %v2429_v24 = vpack.c.bf16 %v2365_v25, %v2365_v25 }
 0x25f   : > { %v3136_v36 = vunpack.c.l.b16 %v2420_v49  ;;  %v3333_v46 = vpack.c.bf16 %v2512_v53, %v2512_v53  ;;  %v2425_v3 = vpack.c.bf16 %v2361_v19, %v2361_v19 }
 0x260   : > { %v2540_v20 = vpop.f32.mrf.mxu3  ;;  %v3275_v43 = vunpack.c.l.b16 %v2429_v24 }
 0x261   : > { %v3137_v18 = vpack.c.b16 %v3136_v36, %v3135_v29  ;;  %3398 = vst.msk [vmem:[%s5624_s11 + $0x10] sm:$0xf] %vm3393_vm1, %v3333_v46  ;;  %v3335_v6 = vpack.c.bf16 %v2540_v20, %v2540_v20  ;;  %v2484_v4 = vpop.f32.mrf.mxu1 }
 0x262   : > { %v4360_v35 = vpop.eup %4359  ;;  %v3331_v17 = vpack.c.bf16 %v2484_v4, %v2484_v4 }
 0x263   : > { %v4362_v51 = vpop.eup %4361  ;;  %v2367_v47 = vmul.f32 %v4360_v35, %v5507_v37  ;;  %3400 = vst.msk [vmem:[%s5624_s11 + $0x18] sm:$0xf] %vm3393_vm1, %v3335_v6  ;;  %v2222_v12 = vpop.xlane.xlu2 %2221  ;;  %3974 = vmatmul.msk.bf16.vlgmr.msra.gmra.mxu1 %vm486_vm0, %v3137_v18 }
 0x264   : > { %v4364_v7 = vpop.eup %4363  ;;  %v2368_v14 = vmul.f32 %v4362_v51, %v5513_v15  ;;  %3396 = vst.msk [vmem:[%s5624_s11 + $0x8] sm:$0xf] %vm3393_vm1, %v3331_v17  ;;  %4365 = vrcp.f32 %v2222_v12  ;;  %v2225_v21 = vpop.xlane.xlu0 %2224 }
 0x265   : > { %v2228_v13 = vpop.xlane.xlu1 %2227  ;;  %v2431_v22 = vpack.c.bf16 %v2367_v47, %v2367_v47  ;;  %v2366_v33 = vmul.f32 %v4364_v7, %v5515_v59  ;;  %4367 = vrcp.f32 %v2225_v21 }
 0x266   : > { %v2432_v37 = vpack.c.bf16 %v2368_v14, %v2368_v14  ;;  %4369 = vrcp.f32 %v2228_v13  ;;  %v2514_v2 = vpop.f32.mrf.mxu2 }
 0x267   : > { %v2430_v56 = vpack.c.bf16 %v2366_v33, %v2366_v33  ;;  %v3334_v63 = vpack.c.bf16 %v2514_v2, %v2514_v2  ;;  %v3303_v11 = vunpack.c.l.b16 %v2431_v22 }
 0x268   : > { %v3304_v15 = vunpack.c.l.b16 %v2432_v37  ;;  %v2542_v61 = vpop.f32.mrf.mxu3  ;;  %v2568_v8 = vpop.f32.mrf.mxu0 }
 0x269   : > { %v3276_v52 = vunpack.c.l.b16 %v2430_v56  ;;  %3399 = vst.msk [vmem:[%s5624_s11 + $0x14] sm:$0xf] %vm3393_vm1, %v3334_v63  ;;  %v3336_v31 = vpack.c.bf16 %v2542_v61, %v2542_v61  ;;  %v3337_v59 = vpack.c.bf16 %v2568_v8, %v2568_v8  ;;  %v2486_v40 = vpop.f32.mrf.mxu1 }
 0x26a   : > { %v4366_v42 = vpop.eup %4365  ;;  %v3305_v60 = vpack.c.b16 %v3304_v15, %v3303_v11  ;;  %v3332_v54 = vpack.c.bf16 %v2486_v40, %v2486_v40 }
 0x26b   : > { %v4368_v41 = vpop.eup %4367  ;;  %v3277_v1 = vpack.c.b16 %v3276_v52, %v3275_v43  ;;  %v2362_v28 = vmul.f32 %v4366_v42, %v5523_v26  ;;  %3401 = vst.msk [vmem:[%s5624_s11 + $0x1c] sm:$0xf] %vm3393_vm1, %v3336_v31  ;;  %v3219_v26 = vunpack.c.l.b16 %v2425_v3 }
 0x26c   : > { %v4370_v48 = vpop.eup %4369  ;;  %v2363_v34 = vmul.f32 %v4368_v41, %v5531_v23  ;;  %3402 = vst.msk [vmem:[%s5624_s11 + $0x20] sm:$0xf] %vm3393_vm1, %v3337_v59 }
 0x26d   : > { %v2426_v30 = vpack.c.bf16 %v2362_v28, %v2362_v28  ;;  %v2364_v16 = vmul.f32 %v4370_v48, %v5537_v58  ;;  %3397 = vst.msk [vmem:[%s5624_s11 + $0xc] sm:$0xf] %vm3393_vm1, %v3332_v54  ;;  %3999 = vmatmul.msk.bf16.vlgmr.msrb.gmra.mxu2 %vm486_vm0, %v3277_v1  ;;  %4004 = vmatmul.msk.bf16.vlgmr.msrb.gmra.mxu3 %vm486_vm0, %v3305_v60 }
 0x26e   : > { %v2427_v44 = vpack.c.bf16 %v2363_v34, %v2363_v34 }
 0x26f   : > { %v3220_v39 = vunpack.c.l.b16 %v2426_v30  ;;  %v2428_v10 = vpack.c.bf16 %v2364_v16, %v2364_v16 }
 0x270   : > { %v3247_v50 = vunpack.c.l.b16 %v2427_v44  ;;  %v2570_v23 = vpop.f32.mrf.mxu0 }
 0x271   : > { %v3221_v45 = vpack.c.b16 %v3220_v39, %v3219_v26  ;;  %v3248_v57 = vunpack.c.l.b16 %v2428_v10  ;;  %v3338_v0 = vpack.c.bf16 %v2570_v23, %v2570_v23 }
 0x272   : > { %v2596_v58 = vpop.f32.mrf.mxu1 }
 0x273   : > { %v3249_v5 = vpack.c.b16 %v3248_v57, %v3247_v50  ;;  %3403 = vst.msk [vmem:[%s5624_s11 + $0x24] sm:$0xf] %vm3393_vm1, %v3338_v0  ;;  %v3339_v62 = vpack.c.bf16 %v2596_v58, %v2596_v58  ;;  %3989 = vmatmul.msk.bf16.vlgmr.msrb.gmra.mxu0 %vm486_vm0, %v3221_v45 }
 0x275   : > { %3404 = vst.msk [vmem:[%s5624_s11 + $0x28] sm:$0xf] %vm3393_vm1, %v3339_v62  ;;  %3994 = vmatmul.msk.bf16.vlgmr.msrb.gmra.mxu1 %vm486_vm0, %v3249_v5 }
 0x276   : > { %v2652_v9 = vpop.f32.mrf.mxu3 }
 0x277   : > { %v3343_v27 = vpack.c.bf16 %v2652_v9, %v2652_v9  ;;  %v2624_v38 = vpop.f32.mrf.mxu2 }
 0x278   : > { %v3341_v49 = vpack.c.bf16 %v2624_v38, %v2624_v38 }
 0x279   : > { %3408 = vst.msk [vmem:[%s5624_s11 + $0x38] sm:$0xf] %vm3393_vm1, %v3343_v27 }
 0x27a   : > { %3406 = vst.msk [vmem:[%s5624_s11 + $0x30] sm:$0xf] %vm3393_vm1, %v3341_v49  ;;  %v2598_v32 = vpop.f32.mrf.mxu1 }
 0x27b   : > { %v3340_v53 = vpack.c.bf16 %v2598_v32, %v2598_v32 }
 0x27d   : > { %3405 = vst.msk [vmem:[%s5624_s11 + $0x2c] sm:$0xf] %vm3393_vm1, %v3340_v53 }
 0x27e   : > { %v2654_v29 = vpop.f32.mrf.mxu3 }
 0x27f   : > { %v3344_v36 = vpack.c.bf16 %v2654_v29, %v2654_v29  ;;  %v2626_v46 = vpop.f32.mrf.mxu2 }
 0x280   : > { %v3342_v20 = vpack.c.bf16 %v2626_v46, %v2626_v46 }
 0x281   : > { %3409 = vst.msk [vmem:[%s5624_s11 + $0x3c] sm:$0xf] %vm3393_vm1, %v3344_v36  ;;  %v2680_v55 = vpop.f32.mrf.mxu0 }
 0x282   : > { %3407 = vst.msk [vmem:[%s5624_s11 + $0x34] sm:$0xf] %vm3393_vm1, %v3342_v20  ;;  %v3345_v18 = vpack.c.bf16 %v2680_v55, %v2680_v55 }
 0x284   : > { %3410 = vst.msk [vmem:[%s5624_s11 + $0x40] sm:$0xf] %vm3393_vm1, %v3345_v18 }
 0x288   : > { %v2708_v25 = vpop.f32.mrf.mxu1  ;;  %v2736_v6 = vpop.f32.mrf.mxu2 }
 0x289   : > { %v3347_v4 = vpack.c.bf16 %v2708_v25, %v2708_v25  ;;  %v3349_v35 = vpack.c.bf16 %v2736_v6, %v2736_v6  ;;  %v2682_v17 = vpop.f32.mrf.mxu0 }
 0x28a   : > { %v3346_v51 = vpack.c.bf16 %v2682_v17, %v2682_v17 }
 0x28b   : > { %3412 = vst.msk [vmem:[%s5624_s11 + $0x48] sm:$0xf] %vm3393_vm1, %v3347_v4 }
 0x28c   : > { %3414 = vst.msk [vmem:[%s5624_s11 + $0x50] sm:$0xf] %vm3393_vm1, %v3349_v35 }
 0x28d   : > { %3411 = vst.msk [vmem:[%s5624_s11 + $0x44] sm:$0xf] %vm3393_vm1, %v3346_v51 }
 0x28f   : > { %v2764_v47 = vpop.f32.mrf.mxu3 }
 0x290   : > { %v2710_v12 = vpop.f32.mrf.mxu1  ;;  %v2738_v7 = vpop.f32.mrf.mxu2  ;;  %v3351_v14 = vpack.c.bf16 %v2764_v47, %v2764_v47 }
 0x291   : > { %v3348_v21 = vpack.c.bf16 %v2710_v12, %v2710_v12  ;;  %v3350_v13 = vpack.c.bf16 %v2738_v7, %v2738_v7 }
 0x292   : > { %3416 = vst.msk [vmem:[%s5624_s11 + $0x58] sm:$0xf] %vm3393_vm1, %v3351_v14  ;;  %v2792_v24 = vpop.f32.mrf.mxu0 }
 0x293   : > { %3413 = vst.msk [vmem:[%s5624_s11 + $0x4c] sm:$0xf] %vm3393_vm1, %v3348_v21  ;;  %v3353_v22 = vpack.c.bf16 %v2792_v24, %v2792_v24 }
 0x294   : > { %3415 = vst.msk [vmem:[%s5624_s11 + $0x54] sm:$0xf] %vm3393_vm1, %v3350_v13 }
 0x295   : > { %3418 = vst.msk [vmem:[%s5624_s11 + $0x60] sm:$0xf] %vm3393_vm1, %v3353_v22 }
 0x297   : > { %v2766_v33 = vpop.f32.mrf.mxu3 }
 0x298   : > { %v3352_v37 = vpack.c.bf16 %v2766_v33, %v2766_v33 }
 0x29a   : > { %3417 = vst.msk [vmem:[%s5624_s11 + $0x5c] sm:$0xf] %vm3393_vm1, %v3352_v37  ;;  %v2794_v2 = vpop.f32.mrf.mxu0 }
 0x29b   : > { %v3354_v19 = vpack.c.bf16 %v2794_v2, %v2794_v2 }
 0x29d   : > { %3419 = vst.msk [vmem:[%s5624_s11 + $0x64] sm:$0xf] %vm3393_vm1, %v3354_v19 }
 0x29e   : > { %v2848_v56 = vpop.f32.mrf.mxu2 }
 0x29f   : > { %v3357_v63 = vpack.c.bf16 %v2848_v56, %v2848_v56 }
 0x2a0   : > { %v2876_v11 = vpop.f32.mrf.mxu3 }
 0x2a1   : > { %3422 = vst.msk [vmem:[%s5624_s11 + $0x70] sm:$0xf] %vm3393_vm1, %v3357_v63  ;;  %v3359_v15 = vpack.c.bf16 %v2876_v11, %v2876_v11  ;;  %v2820_v61 = vpop.f32.mrf.mxu1 }
 0x2a2   : > { %v3355_v8 = vpack.c.bf16 %v2820_v61, %v2820_v61 }
 0x2a3   : > { %3424 = vst.msk [vmem:[%s5624_s11 + $0x78] sm:$0xf] %vm3393_vm1, %v3359_v15 }
 0x2a4   : > { %3420 = vst.msk [vmem:[%s5624_s11 + $0x68] sm:$0xf] %vm3393_vm1, %v3355_v8 }
 0x2a6   : > { %v2850_v43 = vpop.f32.mrf.mxu2 }
 0x2a7   : > { %v3358_v52 = vpack.c.bf16 %v2850_v43, %v2850_v43 }
 0x2a8   : > { %v2878_v31 = vpop.f32.mrf.mxu3  ;;  %v2904_v59 = vpop.f32.mrf.mxu0 }
 0x2a9   : > { %3423 = vst.msk [vmem:[%s5624_s11 + $0x74] sm:$0xf] %vm3393_vm1, %v3358_v52  ;;  %v3360_v40 = vpack.c.bf16 %v2878_v31, %v2878_v31  ;;  %v3361_v42 = vpack.c.bf16 %v2904_v59, %v2904_v59  ;;  %v2822_v60 = vpop.f32.mrf.mxu1 }
 0x2aa   : > { %v3356_v54 = vpack.c.bf16 %v2822_v60, %v2822_v60 }
 0x2ab   : > { %3425 = vst.msk [vmem:[%s5624_s11 + $0x7c] sm:$0xf] %vm3393_vm1, %v3360_v40 }
 0x2ac   : > { %3426 = vst.msk [vmem:[%s5624_s11 + $0x80] sm:$0xf] %vm3393_vm1, %v3361_v42 }
 0x2ad   : > { %3421 = vst.msk [vmem:[%s5624_s11 + $0x6c] sm:$0xf] %vm3393_vm1, %v3356_v54 }
 0x2b0   : > { %v2906_v41 = vpop.f32.mrf.mxu0 }
 0x2b1   : > { %v3362_v3 = vpack.c.bf16 %v2906_v41, %v2906_v41 }
 0x2b2   : > { %v2932_v1 = vpop.f32.mrf.mxu1 }
 0x2b3   : > { %3427 = vst.msk [vmem:[%s5624_s11 + $0x84] sm:$0xf] %vm3393_vm1, %v3362_v3  ;;  %v3363_v28 = vpack.c.bf16 %v2932_v1, %v2932_v1 }
 0x2b5   : > { %3428 = vst.msk [vmem:[%s5624_s11 + $0x88] sm:$0xf] %vm3393_vm1, %v3363_v28 }
 0x2b6   : > { %v2988_v48 = vpop.f32.mrf.mxu3 }
 0x2b7   : > { %v3367_v34 = vpack.c.bf16 %v2988_v48, %v2988_v48  ;;  %v2960_v30 = vpop.f32.mrf.mxu2 }
 0x2b8   : > { %v3365_v16 = vpack.c.bf16 %v2960_v30, %v2960_v30 }
 0x2b9   : > { %3432 = vst.msk [vmem:[%s5624_s11 + $0x98] sm:$0xf] %vm3393_vm1, %v3367_v34 }
 0x2ba   : > { %3430 = vst.msk [vmem:[%s5624_s11 + $0x90] sm:$0xf] %vm3393_vm1, %v3365_v16  ;;  %v2934_v44 = vpop.f32.mrf.mxu1 }
 0x2bb   : > { %v3364_v26 = vpack.c.bf16 %v2934_v44, %v2934_v44 }
 0x2bd   : > { %3429 = vst.msk [vmem:[%s5624_s11 + $0x8c] sm:$0xf] %vm3393_vm1, %v3364_v26 }
 0x2be   : > { %v2990_v39 = vpop.f32.mrf.mxu3 }
 0x2bf   : > { %v3368_v10 = vpack.c.bf16 %v2990_v39, %v2990_v39  ;;  %v2962_v50 = vpop.f32.mrf.mxu2 }
 0x2c0   : > { %v3366_v23 = vpack.c.bf16 %v2962_v50, %v2962_v50 }
 0x2c1   : > { %3433 = vst.msk [vmem:[%s5624_s11 + $0x9c] sm:$0xf] %vm3393_vm1, %v3368_v10 }
 0x2c2   : > { %3431 = vst.msk [vmem:[%s5624_s11 + $0x94] sm:$0xf] %vm3393_vm1, %v3366_v23  ;;  %v3016_v45 = vpop.f32.mrf.mxu0  ;;  %v3044_v57 = vpop.f32.mrf.mxu1 }
 0x2c3   : > { %v3369_v0 = vpack.c.bf16 %v3016_v45, %v3016_v45  ;;  %v3371_v58 = vpack.c.bf16 %v3044_v57, %v3044_v57 }
 0x2c5   : > { %3434 = vst.msk [vmem:[%s5624_s11 + $0xa0] sm:$0xf] %vm3393_vm1, %v3369_v0 }
 0x2c6   : > { %3436 = vst.msk [vmem:[%s5624_s11 + $0xa8] sm:$0xf] %vm3393_vm1, %v3371_v58 }
 0x2ca   : > { %v3018_v5 = vpop.f32.mrf.mxu0  ;;  %v3046_v62 = vpop.f32.mrf.mxu1 }
 0x2cb   : > { %v3370_v9 = vpack.c.bf16 %v3018_v5, %v3018_v5  ;;  %v3372_v27 = vpack.c.bf16 %v3046_v62, %v3046_v62 }
 0x2cd   : > { %3435 = vst.msk [vmem:[%s5624_s11 + $0xa4] sm:$0xf] %vm3393_vm1, %v3370_v9 }
 0x2ce   : > { %3437 = vst.msk [vmem:[%s5624_s11 + $0xac] sm:$0xf] %vm3393_vm1, %v3372_v27  ;;  %v3100_v38 = vpop.f32.mrf.mxu3 }
 0x2cf   : > { %v3375_v49 = vpack.c.bf16 %v3100_v38, %v3100_v38  ;;  %v3072_v32 = vpop.f32.mrf.mxu2 }
 0x2d0   : > { %v3373_v53 = vpack.c.bf16 %v3072_v32, %v3072_v32 }
 0x2d1   : > { %3440 = vst.msk [vmem:[%s5624_s11 + $0xb8] sm:$0xf] %vm3393_vm1, %v3375_v49 }
 0x2d2   : > { %3438 = vst.msk [vmem:[%s5624_s11 + $0xb0] sm:$0xf] %vm3393_vm1, %v3373_v53 }
 0x2d6   : > { %v3102_v29 = vpop.f32.mrf.mxu3 }
 0x2d7   : > { %v3376_v36 = vpack.c.bf16 %v3102_v29, %v3102_v29  ;;  %v3074_v46 = vpop.f32.mrf.mxu2 }
 0x2d8   : > { %v3374_v20 = vpack.c.bf16 %v3074_v46, %v3074_v46 }
 0x2d9   : > { %3441 = vst.msk [vmem:[%s5624_s11 + $0xbc] sm:$0xf] %vm3393_vm1, %v3376_v36  ;;  %v3128_v55 = vpop.f32.mrf.mxu0 }
 0x2da   : > { %3439 = vst.msk [vmem:[%s5624_s11 + $0xb4] sm:$0xf] %vm3393_vm1, %v3374_v20  ;;  %v3377_v18 = vpack.c.bf16 %v3128_v55, %v3128_v55 }
 0x2dc   : > { %3442 = vst.msk [vmem:[%s5624_s11 + $0xc0] sm:$0xf] %vm3393_vm1, %v3377_v18 }
 0x2df   : > { %v3184_v25 = vpop.f32.mrf.mxu2 }
 0x2e0   : > { %v3156_v6 = vpop.f32.mrf.mxu1  ;;  %v3381_v4 = vpack.c.bf16 %v3184_v25, %v3184_v25  ;;  %v3212_v35 = vpop.f32.mrf.mxu3 }
 0x2e1   : > { %v3379_v17 = vpack.c.bf16 %v3156_v6, %v3156_v6  ;;  %v3383_v51 = vpack.c.bf16 %v3212_v35, %v3212_v35  ;;  %v3130_v47 = vpop.f32.mrf.mxu0 }
 0x2e2   : > { %3446 = vst.msk [vmem:[%s5624_s11 + $0xd0] sm:$0xf] %vm3393_vm1, %v3381_v4  ;;  %v3378_v12 = vpack.c.bf16 %v3130_v47, %v3130_v47 }
 0x2e3   : > { %3444 = vst.msk [vmem:[%s5624_s11 + $0xc8] sm:$0xf] %vm3393_vm1, %v3379_v17 }
 0x2e4   : > { %3448 = vst.msk [vmem:[%s5624_s11 + $0xd8] sm:$0xf] %vm3393_vm1, %v3383_v51 }
 0x2e5   : > { %3443 = vst.msk [vmem:[%s5624_s11 + $0xc4] sm:$0xf] %vm3393_vm1, %v3378_v12 }
 0x2e7   : > { %v3186_v7 = vpop.f32.mrf.mxu2 }
 0x2e8   : > { %v3158_v14 = vpop.f32.mrf.mxu1  ;;  %v3382_v21 = vpack.c.bf16 %v3186_v7, %v3186_v7  ;;  %v3214_v13 = vpop.f32.mrf.mxu3 }
 0x2e9   : > { %v3380_v24 = vpack.c.bf16 %v3158_v14, %v3158_v14  ;;  %v3384_v22 = vpack.c.bf16 %v3214_v13, %v3214_v13 }
 0x2ea   : > { %3447 = vst.msk [vmem:[%s5624_s11 + $0xd4] sm:$0xf] %vm3393_vm1, %v3382_v21 }
 0x2eb   : > { %3445 = vst.msk [vmem:[%s5624_s11 + $0xcc] sm:$0xf] %vm3393_vm1, %v3380_v24 }
 0x2ec   : > { %3449 = vst.msk [vmem:[%s5624_s11 + $0xdc] sm:$0xf] %vm3393_vm1, %v3384_v22 }
 0x2f0   : > { %v3240_v33 = vpop.f32.mrf.mxu0  ;;  %v3296_v37 = vpop.f32.mrf.mxu2 }
 0x2f1   : > { %v3385_v2 = vpack.c.bf16 %v3240_v33, %v3240_v33  ;;  %v3389_v19 = vpack.c.bf16 %v3296_v37, %v3296_v37  ;;  %v3324_v56 = vpop.f32.mrf.mxu3 }
 0x2f2   : > { %v3391_v63 = vpack.c.bf16 %v3324_v56, %v3324_v56  ;;  %v3268_v11 = vpop.f32.mrf.mxu1 }
 0x2f3   : > { %3450 = vst.msk [vmem:[%s5624_s11 + $0xe0] sm:$0xf] %vm3393_vm1, %v3385_v2  ;;  %v3387_v15 = vpack.c.bf16 %v3268_v11, %v3268_v11 }
 0x2f4   : > { %3454 = vst.msk [vmem:[%s5624_s11 + $0xf0] sm:$0xf] %vm3393_vm1, %v3389_v19 }
 0x2f5   : > { %3456 = vst.msk [vmem:[%s5624_s11 + $0xf8] sm:$0xf] %vm3393_vm1, %v3391_v63 }
 0x2f6   : > { %3452 = vst.msk [vmem:[%s5624_s11 + $0xe8] sm:$0xf] %vm3393_vm1, %v3387_v15 }
 0x2f8   : > { %v3242_v61 = vpop.f32.mrf.mxu0  ;;  %v3298_v8 = vpop.f32.mrf.mxu2 }
 0x2f9   : > { %v3386_v43 = vpack.c.bf16 %v3242_v61, %v3242_v61  ;;  %v3390_v52 = vpack.c.bf16 %v3298_v8, %v3298_v8  ;;  %v3326_v31 = vpop.f32.mrf.mxu3 }
 0x2fa   : > { %v3392_v59 = vpack.c.bf16 %v3326_v31, %v3326_v31  ;;  %v3270_v40 = vpop.f32.mrf.mxu1 }
 0x2fb   : > { %3451 = vst.msk [vmem:[%s5624_s11 + $0xe4] sm:$0xf] %vm3393_vm1, %v3386_v43  ;;  %v3388_v42 = vpack.c.bf16 %v3270_v40, %v3270_v40 }
 0x2fc   : > { %3455 = vst.msk [vmem:[%s5624_s11 + $0xf4] sm:$0xf] %vm3393_vm1, %v3390_v52 }
 0x2fd   : > { %3457 = vst.msk [vmem:[%s5624_s11 + $0xfc] sm:$0xf] %vm3393_vm1, %v3392_v59 }
 0x2fe   : > { %3453 = vst.msk [vmem:[%s5624_s11 + $0xec] sm:$0xf] %vm3393_vm1, %v3388_v42 }
 0x2ff PF: > { %s15_s18 = sadd.s32 1, %s4377_s18  }
 0x300   : > { %p12_p4 = scmp.ge.s32.totalorder %s15_s18, 4  }
 0x302   :  { %14 = sbr.rel (!%p12_p4) target bundleno = 1 (0x1), region = 76 }

</bundles_post_ra>
